<compile_context>
chip_gen: v5e
topology: v5e:2x2
jax: 0.10.0
libtpu: 0.0.40
codegen_flags: <defaults>
</compile_context>

<pallas_src>
import jax
import jax.numpy as jnp
from jax.experimental import pallas as pl
from jax.experimental.pallas import tpu as pltpu

# ---------------- hyper-parameters (small, consistent with the module forward) ----------------
B = 2              # batch
S = 16             # sequence length
D = 32             # bert hidden size == "in_dim" of Conv2d(1, 1, kernel_size=(3, in_dim))
N_LAYERS = 12      # 12 layers -> 13 hidden states (required by Linear(23, 10) / Linear(46, 10))
N_HEADS = 2
HD = D // N_HEADS
FFN = 64
VOCAB = 64
NUM_CLASSES = 3
DOM_CLASSES = 32
L = N_LAYERS + 1   # 13 hidden states
POOLED = L - 3     # MaxPool1d(kernel=4, stride=1): 13 -> 10
CAT = L + POOLED   # 23
HEAD_HID = 10

NPROG = 2          # encoder-kernel grid width ("parallel" -> both TensorCores on v7x)
N2B = 2 * B        # text and domains batched together
HALF = N2B // NPROG

HP = jax.lax.Precision.HIGHEST   # reference path only


# ---------------- deterministic parameter init ----------------
def _normal(key, shape, scale=0.02):
    return scale * jax.random.normal(key, shape, dtype=jnp.float32)


def init_bert_params(key):
    keys = jax.random.split(key, 4 + N_LAYERS)
    params = {
        "word_emb": _normal(keys[0], (VOCAB, D)),
        "pos_emb": _normal(keys[1], (S, D)),
        "type_emb": _normal(keys[2], (2, D)),
        "emb_ln_g": jnp.ones((D,), jnp.float32),
        "emb_ln_b": jnp.zeros((D,), jnp.float32),
        "layers": [],
    }
    for i in range(N_LAYERS):
        lk = jax.random.split(keys[4 + i], 6)
        params["layers"].append({
            "wq": _normal(lk[0], (D, D)), "bq": jnp.zeros((D,), jnp.float32),
            "wk": _normal(lk[1], (D, D)), "bk": jnp.zeros((D,), jnp.float32),
            "wv": _normal(lk[2], (D, D)), "bv": jnp.zeros((D,), jnp.float32),
            "wo": _normal(lk[3], (D, D)), "bo": jnp.zeros((D,), jnp.float32),
            "w1": _normal(lk[4], (D, FFN)), "b1": jnp.zeros((FFN,), jnp.float32),
            "w2": _normal(lk[5], (FFN, D)), "b2": jnp.zeros((D,), jnp.float32),
            "ln1_g": jnp.ones((D,), jnp.float32), "ln1_b": jnp.zeros((D,), jnp.float32),
            "ln2_g": jnp.ones((D,), jnp.float32), "ln2_b": jnp.zeros((D,), jnp.float32),
        })
    return params


def init_head_params(key):
    # Linear weights are stored as [in, out] (transposed vs torch's [out, in]).
    ks = jax.random.split(key, 10)
    return {
        "conv_w": _normal(ks[0], (3, D), 0.1),            # Conv2d(1, 1, (3, D)) weight
        "conv_b": _normal(ks[1], (), 0.1),                # Conv2d bias (scalar)
        "w1": _normal(ks[2], (CAT, HEAD_HID), 0.1),       # Linear(23, 10)
        "b1": _normal(ks[3], (HEAD_HID,), 0.1),
        "w2": _normal(ks[4], (HEAD_HID, NUM_CLASSES), 0.1),   # Linear(10, 3)
        "b2": _normal(ks[5], (NUM_CLASSES,), 0.1),
        "w3": _normal(ks[6], (2 * CAT, HEAD_HID), 0.1),   # Linear(46, 10)
        "b3": _normal(ks[7], (HEAD_HID,), 0.1),
        "w4": _normal(ks[8], (HEAD_HID, DOM_CLASSES), 0.1),   # Linear(10, 32)
        "b4": _normal(ks[9], (DOM_CLASSES,), 0.1),
    }


# ---------------- shared small math helpers (used by kernel and reference) ----------------
def _layer_norm(x, g, b, eps=1e-12):
    mu = jnp.mean(x, axis=-1, keepdims=True)
    var = jnp.mean(jnp.square(x - mu), axis=-1, keepdims=True)
    return (x - mu) * jax.lax.rsqrt(var + eps) * g + b


def _gelu_tanh(x):
    c = 0.7978845608028654  # sqrt(2/pi)
    return 0.5 * x * (1.0 + jnp.tanh(c * (x + 0.044715 * x * x * x)))


# ---------------- host-side parameter packing (done once, outside jit) ----------------
def pack_encoder_params(bp):
    layers = bp["layers"]
    wqkvo = jnp.stack([jnp.stack([p["wq"], p["wk"], p["wv"], p["wo"]], 0) for p in layers], 0)
    wffn1 = jnp.stack([p["w1"] for p in layers], 0)                     # [12, D, FFN]
    wffn2 = jnp.stack([p["w2"] for p in layers], 0)                     # [12, FFN, D]
    vecs = jnp.stack([jnp.stack([p["bq"], p["bk"], p["bv"], p["bo"], p["b2"],
                                 p["ln1_g"], p["ln1_b"], p["ln2_g"], p["ln2_b"]], 0)
                      for p in layers], 0)                              # [12, 9, D]
    bffn1 = jnp.stack([p["b1"] for p in layers], 0).reshape(N_LAYERS, 1, FFN)
    return {"wqkvo": wqkvo, "wffn1": wffn1, "wffn2": wffn2, "vecs": vecs, "bffn1": bffn1}


def pack_head_params(hp):
    # Conv bias fold: max(conv + cb) == max(conv) + cb, and a +cb offset on every one of the
    # 23 / 46 concatenated features is exactly cb * sum_in(w) added to the linear biases.
    cb = hp["conv_b"]
    w1, w3 = hp["w1"], hp["w3"]
    b1_eff = hp["b1"] + cb * jnp.sum(w1, axis=0)
    b3_eff = hp["b3"] + cb * jnp.sum(w3, axis=0)
    # Fused linear1/linear3: [cat46] @ w13 -> [h1 | h3]  (w1 only sees the first 23 features).
    w13 = jnp.zeros((2 * CAT, 2 * HEAD_HID), jnp.float32)
    w13 = w13.at[0:CAT, 0:HEAD_HID].set(w1)
    w13 = w13.at[:, HEAD_HID:2 * HEAD_HID].set(w3)
    b13 = jnp.concatenate([b1_eff, b3_eff]).reshape(1, 2 * HEAD_HID)
    # Fused, lane-dense linear2/linear4: [h1 | h3] @ wout -> cols 0..2 = l, cols 3..34 = l_dom.
    wout = jnp.zeros((2 * HEAD_HID, 128), jnp.float32)
    wout = wout.at[HEAD_HID:2 * HEAD_HID, 0:NUM_CLASSES].set(hp["w2"])
    wout = wout.at[0:HEAD_HID, NUM_CLASSES:NUM_CLASSES + DOM_CLASSES].set(hp["w4"])
    bout = jnp.zeros((1, 128), jnp.float32)
    bout = bout.at[0, 0:NUM_CLASSES].set(hp["b2"])
    bout = bout.at[0, NUM_CLASSES:NUM_CLASSES + DOM_CLASSES].set(hp["b4"])
    return {"cwt": hp["conv_w"].T, "w13": w13, "b13": b13, "wout": wout, "bout": bout}


# ---------------- plain-JAX glue inside the jit (embedding lookup only) ----------------
def _embed(emb, input_ids, token_type_ids):
    h = (emb["word_emb"][input_ids] + emb["pos_emb"][None, :, :]
         + emb["type_emb"][token_type_ids])
    return _layer_norm(h, emb["emb_ln_g"], emb["emb_ln_b"])


# ---------------- Pallas kernel 1: fused 12-layer encoder + conv(3,D)+max features ----------------
def _encoder_features_kernel(h0_ref, bias_ref, wqkvo_ref, wffn1_ref, wffn2_ref,
                             vecs_ref, bffn1_ref, cwt_ref, xout_ref, hs_ref):
    """One batch-half: run all 12 encoder layers with activations and weights resident in VMEM,
    store the 13 hidden states into the hs_ref scratch, then compute the per-hidden-state
    conv(1,1,(3,D)) + max-over-sequence feature with one MXU matmul over D."""
    h0 = h0_ref[...]                               # [HALF, S, D]
    bias = bias_ref[...]                           # [HALF, S, S] attention mask bias
    hs_ref[0] = h0
    inv_sqrt_hd = 1.0 / float(HD) ** 0.5

    def mm(a, w):
        return jnp.dot(a, w, preferred_element_type=jnp.float32)

    def ln(x, g, b):                               # x: [rows, D], g/b: [1, D]
        mu = jnp.mean(x, axis=-1, keepdims=True)
        var = jnp.mean(jnp.square(x - mu), axis=-1, keepdims=True)
        return (x - mu) * jax.lax.rsqrt(var + 1e-12) * g + b

    def layer_body(i, h2):                         # h2: [HALF*S, D]
        Wl = wqkvo_ref[i]                          # [4, D, D]  (wq, wk, wv, wo)
        Vl = vecs_ref[i]                           # [9, D]     (bq,bk,bv,bo,b2,ln1g,ln1b,ln2g,ln2b)
        W1 = wffn1_ref[i]                          # [D, FFN]
        W2 = wffn2_ref[i]                          # [FFN, D]
        b1 = bffn1_ref[i]                          # [1, FFN]

        q3 = (mm(h2, Wl[0]) + Vl[0:1]).reshape(HALF, S, D)
        k3 = (mm(h2, Wl[1]) + Vl[1:2]).reshape(HALF, S, D)
        v3 = (mm(h2, Wl[2]) + Vl[2:3]).reshape(HALF, S, D)
        wo = Wl[3]

        attn_out = Vl[3:4]                         # start from bo; broadcasts over rows
        for nh in range(N_HEADS):                  # static unroll over the 2 heads
            lo, hi = nh * HD, (nh + 1) * HD
            qh = q3[:, :, lo:hi]
            kh = k3[:, :, lo:hi]
            vh = v3[:, :, lo:hi]
            sc = jnp.einsum("bqd,bkd->bqk", qh, kh,
                            preferred_element_type=jnp.float32) * inv_sqrt_hd + bias
            sc = sc - jnp.max(sc, axis=-1, keepdims=True)
            p = jnp.exp(sc)
            p = p / jnp.sum(p, axis=-1, keepdims=True)
            ctx = jnp.einsum("bqk,bkd->bqd", p, vh,
                             preferred_element_type=jnp.float32)     # [HALF, S, HD]
            # per-head output projection == concat(ctx_heads) @ wo, without a lane concat
            attn_out = attn_out + mm(ctx.reshape(HALF * S, HD), wo[lo:hi, :])

        h2 = ln(h2 + attn_out, Vl[5:6], Vl[6:7])
        ffn = mm(_gelu_tanh(mm(h2, W1) + b1), W2) + Vl[4:5]
        h2 = ln(h2 + ffn, Vl[7:8], Vl[8:9])
        hs_ref[i + 1] = h2.reshape(HALF, S, D)
        return h2

    jax.lax.fori_loop(0, N_LAYERS, layer_body, h0.reshape(HALF * S, D))

    # Conv2d(1, 1, (3, D)) over every hidden state + max over the S-2 valid positions.
    # The D-contraction is one MXU matmul; the 3 kernel taps are selected with a cheap masked
    # 3-lane reduce (avoids single-lane extraction relayouts).  Conv bias is folded into the
    # head biases on the host.
    hs = hs_ref[...]                                               # [L, HALF, S, D]
    c = mm(hs.reshape(L * HALF * S, D), cwt_ref[...])              # [L*HALF*S, 3]
    c = c.reshape(L, HALF, S, 3)
    lane3 = jax.lax.broadcasted_iota(jnp.int32, (1, 1, 1, 3), 3)
    c0 = jnp.sum(jnp.where(lane3 == 0, c, 0.0), axis=-1)           # [L, HALF, S]
    c1 = jnp.sum(jnp.where(lane3 == 1, c, 0.0), axis=-1)
    c2 = jnp.sum(jnp.where(lane3 == 2, c, 0.0), axis=-1)
    conv = c0[:, :, 0:S - 2] + c1[:, :, 1:S - 1] + c2[:, :, 2:S]   # [L, HALF, S-2]
    xout_ref[...] = jnp.max(conv, axis=-1).reshape(1, L, HALF)


# ---------------- Pallas kernel 2: pooled-feature head (2 fused MXU matmuls, lane-dense out) ----
def _head_kernel(xall_ref, w13_ref, b13_ref, wout_ref, bout_ref, out_ref, cat_ref):
    xall = xall_ref[...]                           # [2B, L]: rows 0..B-1 = text, B..2B-1 = domains
    x = xall[0:B, :]
    x_dom = xall[B:2 * B, :]

    def max_pool4(v):                              # MaxPool1d(kernel_size=4, stride=1): [B,13]->[B,10]
        w = L - 3
        out = v[:, 0:w]
        for k in range(1, 4):
            out = jnp.maximum(out, v[:, k:k + w])
        return out

    # cat46 = [x | pool(x_dom) | x_dom | pool(x)]  (== torch cat([cat([x,xpd],1), cat([xd,xp],1)],1))
    cat_ref[:, 0:L] = x
    cat_ref[:, L:CAT] = max_pool4(x_dom)
    cat_ref[:, CAT:CAT + L] = x_dom
    cat_ref[:, CAT + L:2 * CAT] = max_pool4(x)
    cat46 = cat_ref[...]                           # [B, 46]

    # fused linear1 (first 23 features -> H[:, :10]) and linear3 (all 46 -> H[:, 10:20])
    hmid = jnp.maximum(
        jnp.dot(cat46, w13_ref[...], preferred_element_type=jnp.float32) + b13_ref[...], 0.0)
    # GRL is identity in forward; linear2/linear4 packed into one lane-dense [20, 128] weight
    # (cols 0..2 = l, cols 3..34 = l_dom), single unmasked (B, 128) store.
    out_ref[...] = (jnp.dot(hmid, wout_ref[...], preferred_element_type=jnp.float32)
                    + bout_ref[...])


# ---------------- jitted end-to-end forward ----------------
def _replicated_spec(shape):
    nd = len(shape)
    return pl.BlockSpec(shape, lambda i, _nd=nd: (0,) * _nd)


@jax.jit
def bert_multitask_forward(emb_params, enc_packed, head_packed, text, domains, dom_lab):
    """Mirrors BertMultiTaskmodel.forward(text, domains, dom_lab); dom_lab is unused there."""
    del dom_lab
    packed = jnp.concatenate([text, domains], axis=0)              # [2B, 3, S]
    input_ids = packed[:, 0, :]
    input_mask = packed[:, 1, :]
    token_type = packed[:, 2, :]
    h0 = _embed(emb_params, input_ids, token_type)                 # [2B, S, D] hidden_states[0]
    bias = (1.0 - input_mask.astype(jnp.float32)) * -1e9           # [2B, S]
    bias3 = jnp.broadcast_to(bias[:, None, :], (N2B, S, S))

    xall_blocks = pl.pallas_call(
        _encoder_features_kernel,
        out_shape=jax.ShapeDtypeStruct((NPROG, L, HALF), jnp.float32),
        grid=(NPROG,),
        in_specs=[
            pl.BlockSpec((HALF, S, D), lambda i: (i, 0, 0)),       # h0, split over batch halves
            pl.BlockSpec((HALF, S, S), lambda i: (i, 0, 0)),       # attention mask bias
            _replicated_spec((N_LAYERS, 4, D, D)),                 # wq/wk/wv/wo
            _replicated_spec((N_LAYERS, D, FFN)),                  # ffn w1
            _replicated_spec((N_LAYERS, FFN, D)),                  # ffn w2
            _replicated_spec((N_LAYERS, 9, D)),                    # biases + layernorm params
            _replicated_spec((N_LAYERS, 1, FFN)),                  # ffn b1
            _replicated_spec((D, 3)),                              # conv weight (transposed)
        ],
        out_specs=pl.BlockSpec((1, L, HALF), lambda i: (i, 0, 0)),
        scratch_shapes=[pltpu.VMEM((L, HALF, S, D), jnp.float32)],
        compiler_params=pltpu.CompilerParams(dimension_semantics=("parallel",)),
    )(h0, bias3, enc_packed["wqkvo"], enc_packed["wffn1"], enc_packed["wffn2"],
      enc_packed["vecs"], enc_packed["bffn1"], head_packed["cwt"])

    x_all = jnp.transpose(xall_blocks, (0, 2, 1)).reshape(N2B, L)  # [2B, 13] conv-max features

    out_packed = pl.pallas_call(
        _head_kernel,
        out_shape=jax.ShapeDtypeStruct((B, 128), jnp.float32),
        grid=(1,),
        in_specs=[
            _replicated_spec((N2B, L)),
            _replicated_spec((2 * CAT, 2 * HEAD_HID)),
            _replicated_spec((1, 2 * HEAD_HID)),
            _replicated_spec((2 * HEAD_HID, 128)),
            _replicated_spec((1, 128)),
        ],
        out_specs=_replicated_spec((B, 128)),
        scratch_shapes=[pltpu.VMEM((B, 2 * CAT), jnp.float32)],
        compiler_params=pltpu.CompilerParams(dimension_semantics=("arbitrary",)),
    )(x_all, head_packed["w13"], head_packed["b13"], head_packed["wout"], head_packed["bout"])

    l = out_packed[:, 0:NUM_CLASSES]
    l_dom = out_packed[:, NUM_CLASSES:NUM_CLASSES + DOM_CLASSES]
    return l, l_dom


# ---------------- pure-JAX reference (high precision, sanity check) ----------------
def mini_bert_hidden_states(params, input_ids, attention_mask, token_type_ids):
    nb = input_ids.shape[0]
    h = (params["word_emb"][input_ids] + params["pos_emb"][None, :, :]
         + params["type_emb"][token_type_ids])
    h = _layer_norm(h, params["emb_ln_g"], params["emb_ln_b"])
    hidden_states = [h]
    mask_bias = (1.0 - attention_mask[:, None, None, :].astype(jnp.float32)) * -1e9
    hd = D // N_HEADS
    for p in params["layers"]:
        q = jnp.matmul(h, p["wq"], precision=HP) + p["bq"]
        k = jnp.matmul(h, p["wk"], precision=HP) + p["bk"]
        v = jnp.matmul(h, p["wv"], precision=HP) + p["bv"]
        split = lambda t: t.reshape(nb, S, N_HEADS, hd).transpose(0, 2, 1, 3)
        qh, kh, vh = split(q), split(k), split(v)
        scores = (jnp.einsum("bhqd,bhkd->bhqk", qh, kh, precision=HP)
                  / jnp.sqrt(float(hd)) + mask_bias)
        attn = jax.nn.softmax(scores, axis=-1)
        ctx = jnp.einsum("bhqk,bhkd->bhqd", attn, vh,
                         precision=HP).transpose(0, 2, 1, 3).reshape(nb, S, D)
        h = _layer_norm(h + jnp.matmul(ctx, p["wo"], precision=HP) + p["bo"],
                        p["ln1_g"], p["ln1_b"])
        ffn = jnp.matmul(_gelu_tanh(jnp.matmul(h, p["w1"], precision=HP) + p["b1"]),
                         p["w2"], precision=HP) + p["b2"]
        h = _layer_norm(h + ffn, p["ln2_g"], p["ln2_b"])
        hidden_states.append(h)
    return hidden_states


def head_reference(hs_t, hs_d, hp):
    def conv_max(hs):
        c = jnp.einsum("blsd,kd->blsk", hs, hp["conv_w"], precision=HP)
        s = hs.shape[2]
        conv = c[:, :, 0:s - 2, 0] + c[:, :, 1:s - 1, 1] + c[:, :, 2:s, 2] + hp["conv_b"]
        return conv.max(axis=-1)

    x, x_dom = conv_max(hs_t), conv_max(hs_d)

    def pool(v):
        w = v.shape[1] - 3
        return jnp.stack([v[:, k:k + w] for k in range(4)], 0).max(0)

    xp, xpd = pool(x), pool(x_dom)
    xc = jnp.concatenate([x, xpd], 1)
    xdc = jnp.concatenate([x_dom, xp], 1)
    h1 = jax.nn.relu(jnp.matmul(xc, hp["w1"], precision=HP) + hp["b1"])
    l_dom = jnp.matmul(h1, hp["w4"], precision=HP) + hp["b4"]
    h3 = jax.nn.relu(jnp.matmul(jnp.concatenate([xc, xdc], 1), hp["w3"], precision=HP) + hp["b3"])
    l = jnp.matmul(h3, hp["w2"], precision=HP) + hp["b2"]
    return l, l_dom


def reference_forward(bert_params, head_params, text, domains):
    def stack_hs(packed):
        hs = mini_bert_hidden_states(bert_params, packed[:, 0, :], packed[:, 1, :], packed[:, 2, :])
        return jnp.stack(hs, axis=1)                           # [B, L, S, D]
    return head_reference(stack_hs(text), stack_hs(domains), head_params)


# ---------------- main ----------------
if __name__ == "__main__":
    key = jax.random.PRNGKey(0)
    kb, kh, k1, k2, k3 = jax.random.split(key, 5)
    bert_params = init_bert_params(kb)
    head_params = init_head_params(kh)

    emb_params = {k: bert_params[k]
                  for k in ("word_emb", "pos_emb", "type_emb", "emb_ln_g", "emb_ln_b")}
    enc_packed = pack_encoder_params(bert_params)
    head_packed = pack_head_params(head_params)

    def make_packed_input(k):
        ka, kc = jax.random.split(k)
        ids = jax.random.randint(ka, (B, S), 0, VOCAB, dtype=jnp.int32)
        mask = jnp.ones((B, S), dtype=jnp.int32)
        types = jax.random.randint(kc, (B, S), 0, 2, dtype=jnp.int32)
        return jnp.stack([ids, mask, types], axis=1)           # [B, 3, S] like torch `text`

    text = make_packed_input(k1)
    domains = make_packed_input(k2)
    dom_lab = jax.random.randint(k3, (B,), 0, DOM_CLASSES, dtype=jnp.int32)

    l, l_dom = bert_multitask_forward(emb_params, enc_packed, head_packed, text, domains, dom_lab)
    l = jax.block_until_ready(l)
    l_dom = jax.block_until_ready(l_dom)
    assert l.shape == (B, NUM_CLASSES) and l_dom.shape == (B, DOM_CLASSES)

    # sanity check the fused Pallas pipeline against the plain-JAX reference
    l_ref, ldom_ref = jax.jit(reference_forward)(bert_params, head_params, text, domains)
    assert bool(jnp.allclose(l, l_ref, atol=3e-2, rtol=3e-2)), "l mismatch vs reference"
    assert bool(jnp.allclose(l_dom, ldom_ref, atol=3e-2, rtol=3e-2)), "l_dom mismatch vs reference"

    print("KERNEL_OK")
</pallas_src>

<mosaic_0001>
module attributes {stable_mosaic.version = 11 : i64} {
  func.func @_encoder_features_kernel(%arg0: i32, %arg1: memref<2x16x32xf32, #tpu.memory_space<vmem>>, %arg2: memref<2x16x16xf32, #tpu.memory_space<vmem>>, %arg3: memref<12x4x32x32xf32, #tpu.memory_space<vmem>>, %arg4: memref<12x32x64xf32, #tpu.memory_space<vmem>>, %arg5: memref<12x64x32xf32, #tpu.memory_space<vmem>>, %arg6: memref<12x9x32xf32, #tpu.memory_space<vmem>>, %arg7: memref<12x1x64xf32, #tpu.memory_space<vmem>>, %arg8: memref<32x3xf32, #tpu.memory_space<vmem>>, %arg9: memref<1x13x2xf32, #tpu.memory_space<vmem>>, %arg10: memref<13x2x16x32xf32, #tpu.memory_space<vmem>>) attributes {dimension_semantics = [#tpu.dimension_semantics<parallel>], iteration_bounds = array<i64: 2>, scalar_prefetch = 0 : i64, scratch_operands = 1 : i64, tpu.core_type = #tpu.core_type<tc>, window_params = [{transform_indices = @transform_0, window_bounds = array<i64: 2, 16, 32>}, {transform_indices = @transform_1, window_bounds = array<i64: 2, 16, 16>}, {pipeline_mode = #tpu.pipeline_mode<synchronous>, transform_indices = @transform_2, window_bounds = array<i64: 12, 4, 32, 32>}, {pipeline_mode = #tpu.pipeline_mode<synchronous>, transform_indices = @transform_3, window_bounds = array<i64: 12, 32, 64>}, {pipeline_mode = #tpu.pipeline_mode<synchronous>, transform_indices = @transform_4, window_bounds = array<i64: 12, 64, 32>}, {pipeline_mode = #tpu.pipeline_mode<synchronous>, transform_indices = @transform_5, window_bounds = array<i64: 12, 9, 32>}, {pipeline_mode = #tpu.pipeline_mode<synchronous>, transform_indices = @transform_6, window_bounds = array<i64: 12, 1, 64>}, {pipeline_mode = #tpu.pipeline_mode<synchronous>, transform_indices = @transform_7, window_bounds = array<i64: 32, 3>}, {transform_indices = @transform_8, window_bounds = array<i64: 1, 13, 2>}]} {
    %c0 = arith.constant 0 : index
    %c0_0 = arith.constant 0 : index
    %c0_1 = arith.constant 0 : index
    %0 = vector.load %arg1[%c0, %c0_0, %c0_1] : memref<2x16x32xf32, #tpu.memory_space<vmem>>, vector<2x16x32xf32>
    %c0_2 = arith.constant 0 : index
    %c0_3 = arith.constant 0 : index
    %c0_4 = arith.constant 0 : index
    %1 = vector.load %arg2[%c0_2, %c0_3, %c0_4] : memref<2x16x16xf32, #tpu.memory_space<vmem>>, vector<2x16x16xf32>
    %c0_5 = arith.constant 0 : index
    %c0_6 = arith.constant 0 : index
    %c0_7 = arith.constant 0 : index
    %c0_8 = arith.constant 0 : index
    %2 = vector.load %arg10[%c0_5, %c0_6, %c0_7, %c0_8] : memref<13x2x16x32xf32, #tpu.memory_space<vmem>>, vector<1x2x16x32xf32>
    %3 = vector.shape_cast %2 : vector<1x2x16x32xf32> to vector<2x16x32xf32>
    %4 = vector.shape_cast %0 : vector<2x16x32xf32> to vector<1x2x16x32xf32>
    tpu.vector_store %arg10[%c0_5, %c0_6, %c0_7, %c0_8], %4 {strides = array<i32>} : memref<13x2x16x32xf32, #tpu.memory_space<vmem>>, vector<1x2x16x32xf32>,
    %5 = vector.shape_cast %0 : vector<2x16x32xf32> to vector<32x32xf32>
    %c0_i32 = arith.constant 0 : i32
    %c12_i32 = arith.constant 12 : i32
    %6 = arith.addi %c0_i32, %c12_i32 : i32
    %c1_i32 = arith.constant 1 : i32
    %7 = scf.for %arg11 = %c0_i32 to %6 step %c1_i32 iter_args(%arg12 = %5) -> (vector<32x32xf32>)  : i32 {
      %43 = arith.index_cast %arg11 : i32 to index
      %c0_28 = arith.constant 0 : index
      %c0_29 = arith.constant 0 : index
      %c0_30 = arith.constant 0 : index
      %44 = vector.load %arg3[%43, %c0_28, %c0_29, %c0_30] : memref<12x4x32x32xf32, #tpu.memory_space<vmem>>, vector<1x4x32x32xf32>
      %45 = vector.shape_cast %44 : vector<1x4x32x32xf32> to vector<4x32x32xf32>
      %46 = arith.index_cast %arg11 : i32 to index
      %c0_31 = arith.constant 0 : index
      %c0_32 = arith.constant 0 : index
      %47 = vector.load %arg6[%46, %c0_31, %c0_32] : memref<12x9x32xf32, #tpu.memory_space<vmem>>, vector<1x9x32xf32>
      %48 = vector.shape_cast %47 : vector<1x9x32xf32> to vector<9x32xf32>
      %49 = arith.index_cast %arg11 : i32 to index
      %c0_33 = arith.constant 0 : index
      %c0_34 = arith.constant 0 : index
      %50 = vector.load %arg4[%49, %c0_33, %c0_34] : memref<12x32x64xf32, #tpu.memory_space<vmem>>, vector<1x32x64xf32>
      %51 = vector.shape_cast %50 : vector<1x32x64xf32> to vector<32x64xf32>
      %52 = arith.index_cast %arg11 : i32 to index
      %c0_35 = arith.constant 0 : index
      %c0_36 = arith.constant 0 : index
      %53 = vector.load %arg5[%52, %c0_35, %c0_36] : memref<12x64x32xf32, #tpu.memory_space<vmem>>, vector<1x64x32xf32>
      %54 = vector.shape_cast %53 : vector<1x64x32xf32> to vector<64x32xf32>
      %55 = arith.index_cast %arg11 : i32 to index
      %c0_37 = arith.constant 0 : index
      %c0_38 = arith.constant 0 : index
      %56 = vector.load %arg7[%55, %c0_37, %c0_38] : memref<12x1x64xf32, #tpu.memory_space<vmem>>, vector<1x1x64xf32>
      %57 = vector.shape_cast %56 : vector<1x1x64xf32> to vector<1x64xf32>
      %58 = vector.extract_strided_slice %45 {offsets = [0, 0, 0], sizes = [1, 32, 32], strides = [1, 1, 1]} : vector<4x32x32xf32> to vector<1x32x32xf32>
      %59 = vector.shape_cast %58 : vector<1x32x32xf32> to vector<32x32xf32>
      %cst_39 = arith.constant dense<0.000000e+00> : vector<32x32xf32>
      %60 = tpu.matmul %arg12, %59, %cst_39 {dimension_numbers = #tpu.dot_dimension_numbers<[1], [0], [0], [1], [0, 0, 1, 1], [], []>} : vector<32x32xf32>, vector<32x32xf32>, vector<32x32xf32> -> vector<32x32xf32>
      %61 = vector.extract_strided_slice %48 {offsets = [0, 0], sizes = [1, 32], strides = [1, 1]} : vector<9x32xf32> to vector<1x32xf32>
      %62 = vector.broadcast %61 : vector<1x32xf32> to vector<32x32xf32>
      %63 = arith.addf %60, %62 : vector<32x32xf32>
      %64 = vector.shape_cast %63 : vector<32x32xf32> to vector<2x16x32xf32>
      %65 = vector.extract_strided_slice %45 {offsets = [1, 0, 0], sizes = [1, 32, 32], strides = [1, 1, 1]} : vector<4x32x32xf32> to vector<1x32x32xf32>
      %66 = vector.shape_cast %65 : vector<1x32x32xf32> to vector<32x32xf32>
      %cst_40 = arith.constant dense<0.000000e+00> : vector<32x32xf32>
      %67 = tpu.matmul %arg12, %66, %cst_40 {dimension_numbers = #tpu.dot_dimension_numbers<[1], [0], [0], [1], [0, 0, 1, 1], [], []>} : vector<32x32xf32>, vector<32x32xf32>, vector<32x32xf32> -> vector<32x32xf32>
      %68 = vector.extract_strided_slice %48 {offsets = [1, 0], sizes = [1, 32], strides = [1, 1]} : vector<9x32xf32> to vector<1x32xf32>
      %69 = vector.broadcast %68 : vector<1x32xf32> to vector<32x32xf32>
      %70 = arith.addf %67, %69 : vector<32x32xf32>
      %71 = vector.shape_cast %70 : vector<32x32xf32> to vector<2x16x32xf32>
      %72 = vector.extract_strided_slice %45 {offsets = [2, 0, 0], sizes = [1, 32, 32], strides = [1, 1, 1]} : vector<4x32x32xf32> to vector<1x32x32xf32>
      %73 = vector.shape_cast %72 : vector<1x32x32xf32> to vector<32x32xf32>
      %cst_41 = arith.constant dense<0.000000e+00> : vector<32x32xf32>
      %74 = tpu.matmul %arg12, %73, %cst_41 {dimension_numbers = #tpu.dot_dimension_numbers<[1], [0], [0], [1], [0, 0, 1, 1], [], []>} : vector<32x32xf32>, vector<32x32xf32>, vector<32x32xf32> -> vector<32x32xf32>
      %75 = vector.extract_strided_slice %48 {offsets = [2, 0], sizes = [1, 32], strides = [1, 1]} : vector<9x32xf32> to vector<1x32xf32>
      %76 = vector.broadcast %75 : vector<1x32xf32> to vector<32x32xf32>
      %77 = arith.addf %74, %76 : vector<32x32xf32>
      %78 = vector.shape_cast %77 : vector<32x32xf32> to vector<2x16x32xf32>
      %79 = vector.extract_strided_slice %45 {offsets = [3, 0, 0], sizes = [1, 32, 32], strides = [1, 1, 1]} : vector<4x32x32xf32> to vector<1x32x32xf32>
      %80 = vector.shape_cast %79 : vector<1x32x32xf32> to vector<32x32xf32>
      %81 = vector.extract_strided_slice %48 {offsets = [3, 0], sizes = [1, 32], strides = [1, 1]} : vector<9x32xf32> to vector<1x32xf32>
      %82 = vector.extract_strided_slice %64 {offsets = [0, 0, 0], sizes = [2, 16, 16], strides = [1, 1, 1]} : vector<2x16x32xf32> to vector<2x16x16xf32>
      %83 = vector.extract_strided_slice %71 {offsets = [0, 0, 0], sizes = [2, 16, 16], strides = [1, 1, 1]} : vector<2x16x32xf32> to vector<2x16x16xf32>
      %84 = vector.extract_strided_slice %78 {offsets = [0, 0, 0], sizes = [2, 16, 16], strides = [1, 1, 1]} : vector<2x16x32xf32> to vector<2x16x16xf32>
      "tpu.trace_start"() <{level = 10 : i32, message = "bqd,bkd->bqk"}> : () -> ()
      %cst_42 = arith.constant dense<0.000000e+00> : vector<2x16x16xf32>
      %85 = tpu.matmul %82, %83, %cst_42 {dimension_numbers = #tpu.dot_dimension_numbers<[2], [2], [1], [1], [0, 0, 0, 1, 1, 1], [0], [0]>} : vector<2x16x16xf32>, vector<2x16x16xf32>, vector<2x16x16xf32> -> vector<2x16x16xf32>
      "tpu.trace_stop"() : () -> ()
      %cst_43 = arith.constant 2.500000e-01 : f32
      %86 = vector.broadcast %cst_43 : f32 to vector<2x16x16xf32>
      %87 = arith.mulf %85, %86 : vector<2x16x16xf32>
      %88 = arith.addf %87, %1 : vector<2x16x16xf32>
      %cst_44 = arith.constant dense<0xFF800000> : vector<2x16xf32>
      %89 = vector.multi_reduction <maximumf>, %88, %cst_44 [2] : vector<2x16x16xf32> to vector<2x16xf32>
      %90 = vector.shape_cast %89 : vector<2x16xf32> to vector<2x16x1xf32>
      %91 = vector.broadcast %90 : vector<2x16x1xf32> to vector<2x16x16xf32>
      %92 = arith.subf %88, %91 : vector<2x16x16xf32>
      %93 = math.exp %92 : vector<2x16x16xf32>
      %cst_45 = arith.constant dense<0.000000e+00> : vector<2x16xf32>
      %94 = vector.multi_reduction <add>, %93, %cst_45 [2] : vector<2x16x16xf32> to vector<2x16xf32>
      %95 = vector.shape_cast %94 : vector<2x16xf32> to vector<2x16x1xf32>
      %96 = vector.broadcast %95 : vector<2x16x1xf32> to vector<2x16x16xf32>
      %97 = arith.divf %93, %96 : vector<2x16x16xf32>
      "tpu.trace_start"() <{level = 10 : i32, message = "bqk,bkd->bqd"}> : () -> ()
      %cst_46 = arith.constant dense<0.000000e+00> : vector<2x16x16xf32>
      %98 = tpu.matmul %97, %84, %cst_46 {dimension_numbers = #tpu.dot_dimension_numbers<[2], [1], [1], [2], [0, 0, 0, 1, 1, 2], [0], [0]>} : vector<2x16x16xf32>, vector<2x16x16xf32>, vector<2x16x16xf32> -> vector<2x16x16xf32>
      "tpu.trace_stop"() : () -> ()
      %99 = vector.shape_cast %98 : vector<2x16x16xf32> to vector<32x16xf32>
      %100 = vector.extract_strided_slice %80 {offsets = [0, 0], sizes = [16, 32], strides = [1, 1]} : vector<32x32xf32> to vector<16x32xf32>
      %cst_47 = arith.constant dense<0.000000e+00> : vector<32x32xf32>
      %101 = tpu.matmul %99, %100, %cst_47 {dimension_numbers = #tpu.dot_dimension_numbers<[1], [0], [0], [1], [0, 0, 1, 1], [], []>} : vector<32x16xf32>, vector<16x32xf32>, vector<32x32xf32> -> vector<32x32xf32>
      %102 = vector.broadcast %81 : vector<1x32xf32> to vector<32x32xf32>
      %103 = arith.addf %102, %101 : vector<32x32xf32>
      %104 = vector.extract_strided_slice %64 {offsets = [0, 0, 16], sizes = [2, 16, 16], strides = [1, 1, 1]} : vector<2x16x32xf32> to vector<2x16x16xf32>
      %105 = vector.extract_strided_slice %71 {offsets = [0, 0, 16], sizes = [2, 16, 16], strides = [1, 1, 1]} : vector<2x16x32xf32> to vector<2x16x16xf32>
      %106 = vector.extract_strided_slice %78 {offsets = [0, 0, 16], sizes = [2, 16, 16], strides = [1, 1, 1]} : vector<2x16x32xf32> to vector<2x16x16xf32>
      "tpu.trace_start"() <{level = 10 : i32, message = "bqd,bkd->bqk"}> : () -> ()
      %cst_48 = arith.constant dense<0.000000e+00> : vector<2x16x16xf32>
      %107 = tpu.matmul %104, %105, %cst_48 {dimension_numbers = #tpu.dot_dimension_numbers<[2], [2], [1], [1], [0, 0, 0, 1, 1, 1], [0], [0]>} : vector<2x16x16xf32>, vector<2x16x16xf32>, vector<2x16x16xf32> -> vector<2x16x16xf32>
      "tpu.trace_stop"() : () -> ()
      %cst_49 = arith.constant 2.500000e-01 : f32
      %108 = vector.broadcast %cst_49 : f32 to vector<2x16x16xf32>
      %109 = arith.mulf %107, %108 : vector<2x16x16xf32>
      %110 = arith.addf %109, %1 : vector<2x16x16xf32>
      %cst_50 = arith.constant dense<0xFF800000> : vector<2x16xf32>
      %111 = vector.multi_reduction <maximumf>, %110, %cst_50 [2] : vector<2x16x16xf32> to vector<2x16xf32>
      %112 = vector.shape_cast %111 : vector<2x16xf32> to vector<2x16x1xf32>
      %113 = vector.broadcast %112 : vector<2x16x1xf32> to vector<2x16x16xf32>
      %114 = arith.subf %110, %113 : vector<2x16x16xf32>
      %115 = math.exp %114 : vector<2x16x16xf32>
      %cst_51 = arith.constant dense<0.000000e+00> : vector<2x16xf32>
      %116 = vector.multi_reduction <add>, %115, %cst_51 [2] : vector<2x16x16xf32> to vector<2x16xf32>
      %117 = vector.shape_cast %116 : vector<2x16xf32> to vector<2x16x1xf32>
      %118 = vector.broadcast %117 : vector<2x16x1xf32> to vector<2x16x16xf32>
      %119 = arith.divf %115, %118 : vector<2x16x16xf32>
      "tpu.trace_start"() <{level = 10 : i32, message = "bqk,bkd->bqd"}> : () -> ()
      %cst_52 = arith.constant dense<0.000000e+00> : vector<2x16x16xf32>
      %120 = tpu.matmul %119, %106, %cst_52 {dimension_numbers = #tpu.dot_dimension_numbers<[2], [1], [1], [2], [0, 0, 0, 1, 1, 2], [0], [0]>} : vector<2x16x16xf32>, vector<2x16x16xf32>, vector<2x16x16xf32> -> vector<2x16x16xf32>
      "tpu.trace_stop"() : () -> ()
      %121 = vector.shape_cast %120 : vector<2x16x16xf32> to vector<32x16xf32>
      %122 = vector.extract_strided_slice %80 {offsets = [16, 0], sizes = [16, 32], strides = [1, 1]} : vector<32x32xf32> to vector<16x32xf32>
      %cst_53 = arith.constant dense<0.000000e+00> : vector<32x32xf32>
      %123 = tpu.matmul %121, %122, %cst_53 {dimension_numbers = #tpu.dot_dimension_numbers<[1], [0], [0], [1], [0, 0, 1, 1], [], []>} : vector<32x16xf32>, vector<16x32xf32>, vector<32x32xf32> -> vector<32x32xf32>
      %124 = arith.addf %103, %123 : vector<32x32xf32>
      %125 = arith.addf %arg12, %124 : vector<32x32xf32>
      %126 = vector.extract_strided_slice %48 {offsets = [5, 0], sizes = [1, 32], strides = [1, 1]} : vector<9x32xf32> to vector<1x32xf32>
      %127 = vector.extract_strided_slice %48 {offsets = [6, 0], sizes = [1, 32], strides = [1, 1]} : vector<9x32xf32> to vector<1x32xf32>
      %cst_54 = arith.constant dense<0.000000e+00> : vector<32xf32>
      %128 = vector.multi_reduction <add>, %125, %cst_54 [1] : vector<32x32xf32> to vector<32xf32>
      %129 = vector.shape_cast %128 : vector<32xf32> to vector<32x1xf32>
      %cst_55 = arith.constant 3.200000e+01 : f32
      %130 = vector.broadcast %cst_55 : f32 to vector<32x1xf32>
      %131 = arith.divf %129, %130 : vector<32x1xf32>
      %132 = vector.broadcast %131 : vector<32x1xf32> to vector<32x32xf32>
      %133 = arith.subf %125, %132 : vector<32x32xf32>
      %134 = arith.mulf %133, %133 : vector<32x32xf32>
      %cst_56 = arith.constant dense<0.000000e+00> : vector<32xf32>
      %135 = vector.multi_reduction <add>, %134, %cst_56 [1] : vector<32x32xf32> to vector<32xf32>
      %136 = vector.shape_cast %135 : vector<32xf32> to vector<32x1xf32>
      %cst_57 = arith.constant 3.200000e+01 : f32
      %137 = vector.broadcast %cst_57 : f32 to vector<32x1xf32>
      %138 = arith.divf %136, %137 : vector<32x1xf32>
      %139 = vector.broadcast %131 : vector<32x1xf32> to vector<32x32xf32>
      %140 = arith.subf %125, %139 : vector<32x32xf32>
      %cst_58 = arith.constant 9.99999996E-13 : f32
      %141 = vector.broadcast %cst_58 : f32 to vector<32x1xf32>
      %142 = arith.addf %138, %141 : vector<32x1xf32>
      %143 = math.rsqrt %142 : vector<32x1xf32>
      %144 = vector.broadcast %143 : vector<32x1xf32> to vector<32x32xf32>
      %145 = arith.mulf %140, %144 : vector<32x32xf32>
      %146 = vector.broadcast %126 : vector<1x32xf32> to vector<32x32xf32>
      %147 = arith.mulf %145, %146 : vector<32x32xf32>
      %148 = vector.broadcast %127 : vector<1x32xf32> to vector<32x32xf32>
      %149 = arith.addf %147, %148 : vector<32x32xf32>
      %cst_59 = arith.constant dense<0.000000e+00> : vector<32x64xf32>
      %150 = tpu.matmul %149, %51, %cst_59 {dimension_numbers = #tpu.dot_dimension_numbers<[1], [0], [0], [1], [0, 0, 1, 1], [], []>} : vector<32x32xf32>, vector<32x64xf32>, vector<32x64xf32> -> vector<32x64xf32>
      %151 = vector.broadcast %57 : vector<1x64xf32> to vector<32x64xf32>
      %152 = arith.addf %150, %151 : vector<32x64xf32>
      %cst_60 = arith.constant 5.000000e-01 : f32
      %153 = vector.broadcast %cst_60 : f32 to vector<32x64xf32>
      %154 = arith.mulf %153, %152 : vector<32x64xf32>
      %cst_61 = arith.constant 4.471500e-02 : f32
      %155 = vector.broadcast %cst_61 : f32 to vector<32x64xf32>
      %156 = arith.mulf %155, %152 : vector<32x64xf32>
      %157 = arith.mulf %156, %152 : vector<32x64xf32>
      %158 = arith.mulf %157, %152 : vector<32x64xf32>
      %159 = arith.addf %152, %158 : vector<32x64xf32>
      %cst_62 = arith.constant 0.797884583 : f32
      %160 = vector.broadcast %cst_62 : f32 to vector<32x64xf32>
      %161 = arith.mulf %160, %159 : vector<32x64xf32>
      %162 = math.tanh %161 : vector<32x64xf32>
      %cst_63 = arith.constant 1.000000e+00 : f32
      %163 = vector.broadcast %cst_63 : f32 to vector<32x64xf32>
      %164 = arith.addf %163, %162 : vector<32x64xf32>
      %165 = arith.mulf %154, %164 : vector<32x64xf32>
      %cst_64 = arith.constant dense<0.000000e+00> : vector<32x32xf32>
      %166 = tpu.matmul %165, %54, %cst_64 {dimension_numbers = #tpu.dot_dimension_numbers<[1], [0], [0], [1], [0, 0, 1, 1], [], []>} : vector<32x64xf32>, vector<64x32xf32>, vector<32x32xf32> -> vector<32x32xf32>
      %167 = vector.extract_strided_slice %48 {offsets = [4, 0], sizes = [1, 32], strides = [1, 1]} : vector<9x32xf32> to vector<1x32xf32>
      %168 = vector.broadcast %167 : vector<1x32xf32> to vector<32x32xf32>
      %169 = arith.addf %166, %168 : vector<32x32xf32>
      %170 = arith.addf %149, %169 : vector<32x32xf32>
      %171 = vector.extract_strided_slice %48 {offsets = [7, 0], sizes = [1, 32], strides = [1, 1]} : vector<9x32xf32> to vector<1x32xf32>
      %172 = vector.extract_strided_slice %48 {offsets = [8, 0], sizes = [1, 32], strides = [1, 1]} : vector<9x32xf32> to vector<1x32xf32>
      %cst_65 = arith.constant dense<0.000000e+00> : vector<32xf32>
      %173 = vector.multi_reduction <add>, %170, %cst_65 [1] : vector<32x32xf32> to vector<32xf32>
      %174 = vector.shape_cast %173 : vector<32xf32> to vector<32x1xf32>
      %cst_66 = arith.constant 3.200000e+01 : f32
      %175 = vector.broadcast %cst_66 : f32 to vector<32x1xf32>
      %176 = arith.divf %174, %175 : vector<32x1xf32>
      %177 = vector.broadcast %176 : vector<32x1xf32> to vector<32x32xf32>
      %178 = arith.subf %170, %177 : vector<32x32xf32>
      %179 = arith.mulf %178, %178 : vector<32x32xf32>
      %cst_67 = arith.constant dense<0.000000e+00> : vector<32xf32>
      %180 = vector.multi_reduction <add>, %179, %cst_67 [1] : vector<32x32xf32> to vector<32xf32>
      %181 = vector.shape_cast %180 : vector<32xf32> to vector<32x1xf32>
      %cst_68 = arith.constant 3.200000e+01 : f32
      %182 = vector.broadcast %cst_68 : f32 to vector<32x1xf32>
      %183 = arith.divf %181, %182 : vector<32x1xf32>
      %184 = vector.broadcast %176 : vector<32x1xf32> to vector<32x32xf32>
      %185 = arith.subf %170, %184 : vector<32x32xf32>
      %cst_69 = arith.constant 9.99999996E-13 : f32
      %186 = vector.broadcast %cst_69 : f32 to vector<32x1xf32>
      %187 = arith.addf %183, %186 : vector<32x1xf32>
      %188 = math.rsqrt %187 : vector<32x1xf32>
      %189 = vector.broadcast %188 : vector<32x1xf32> to vector<32x32xf32>
      %190 = arith.mulf %185, %189 : vector<32x32xf32>
      %191 = vector.broadcast %171 : vector<1x32xf32> to vector<32x32xf32>
      %192 = arith.mulf %190, %191 : vector<32x32xf32>
      %193 = vector.broadcast %172 : vector<1x32xf32> to vector<32x32xf32>
      %194 = arith.addf %192, %193 : vector<32x32xf32>
      %195 = vector.shape_cast %194 : vector<32x32xf32> to vector<2x16x32xf32>
      %c1_i32_70 = arith.constant 1 : i32
      %196 = arith.addi %arg11, %c1_i32_70 : i32
      %197 = arith.index_cast %196 : i32 to index
      %c0_71 = arith.constant 0 : index
      %c0_72 = arith.constant 0 : index
      %c0_73 = arith.constant 0 : index
      %198 = vector.load %arg10[%197, %c0_71, %c0_72, %c0_73] : memref<13x2x16x32xf32, #tpu.memory_space<vmem>>, vector<1x2x16x32xf32>
      %199 = vector.shape_cast %198 : vector<1x2x16x32xf32> to vector<2x16x32xf32>
      %200 = vector.shape_cast %195 : vector<2x16x32xf32> to vector<1x2x16x32xf32>
      tpu.vector_store %arg10[%197, %c0_71, %c0_72, %c0_73], %200 {strides = array<i32>} : memref<13x2x16x32xf32, #tpu.memory_space<vmem>>, vector<1x2x16x32xf32>,
      scf.yield %194 : vector<32x32xf32>
    }
    %c12_i32_9 = arith.constant 12 : i32
    %c0_10 = arith.constant 0 : index
    %c0_11 = arith.constant 0 : index
    %c0_12 = arith.constant 0 : index
    %c0_13 = arith.constant 0 : index
    %8 = vector.load %arg10[%c0_10, %c0_11, %c0_12, %c0_13] : memref<13x2x16x32xf32, #tpu.memory_space<vmem>>, vector<13x2x16x32xf32>
    %9 = vector.shape_cast %8 : vector<13x2x16x32xf32> to vector<416x32xf32>
    %c0_14 = arith.constant 0 : index
    %c0_15 = arith.constant 0 : index
    %10 = vector.load %arg8[%c0_14, %c0_15] : memref<32x3xf32, #tpu.memory_space<vmem>>, vector<32x3xf32>
    %cst = arith.constant dense<0.000000e+00> : vector<416x3xf32>
    %11 = tpu.matmul %9, %10, %cst {dimension_numbers = #tpu.dot_dimension_numbers<[1], [0], [0], [1], [0, 0, 1, 1], [], []>} : vector<416x32xf32>, vector<32x3xf32>, vector<416x3xf32> -> vector<416x3xf32>
    %12 = vector.shape_cast %11 : vector<416x3xf32> to vector<13x2x16x3xf32>
    %13 = tpu.iota {dimensions = array<i32: 3>} : vector<1x1x1x3xi32>
    %c0_i32_16 = arith.constant 0 : i32
    %14 = vector.broadcast %c0_i32_16 : i32 to vector<1x1x1x3xi32>
    %15 = arith.cmpi eq, %13, %14 : vector<1x1x1x3xi32>
    %cst_17 = arith.constant 0.000000e+00 : f32
    %16 = vector.shape_cast %15 : vector<1x1x1x3xi1> to vector<1x1x1x3xi1>
    %17 = vector.broadcast %16 : vector<1x1x1x3xi1> to vector<13x2x16x3xi1>
    %18 = vector.broadcast %cst_17 : f32 to vector<13x2x16x3xf32>
    %19 = arith.select %17, %12, %18 : vector<13x2x16x3xi1>, vector<13x2x16x3xf32>
    %cst_18 = arith.constant dense<0.000000e+00> : vector<13x2x16xf32>
    %20 = vector.multi_reduction <add>, %19, %cst_18 [3] : vector<13x2x16x3xf32> to vector<13x2x16xf32>
    %c1_i32_19 = arith.constant 1 : i32
    %21 = vector.broadcast %c1_i32_19 : i32 to vector<1x1x1x3xi32>
    %22 = arith.cmpi eq, %13, %21 : vector<1x1x1x3xi32>
    %cst_20 = arith.constant 0.000000e+00 : f32
    %23 = vector.shape_cast %22 : vector<1x1x1x3xi1> to vector<1x1x1x3xi1>
    %24 = vector.broadcast %23 : vector<1x1x1x3xi1> to vector<13x2x16x3xi1>
    %25 = vector.broadcast %cst_20 : f32 to vector<13x2x16x3xf32>
    %26 = arith.select %24, %12, %25 : vector<13x2x16x3xi1>, vector<13x2x16x3xf32>
    %cst_21 = arith.constant dense<0.000000e+00> : vector<13x2x16xf32>
    %27 = vector.multi_reduction <add>, %26, %cst_21 [3] : vector<13x2x16x3xf32> to vector<13x2x16xf32>
    %c2_i32 = arith.constant 2 : i32
    %28 = vector.broadcast %c2_i32 : i32 to vector<1x1x1x3xi32>
    %29 = arith.cmpi eq, %13, %28 : vector<1x1x1x3xi32>
    %cst_22 = arith.constant 0.000000e+00 : f32
    %30 = vector.shape_cast %29 : vector<1x1x1x3xi1> to vector<1x1x1x3xi1>
    %31 = vector.broadcast %30 : vector<1x1x1x3xi1> to vector<13x2x16x3xi1>
    %32 = vector.broadcast %cst_22 : f32 to vector<13x2x16x3xf32>
    %33 = arith.select %31, %12, %32 : vector<13x2x16x3xi1>, vector<13x2x16x3xf32>
    %cst_23 = arith.constant dense<0.000000e+00> : vector<13x2x16xf32>
    %34 = vector.multi_reduction <add>, %33, %cst_23 [3] : vector<13x2x16x3xf32> to vector<13x2x16xf32>
    %35 = vector.extract_strided_slice %20 {offsets = [0, 0, 0], sizes = [13, 2, 14], strides = [1, 1, 1]} : vector<13x2x16xf32> to vector<13x2x14xf32>
    %36 = vector.extract_strided_slice %27 {offsets = [0, 0, 1], sizes = [13, 2, 14], strides = [1, 1, 1]} : vector<13x2x16xf32> to vector<13x2x14xf32>
    %37 = arith.addf %35, %36 : vector<13x2x14xf32>
    %38 = vector.extract_strided_slice %34 {offsets = [0, 0, 2], sizes = [13, 2, 14], strides = [1, 1, 1]} : vector<13x2x16xf32> to vector<13x2x14xf32>
    %39 = arith.addf %37, %38 : vector<13x2x14xf32>
    %cst_24 = arith.constant dense<0xFF800000> : vector<13x2xf32>
    %40 = vector.multi_reduction <maximumf>, %39, %cst_24 [2] : vector<13x2x14xf32> to vector<13x2xf32>
    %41 = vector.shape_cast %40 : vector<13x2xf32> to vector<1x13x2xf32>
    %c0_25 = arith.constant 0 : index
    %c0_26 = arith.constant 0 : index
    %c0_27 = arith.constant 0 : index
    %42 = vector.load %arg9[%c0_25, %c0_26, %c0_27] : memref<1x13x2xf32, #tpu.memory_space<vmem>>, vector<1x13x2xf32>
    tpu.vector_store %arg9[%c0_25, %c0_26, %c0_27], %41 {strides = array<i32>} : memref<1x13x2xf32, #tpu.memory_space<vmem>>, vector<1x13x2xf32>,
    return
  }
  func.func @transform_0(%arg0: i32) -> (i32, i32, i32) {
    %c0_i32 = arith.constant 0 : i32
    %c0_i32_0 = arith.constant 0 : i32
    %c0_i32_1 = arith.constant 0 : i32
    return %arg0, %c0_i32, %c0_i32_0 : i32, i32, i32
  }
  func.func @transform_1(%arg0: i32) -> (i32, i32, i32) {
    %c0_i32 = arith.constant 0 : i32
    %c0_i32_0 = arith.constant 0 : i32
    %c0_i32_1 = arith.constant 0 : i32
    return %arg0, %c0_i32, %c0_i32_0 : i32, i32, i32
  }
  func.func @transform_2(%arg0: i32) -> (i32, i32, i32, i32) {
    %c0_i32 = arith.constant 0 : i32
    %c0_i32_0 = arith.constant 0 : i32
    %c0_i32_1 = arith.constant 0 : i32
    %c0_i32_2 = arith.constant 0 : i32
    %c0_i32_3 = arith.constant 0 : i32
    return %c0_i32, %c0_i32_0, %c0_i32_1, %c0_i32_2 : i32, i32, i32, i32
  }
  func.func @transform_3(%arg0: i32) -> (i32, i32, i32) {
    %c0_i32 = arith.constant 0 : i32
    %c0_i32_0 = arith.constant 0 : i32
    %c0_i32_1 = arith.constant 0 : i32
    %c0_i32_2 = arith.constant 0 : i32
    return %c0_i32, %c0_i32_0, %c0_i32_1 : i32, i32, i32
  }
  func.func @transform_4(%arg0: i32) -> (i32, i32, i32) {
    %c0_i32 = arith.constant 0 : i32
    %c0_i32_0 = arith.constant 0 : i32
    %c0_i32_1 = arith.constant 0 : i32
    %c0_i32_2 = arith.constant 0 : i32
    return %c0_i32, %c0_i32_0, %c0_i32_1 : i32, i32, i32
  }
  func.func @transform_5(%arg0: i32) -> (i32, i32, i32) {
    %c0_i32 = arith.constant 0 : i32
    %c0_i32_0 = arith.constant 0 : i32
    %c0_i32_1 = arith.constant 0 : i32
    %c0_i32_2 = arith.constant 0 : i32
    return %c0_i32, %c0_i32_0, %c0_i32_1 : i32, i32, i32
  }
  func.func @transform_6(%arg0: i32) -> (i32, i32, i32) {
    %c0_i32 = arith.constant 0 : i32
    %c0_i32_0 = arith.constant 0 : i32
    %c0_i32_1 = arith.constant 0 : i32
    %c0_i32_2 = arith.constant 0 : i32
    return %c0_i32, %c0_i32_0, %c0_i32_1 : i32, i32, i32
  }
  func.func @transform_7(%arg0: i32) -> (i32, i32) {
    %c0_i32 = arith.constant 0 : i32
    %c0_i32_0 = arith.constant 0 : i32
    %c0_i32_1 = arith.constant 0 : i32
    return %c0_i32, %c0_i32_0 : i32, i32
  }
  func.func @transform_8(%arg0: i32) -> (i32, i32, i32) {
    %c0_i32 = arith.constant 0 : i32
    %c0_i32_0 = arith.constant 0 : i32
    %c0_i32_1 = arith.constant 0 : i32
    return %arg0, %c0_i32, %c0_i32_0 : i32, i32, i32
  }
}

module attributes {stable_mosaic.version = 11 : i64} {
  func.func @_head_kernel(%arg0: i32, %arg1: memref<4x13xf32, #tpu.memory_space<vmem>>, %arg2: memref<46x20xf32, #tpu.memory_space<vmem>>, %arg3: memref<1x20xf32, #tpu.memory_space<vmem>>, %arg4: memref<20x128xf32, #tpu.memory_space<vmem>>, %arg5: memref<1x128xf32, #tpu.memory_space<vmem>>, %arg6: memref<2x128xf32, #tpu.memory_space<vmem>>, %arg7: memref<2x46xf32, #tpu.memory_space<vmem>>) attributes {dimension_semantics = [#tpu.dimension_semantics<arbitrary>], iteration_bounds = array<i64: 1>, scalar_prefetch = 0 : i64, scratch_operands = 1 : i64, tpu.core_type = #tpu.core_type<tc>, window_params = [{pipeline_mode = #tpu.pipeline_mode<synchronous>, transform_indices = @transform_0, window_bounds = array<i64: 4, 13>}, {pipeline_mode = #tpu.pipeline_mode<synchronous>, transform_indices = @transform_1, window_bounds = array<i64: 46, 20>}, {pipeline_mode = #tpu.pipeline_mode<synchronous>, transform_indices = @transform_2, window_bounds = array<i64: 1, 20>}, {pipeline_mode = #tpu.pipeline_mode<synchronous>, transform_indices = @transform_3, window_bounds = array<i64: 20, 128>}, {pipeline_mode = #tpu.pipeline_mode<synchronous>, transform_indices = @transform_4, window_bounds = array<i64: 1, 128>}, {pipeline_mode = #tpu.pipeline_mode<synchronous>, transform_indices = @transform_5, window_bounds = array<i64: 2, 128>}]} {
    %c0 = arith.constant 0 : index
    %c0_0 = arith.constant 0 : index
    %0 = vector.load %arg1[%c0, %c0_0] : memref<4x13xf32, #tpu.memory_space<vmem>>, vector<4x13xf32>
    %1 = vector.extract_strided_slice %0 {offsets = [0, 0], sizes = [2, 13], strides = [1, 1]} : vector<4x13xf32> to vector<2x13xf32>
    %2 = vector.extract_strided_slice %0 {offsets = [2, 0], sizes = [2, 13], strides = [1, 1]} : vector<4x13xf32> to vector<2x13xf32>
    %c0_1 = arith.constant 0 : index
    %c0_2 = arith.constant 0 : index
    %3 = vector.load %arg7[%c0_1, %c0_2] : memref<2x46xf32, #tpu.memory_space<vmem>>, vector<2x13xf32>
    tpu.vector_store %arg7[%c0_1, %c0_2], %1 {strides = array<i32>} : memref<2x46xf32, #tpu.memory_space<vmem>>, vector<2x13xf32>,
    %4 = vector.extract_strided_slice %2 {offsets = [0, 0], sizes = [2, 10], strides = [1, 1]} : vector<2x13xf32> to vector<2x10xf32>
    %5 = vector.extract_strided_slice %2 {offsets = [0, 1], sizes = [2, 10], strides = [1, 1]} : vector<2x13xf32> to vector<2x10xf32>
    %6 = arith.maximumf %4, %5 : vector<2x10xf32>
    %7 = vector.extract_strided_slice %2 {offsets = [0, 2], sizes = [2, 10], strides = [1, 1]} : vector<2x13xf32> to vector<2x10xf32>
    %8 = arith.maximumf %6, %7 : vector<2x10xf32>
    %9 = vector.extract_strided_slice %2 {offsets = [0, 3], sizes = [2, 10], strides = [1, 1]} : vector<2x13xf32> to vector<2x10xf32>
    %10 = arith.maximumf %8, %9 : vector<2x10xf32>
    %c0_3 = arith.constant 0 : index
    %c13 = arith.constant 13 : index
    %11 = vector.load %arg7[%c0_3, %c13] : memref<2x46xf32, #tpu.memory_space<vmem>>, vector<2x10xf32>
    tpu.vector_store %arg7[%c0_3, %c13], %10 {strides = array<i32>} : memref<2x46xf32, #tpu.memory_space<vmem>>, vector<2x10xf32>,
    %c0_4 = arith.constant 0 : index
    %c23 = arith.constant 23 : index
    %12 = vector.load %arg7[%c0_4, %c23] : memref<2x46xf32, #tpu.memory_space<vmem>>, vector<2x13xf32>
    tpu.vector_store %arg7[%c0_4, %c23], %2 {strides = array<i32>} : memref<2x46xf32, #tpu.memory_space<vmem>>, vector<2x13xf32>,
    %13 = vector.extract_strided_slice %1 {offsets = [0, 0], sizes = [2, 10], strides = [1, 1]} : vector<2x13xf32> to vector<2x10xf32>
    %14 = vector.extract_strided_slice %1 {offsets = [0, 1], sizes = [2, 10], strides = [1, 1]} : vector<2x13xf32> to vector<2x10xf32>
    %15 = arith.maximumf %13, %14 : vector<2x10xf32>
    %16 = vector.extract_strided_slice %1 {offsets = [0, 2], sizes = [2, 10], strides = [1, 1]} : vector<2x13xf32> to vector<2x10xf32>
    %17 = arith.maximumf %15, %16 : vector<2x10xf32>
    %18 = vector.extract_strided_slice %1 {offsets = [0, 3], sizes = [2, 10], strides = [1, 1]} : vector<2x13xf32> to vector<2x10xf32>
    %19 = arith.maximumf %17, %18 : vector<2x10xf32>
    %c0_5 = arith.constant 0 : index
    %c36 = arith.constant 36 : index
    %20 = vector.load %arg7[%c0_5, %c36] : memref<2x46xf32, #tpu.memory_space<vmem>>, vector<2x10xf32>
    tpu.vector_store %arg7[%c0_5, %c36], %19 {strides = array<i32>} : memref<2x46xf32, #tpu.memory_space<vmem>>, vector<2x10xf32>,
    %c0_6 = arith.constant 0 : index
    %c0_7 = arith.constant 0 : index
    %21 = vector.load %arg7[%c0_6, %c0_7] : memref<2x46xf32, #tpu.memory_space<vmem>>, vector<2x46xf32>
    %c0_8 = arith.constant 0 : index
    %c0_9 = arith.constant 0 : index
    %22 = vector.load %arg2[%c0_8, %c0_9] : memref<46x20xf32, #tpu.memory_space<vmem>>, vector<46x20xf32>
    %cst = arith.constant dense<0.000000e+00> : vector<2x20xf32>
    %23 = tpu.matmul %21, %22, %cst {dimension_numbers = #tpu.dot_dimension_numbers<[1], [0], [0], [1], [0, 0, 1, 1], [], []>} : vector<2x46xf32>, vector<46x20xf32>, vector<2x20xf32> -> vector<2x20xf32>
    %c0_10 = arith.constant 0 : index
    %c0_11 = arith.constant 0 : index
    %24 = vector.load %arg3[%c0_10, %c0_11] : memref<1x20xf32, #tpu.memory_space<vmem>>, vector<1x20xf32>
    %25 = vector.broadcast %24 : vector<1x20xf32> to vector<2x20xf32>
    %26 = arith.addf %23, %25 : vector<2x20xf32>
    %cst_12 = arith.constant 0.000000e+00 : f32
    %27 = vector.broadcast %cst_12 : f32 to vector<2x20xf32>
    %28 = arith.maximumf %26, %27 : vector<2x20xf32>
    %c0_13 = arith.constant 0 : index
    %c0_14 = arith.constant 0 : index
    %29 = vector.load %arg4[%c0_13, %c0_14] : memref<20x128xf32, #tpu.memory_space<vmem>>, vector<20x128xf32>
    %cst_15 = arith.constant dense<0.000000e+00> : vector<2x128xf32>
    %30 = tpu.matmul %28, %29, %cst_15 {dimension_numbers = #tpu.dot_dimension_numbers<[1], [0], [0], [1], [0, 0, 1, 1], [], []>} : vector<2x20xf32>, vector<20x128xf32>, vector<2x128xf32> -> vector<2x128xf32>
    %c0_16 = arith.constant 0 : index
    %c0_17 = arith.constant 0 : index
    %31 = vector.load %arg5[%c0_16, %c0_17] : memref<1x128xf32, #tpu.memory_space<vmem>>, vector<1x128xf32>
    %32 = vector.broadcast %31 : vector<1x128xf32> to vector<2x128xf32>
    %33 = arith.addf %30, %32 : vector<2x128xf32>
    %c0_18 = arith.constant 0 : index
    %c0_19 = arith.constant 0 : index
    %34 = vector.load %arg6[%c0_18, %c0_19] : memref<2x128xf32, #tpu.memory_space<vmem>>, vector<2x128xf32>
    tpu.vector_store %arg6[%c0_18, %c0_19], %33 {strides = array<i32>} : memref<2x128xf32, #tpu.memory_space<vmem>>, vector<2x128xf32>,
    return
  }
  func.func @transform_0(%arg0: i32) -> (i32, i32) {
    %c0_i32 = arith.constant 0 : i32
    %c0_i32_0 = arith.constant 0 : i32
    %c0_i32_1 = arith.constant 0 : i32
    return %c0_i32, %c0_i32_0 : i32, i32
  }
  func.func @transform_1(%arg0: i32) -> (i32, i32) {
    %c0_i32 = arith.constant 0 : i32
    %c0_i32_0 = arith.constant 0 : i32
    %c0_i32_1 = arith.constant 0 : i32
    return %c0_i32, %c0_i32_0 : i32, i32
  }
  func.func @transform_2(%arg0: i32) -> (i32, i32) {
    %c0_i32 = arith.constant 0 : i32
    %c0_i32_0 = arith.constant 0 : i32
    %c0_i32_1 = arith.constant 0 : i32
    return %c0_i32, %c0_i32_0 : i32, i32
  }
  func.func @transform_3(%arg0: i32) -> (i32, i32) {
    %c0_i32 = arith.constant 0 : i32
    %c0_i32_0 = arith.constant 0 : i32
    %c0_i32_1 = arith.constant 0 : i32
    return %c0_i32, %c0_i32_0 : i32, i32
  }
  func.func @transform_4(%arg0: i32) -> (i32, i32) {
    %c0_i32 = arith.constant 0 : i32
    %c0_i32_0 = arith.constant 0 : i32
    %c0_i32_1 = arith.constant 0 : i32
    return %c0_i32, %c0_i32_0 : i32, i32
  }
  func.func @transform_5(%arg0: i32) -> (i32, i32) {
    %c0_i32 = arith.constant 0 : i32
    %c0_i32_0 = arith.constant 0 : i32
    %c0_i32_1 = arith.constant 0 : i32
    return %c0_i32, %c0_i32_0 : i32, i32
  }
}

</mosaic_0001>

<bundles_post_ra>
// kernel: bert_multitask_forward.3
= control target key start
LH: loop header
LB: loop body
LE: loop exit
PB: predicated region body
PF: predicated region fallthrough
CT: control target
= control target key end

     0   :  { %s144_s20 = smov 127   ;;  %s145_s21 = smov 125   ;;  %vm67_vm0 = vcmask 1045504   ;;  %vm21_vm1 = vcmask 99328   ;;  %vm40_vm2 = vcmask 183402   ;;  %vm45_vm3 = vcmask 289978   ;;  %s219_s0 = inlined_call_operand.vmem [shape: f32[4,13], index: 0, kind: input, shape index: {}]   ;;  %s220_s2 = inlined_call_operand.vmem [shape: f32[1,20], index: 2, kind: input, shape index: {}]   ;;  %s221_s1 = inlined_call_operand.vmem [shape: f32[46,20], index: 1, kind: input, shape index: {}]   ;;  %s222_s4 = inlined_call_operand.vmem [shape: f32[1,128], index: 4, kind: input, shape index: {}]   ;;  %s223_s3 = inlined_call_operand.vmem [shape: f32[20,128], index: 3, kind: input, shape index: {}]   ;;  %s224_s5 = inlined_call_operand.vmem [shape: f32[2,128], index: 5, kind: output, shape index: {}]  }
   0x1   :  { %v20_v0 = vld [vmem:[%s219_s0] sm:$0xf]  ;;  %s146_s22 = smov 23   ;;  %s147_s23 = smov 126   ;;  %v58_v7 = vld [vmem:[%s221_s1 + $0x28] sm:$0x3f] }
   0x2   :  { %24 = vrot.lane.b32.xlu0 %v20_v0, %s144_s20  ;;  %32 = vrot.lane.b32.xlu1 %v20_v0, %s145_s21  ;;  %s148_s24 = smov 36   ;;  %s149_s25 = smov 13   ;;  %22 = vst.msk [vmem:[#allocation2] sm:$0x3] %vm21_vm1, %v20_v0  ;;  %v57_v8 = vld [vmem:[%s221_s1 + $0x20] sm:$0xff]  ;;  %v56_v9 = vld [vmem:[%s221_s1 + $0x18] sm:$0xff] }
   0x3   :  { %42 = vrot.lane.b32.xlu2 %v20_v0, %s146_s22  ;;  %132 = vmatpush.msk.msra.mxu0 %vm67_vm0, %v58_v7  ;;  %v55_v10 = vld [vmem:[%s221_s1 + $0x10] sm:$0xff]  ;;  %v54_v11 = vld [vmem:[%s221_s1 + $0x8] sm:$0xff]  ;;  %v53_v12 = vld [vmem:[%s221_s1] sm:$0xff]  ;;  %vm50_vm4 = vcmask 369952   ;;  %vm63_vm5 = vcmask 375808   ;;  %vm103_vm6 = vcmask 1043456  }
   0x4   :  { %v94_v17 = vld [vmem:[%s223_s3 + $0x10] sm:$0xf]  ;;  %v93_v18 = vld [vmem:[%s223_s3 + $0x8] sm:$0xff]  ;;  %v92_v19 = vld [vmem:[%s223_s3] sm:$0xff]  ;;  %vm99_vm7 = vcmask 162816  }
   0x5   :  { %82 = vmatpush.msra.mxu0 %v57_v8  ;;  %134 = vmatpush.msk.msra.mxu1 %vm103_vm6, %v94_v17  ;;  %v142_v20 = vld [vmem:[%s220_s2] ss:$0 sm:$0xff] }
   0x6   :  { %v143_v24 = vld [vmem:[%s222_s4] ss:$0 sm:$0xff] }
   0x7   :  { %83 = vmatpush.msra.mxu0 %v56_v9  ;;  %121 = vmatpush.msra.mxu1 %v93_v18 }
   0x9   :  { %84 = vmatpush.msra.mxu0 %v55_v10  ;;  %122 = vmatpush.msra.mxu1 %v92_v19 }
   0xa   :  { %28 = vrot.lane.b32.xlu0 %v20_v0, %s147_s23 }
   0xb   :  { %85 = vmatpush.msra.mxu0 %v54_v11 }
   0xd   :  { %86 = vmatpush.msra.mxu0 %v53_v12 }
  0x5d   :  { %v43_v13 = vpop.permute.xlu2 %42 }
  0x74   :  { %v25_v1 = vpop.permute.xlu0 %24  ;;  %v33_v4 = vpop.permute.xlu1 %32 }
  0x75   :  { %v27_v2 = vmax.f32 %v20_v0, %v25_v1 }
  0x7c   :  { %v29_v3 = vpop.permute.xlu0 %28 }
  0x7d   :  { %v31_v5 = vmax.f32 %v27_v2, %v29_v3 }
  0x7f   :  { %v35_v6 = vmax.f32 %v31_v5, %v33_v4 }
  0x81   :  { %47 = vrot.lane.b32.xlu2 %v35_v6, %s148_s24  ;;  %37 = vrot.lane.b32.xlu1 %v35_v6, %s149_s25 }
  0xdb   :  { %v48_v15 = vpop.permute.xlu2 %47 }
  0xf3   :  { %v38_v14 = vpop.permute.xlu1 %37 }
  0xf4   :  { %41 = vst.msk [vmem:[#allocation2 - $0x2] sm:$0xc] %vm40_vm2, %v38_v14 }
  0xf5   :  { %46 = vst.msk [vmem:[#allocation2 - $0x2] sm:$0xc] %vm45_vm3, %v43_v13 }
  0xf6   :  { %51 = vst.msk [vmem:[#allocation2] sm:$0x3] %vm50_vm4, %v48_v15 }
  0xfd   :  { %v52_v16 = vld [vmem:[#allocation2] sm:$0x3] }
  0xfe   :  { %133 = vmatmul.msk.f32.vlgmr.msra.gmra.mxu0 %vm63_vm5, %v52_v16 }
 0x17b   :  { %v88_v21 = vpop.f32.mrf.mxu0 }
 0x17c   :  { %v89_v22 = vadd.f32 %v142_v20, %v88_v21 }
 0x17e   :  { %v91_v23 = vmax.f32 %v89_v22, 0.0 }
 0x180   :  { %135 = vmatmul.msk.f32.vlgmr.msra.gmra.mxu1 %vm99_vm7, %v91_v23 }
 0x1fd   :  { %v124_v25 = vpop.f32.mrf.mxu1 }
 0x1fe   :  { %v125_v26 = vadd.f32 %v143_v24, %v124_v25 }
 0x200   :  { %127 = vst [vmem:[%s224_s5] sm:$0x3] %v125_v26 }

// kernel: bert_multitask_forward.2
= control target key start
LH: loop header
LB: loop body
LE: loop exit
PB: predicated region body
PF: predicated region fallthrough
CT: control target
= control target key end

     0   :  { %13 = vsyncpa [#allocation4], 0  ;;  %s3866_s27 = smov 0   ;;  %s5720_s0 = inlined_call_operand.vmem [shape: f32[4,16,32], index: 0, kind: input, shape index: {}]   ;;  %s5721_s1 = inlined_call_operand.vmem [shape: f32[4,16,16], index: 1, kind: input, shape index: {}]   ;;  %s5722_s2 = inlined_call_operand.hbm [shape: f32[12,4,32,32], index: 2, kind: input, shape index: {}]   ;;  %s5723_s3 = inlined_call_operand.vmem [shape: f32[12,32,64], index: 3, kind: input, shape index: {}]   ;;  %s5724_s4 = inlined_call_operand.vmem [shape: f32[12,64,32], index: 4, kind: input, shape index: {}]   ;;  %s5725_s5 = inlined_call_operand.vmem [shape: f32[12,9,32], index: 5, kind: input, shape index: {}]   ;;  %s5726_s6 = inlined_call_operand.vmem [shape: f32[12,1,64], index: 6, kind: input, shape index: {}]   ;;  %s5727_s7 = inlined_call_operand.vmem [shape: f32[32,3], index: 7, kind: input, shape index: {}]   ;;  %s5728_s8 = inlined_call_operand.vmem [shape: f32[2,13,2], index: 8, kind: output, shape index: {}]  }
   0x1 LB: > { %s239_s30 = sshll.u32 %s5722_s2, 4  ;;  %s3442_s9 = sadd.s32 4294967295, %s3793_s27   ;;  %s3793_s27 = sphi %s3866_s27, %s19_s27   ;;  %s240_s30 = int_to_ptr.hbm [resolvable:$true] %s239_s30 }
   0x2   : > { %p3444_p0 = scmp.ge.s32.totalorder %s3793_s27, 1  ;;  %p228_p1 = scmp.lt.s32.totalorder %s3793_s27, 3 }
   0x3   : > { %p3603_p2 = scmp.eq.s32.totalorder %s3442_s9, 0  ;;  %s3815_s10 = smov [#allocation3]  }
   0x4   : > { %p229_p3 = pnand %p3444_p0, %p228_p1  ;;  %s241_s11 = sshll.u32 %s3815_s10, 4  ;;  %s242_s11 = int_to_ptr.vmem [resolvable:$true] %s241_s11 }
   0x5   : > { %s3816_s12 = smov 128   ;;  %s3817_s13 = smov 8  }
   0x6   : > { %p3599_p4 = pneg %p229_p3  ;;  %292 = sbr.rel (%p229_p3) target bundleno = 3063 (0xbf7), region = 52 }
   0x8   : > { %p3600_p5 = pnand %p3603_p2, %p3599_p4 }
   0xa   : > { %3602 = dma.hbm_to_vmem [thread:$0]  (!%p3600_p5), %s240_s30, 24576, %s242_s11, [#allocation4], %s3816_s12, %s3816_s12, %s3817_s13  }
   0xb   : > { %3788 = dma.done.wait (%p3603_p2), [#allocation4], 24576  }
   0xc   : > { %3790 = vsyncadd (%p3603_p2), [#allocation4], 4294942720  ;;  %s3449_s14 = sshll.u32 %s3442_s9, 1  ;;  %p348_p6 = scmp.lt.s32.totalorder %s3442_s9, 1  ;;  %vm361_vm0 = vcmask 261120  }
   0xd   : > { %p335_p7 = scmp.lt.s32.totalorder %s3449_s14, 3  ;;  %s3908_s26 = smov 0  }
   0xe   : > { %s5883_s9 = smov (!%p348_p6, %s3442_s9), 1 }
   0xf   : > { %s5885_s14 = smov (!%p335_p7, %s3449_s14), 3  ;;  %s3574_s15 = sshll.u32 %s5883_s9, 4 }
  0x10   : > { %s3572_s16 = sshll.u32 %s5885_s14, 4  ;;  %s3880_s19 = scalar_lea.vmem %s5728_s8, %s3574_s15 }
  0x11   : > { %s339_s22 = scalar_lea.vmem %s5720_s0, %s3572_s16  ;;  %s346_s25 = scalar_lea.vmem %s5721_s1, %s3572_s16 }
  0x12   : > { %v353_v0 = vld [vmem:[%s339_s22] sm:$0xff]   ;;  %v3890_v2 = vld [vmem:[%s346_s25 + $0x8] sm:$0xff]  ;;  %v3892_v3 = vld [vmem:[%s346_s25 + $0x10] sm:$0xff] }
  0x13   : > { %v3888_v1 = vld [vmem:[%s346_s25] sm:$0xff]  ;;  %v3894_v4 = vld [vmem:[%s346_s25 + $0x18] sm:$0xff]  ;;  %362 = vst.msk [vmem:[#allocation2] sm:$0xff] %vm361_vm0, %v353_v0  ;;  %v354_v5 = vld [vmem:[%s339_s22 + $0x8] sm:$0xff]  }
  0x14   : > { %363 = vst.msk [vmem:[#allocation2 + $0x8] sm:$0xff] %vm361_vm0, %v354_v5  ;;  %v355_v6 = vld [vmem:[%s339_s22 + $0x10] sm:$0xff]   ;;  %v356_v7 = vld [vmem:[%s339_s22 + $0x18] sm:$0xff]  }
  0x15   : > { %364 = vst.msk [vmem:[#allocation2 + $0x10] sm:$0xff] %vm361_vm0, %v355_v6 }
  0x16   : > { %365 = vst.msk [vmem:[#allocation2 + $0x18] sm:$0xff] %vm361_vm0, %v356_v7 }
  0x17 LB: >> { %s3457_s28 = sshll.u32 %s3813_s26, 7  ;;  %s3458_s29 = sshll.u32 %s3813_s26, 4  ;;  %vm518_vm1 = vcmask 130048   ;;  %s3813_s26 = sphi %s3908_s26, %s371_s26   ;;  %v3809_v0 = vphi %v353_v0, %v1428_v0   ;;  %v3805_v5 = vphi %v354_v5, %v1429_v5   ;;  %v3801_v6 = vphi %v355_v6, %v1430_v6   ;;  %v3797_v7 = vphi %v356_v7, %v1431_v7  }
  0x18   : >> { %s3927_s30 = scalar_lea.vmem [#allocation3], %s3457_s28  ;;  %s3936_s11 = scalar_lea.vmem %s5725_s5, %s3458_s29 }
  0x19   : >> { %v381_v8 = vld [vmem:[%s3927_s30 + $0x18] sm:$0xff]  ;;  %v380_v9 = vld [vmem:[%s3927_s30 + $0x10] sm:$0xff]  ;;  %v379_v12 = vld [vmem:[%s3927_s30 + $0x8] sm:$0xff]  ;;  %s3818_s12 = smov 112   ;;  %s414_s15 = scalar_lea.vmem %s5726_s6, %s3813_s26 }
  0x1a   : >> { %441 = vmatpush.msra.mxu0 %v381_v8  ;;  %v385_v10 = vld [vmem:[%s3927_s30 + $0x38] sm:$0xff]  ;;  %v384_v11 = vld [vmem:[%s3927_s30 + $0x30] sm:$0xff]  ;;  %v383_v13 = vld [vmem:[%s3927_s30 + $0x28] sm:$0xff]  ;;  %s3459_s16 = sshll.u32 %s3813_s26, 5  ;;  %s3460_s21 = sshll.u32 %s3813_s26, 6 }
  0x1b   : >> { %3575 = vmatpush.msra.mxu1 %v385_v10  ;;  %v378_v14 = vld [vmem:[%s3927_s30] sm:$0xff]  ;;  %v389_v16 = vld [vmem:[%s3927_s30 + $0x58] sm:$0xff]  ;;  %v388_v17 = vld [vmem:[%s3927_s30 + $0x50] sm:$0xff]  ;;  %s399_s20 = scalar_lea.vmem %s5723_s3, %s3459_s16  ;;  %s405_s24 = scalar_lea.vmem %s5724_s4, %s3460_s21 }
  0x1c   : >> { %442 = vmatpush.msra.mxu0 %v380_v9  ;;  %v382_v15 = vld [vmem:[%s3927_s30 + $0x20] sm:$0xff]  ;;  %501 = vmatpush.msra.mxu2 %v389_v16  ;;  %v387_v18 = vld [vmem:[%s3927_s30 + $0x48] sm:$0xff]  ;;  %s4214_s29 = scalar_lea.vmem [#allocation2], %s3459_s16  ;;  %s371_s26 = sadd.s32 1, %s3813_s26  }
  0x1d   : >> { %3576 = vmatpush.msra.mxu1 %v384_v11  ;;  %3579 = vmatpush.msra.mxu3 %v389_v16  ;;  %v386_v19 = vld [vmem:[%s3927_s30 + $0x40] sm:$0xff]  ;;  %p368_p8 = scmp.ge.s32.totalorder %s371_s26, 12  }
  0x1e   : >> { %443 = vmatpush.msra.mxu0 %v379_v12  ;;  %502 = vmatpush.msra.mxu2 %v388_v17  ;;  %v3971_v20 = vld [vmem:[%s3936_s11] sm:$0xff] }
  0x1f   : >> { %3577 = vmatpush.msra.mxu1 %v383_v13  ;;  %3580 = vmatpush.msra.mxu3 %v388_v17  ;;  %v458_v21 = vperm.slane %v3971_v20, 1  ;;  %v416_v31 = vperm.slane %v3971_v20, 0  ;;  %v488_v35 = vperm.slane %v3971_v20, 2 }
  0x20   : >> { %444 = vmatpush.msra.mxu0 %v378_v14  ;;  %503 = vmatpush.msra.mxu2 %v387_v18 }
  0x21   : >> { %3461 = vmatmul.msk.f32.vlgmr.msra.gmra.mxu0 %vm361_vm0, %v3809_v0  ;;  %3578 = vmatpush.msra.mxu1 %v382_v15 }
  0x22   : >> { %471 = vmatpush.msrb.mxu0 %v385_v10  ;;  %3466 = vmatmul.msk.f32.vlgmr.msra.gmra.mxu1 %vm361_vm0, %v3805_v5 }
  0x23   : >> { %3581 = vmatpush.msra.mxu3 %v387_v18  ;;  %504 = vmatpush.msra.mxu2 %v386_v19 }
  0x24   : >> { %472 = vmatpush.msrb.mxu0 %v384_v11  ;;  %3469 = vmatmul.msk.f32.vlgmr.msra.gmra.mxu2 %vm361_vm0, %v3809_v0 }
  0x25   : >> { %3582 = vmatpush.msra.mxu3 %v386_v19 }
  0x26   : >> { %473 = vmatpush.msrb.mxu0 %v383_v13  ;;  %3472 = vmatmul.msk.f32.vlgmr.msra.gmra.mxu3 %vm361_vm0, %v3797_v7 }
  0x28   : >> { %474 = vmatpush.msrb.mxu0 %v382_v15 }
  0x29   : >> { %3462 = vmatmul.msk.f32.gmra.mxu0 %vm361_vm0, %v3805_v5 }
  0x2a   : >> { %3467 = vmatmul.msk.f32.gmra.mxu1 %vm361_vm0, %v3801_v6 }
  0x2c   : >> { %3470 = vmatmul.msk.f32.gmra.mxu2 %vm361_vm0, %v3805_v5 }
  0x31   : >> { %3463 = vmatmul.msk.f32.gmra.mxu0 %vm361_vm0, %v3801_v6 }
  0x32   : >> { %3468 = vmatmul.msk.f32.gmra.mxu1 %vm361_vm0, %v3797_v7 }
  0x34   : >> { %3471 = vmatmul.msk.f32.gmra.mxu2 %vm361_vm0, %v3801_v6 }
  0x39   : >> { %3464 = vmatmul.msk.f32.gmra.mxu0 %vm361_vm0, %v3797_v7 }
  0x41   : >> { %3465 = vmatmul.msk.f32.vlgmr.msrb.gmra.mxu0 %vm361_vm0, %v3809_v0 }
  0x9e   : >> { %v446_v22 = vpop.f32.mrf.mxu0 }
  0x9f   : >> { %v479_v23 = vpop.f32.mrf.mxu1  ;;  %v447_v36 = vadd.f32 %v446_v22, %v416_v31 }
  0xa0   : >> { %v480_v24 = vadd.f32 %v479_v23, %v458_v21 }
  0xa2   : >> { %803 = vrot.lane.b32.xlu2 %v480_v24, %s3818_s12  ;;  %3473 = vmatpush.xpose.msk.msrb.mxu3 %vm518_vm1, %v480_v24 }
  0xa6   : >> { %v449_v25 = vpop.f32.mrf.mxu0 }
  0xa7   : >> { %v482_v27 = vpop.f32.mrf.mxu1  ;;  %v506_v29 = vpop.f32.mrf.mxu2  ;;  %v450_v42 = vadd.f32 %v449_v25, %v416_v31 }
  0xa8   : >> { %v483_v37 = vadd.f32 %v482_v27, %v458_v21  ;;  %v3982_v39 = vadd.f32 %v506_v29, %v488_v35 }
  0xa9   : >> { %v515_v47 = vpop.f32.mrf.mxu3 }
  0xaa   : >> { %v4000_v49 = vadd.f32 %v515_v47, %v488_v35 }
  0xac   : >> { %742 = vmatpush.msrb.mxu1 %v4000_v49 }
  0xae   : >> { %v452_v26 = vpop.f32.mrf.mxu0 }
  0xaf   : >> { %v485_v30 = vpop.f32.mrf.mxu1  ;;  %v509_v38 = vpop.f32.mrf.mxu2  ;;  %v453_v43 = vadd.f32 %v452_v26, %v416_v31 }
  0xb0   : >> { %v486_v34 = vadd.f32 %v485_v30, %v458_v21  ;;  %v3984_v40 = vadd.f32 %v509_v38, %v488_v35 }
  0xb2   : >> { %v3659_v41 = vpack.i.bf16 %v3982_v39, %v3984_v40 }
  0xb6   : >> { %v455_v28 = vpop.f32.mrf.mxu0 }
  0xb7   : >> { %v456_v44 = vadd.f32 %v455_v28, %v416_v31  ;;  %v512_v46 = vpop.f32.mrf.mxu2 }
  0xb8   : >> { %v3998_v48 = vadd.f32 %v512_v46, %v488_v35 }
  0xba   : >> { %v3664_v50 = vpack.i.bf16 %v3998_v48, %v4000_v49  ;;  %743 = vmatpush.msrb.mxu1 %v3998_v48 }
  0xbe   : >> { %v476_v32 = vpop.f32.mrf.mxu0 }
  0xbf   : >> { %v477_v33 = vadd.f32 %v476_v32, %v458_v21 }
  0xc1   : >> { %801 = vrot.lane.b32.xlu2 %v477_v33, %s3818_s12  ;;  %3474 = vmatpush.xpose.msk.msrb.mxu3 %vm518_vm1, %v477_v33 }
  0xc4   : >> { %3475 = vmatmul.msk.f32.vlgmr.msrb.gmra.mxu3 %vm518_vm1, %v447_v36 }
  0xc5   : >> { %3477 = vmatpush.xpose.msk.msra.mxu3 %vm518_vm1, %v486_v34 }
  0xc9   : >> { %3478 = vmatpush.xpose.msk.msra.mxu3 %vm518_vm1, %v483_v37  ;;  %842 = vrot.lane.b32.xlu2 %v486_v34, %s3818_s12 }
  0xcc   : >> { %3476 = vmatmul.msk.f32.gmra.mxu3 %vm518_vm1, %v450_v42 }
  0xcd   : >> { %713 = vmatpush.msrb.mxu3 %v3984_v40 }
  0xcf   : >> { %714 = vmatpush.msrb.mxu3 %v3982_v39 }
  0xd1   : >> { %840 = vrot.lane.b32.xlu2 %v483_v37, %s3818_s12 }
  0xd4   : >> { %3479 = vmatmul.msk.f32.vlgmr.msra.gmra.mxu3 %vm518_vm1, %v453_v43 }
  0xd9   : >> { %836 = vrot.lane.b32.xlu2 %v453_v43, %s3818_s12 }
  0xdc   : >> { %3480 = vmatmul.msk.f32.gmra.mxu3 %vm518_vm1, %v456_v44 }
  0xfc   : >> { %v804_v45 = vpop.permute.xlu2 %803 }
  0xfd   : >> { %3489 = vmatpush.xpose.msk.msra.mxu3 %vm518_vm1, %v804_v45 }
 0x11b   : >> { %v802_v51 = vpop.permute.xlu2 %801 }
 0x11c   : >> { %3490 = vmatpush.xpose.msk.msra.mxu3 %vm518_vm1, %v802_v51 }
 0x123   : >> { %v843_v52 = vpop.permute.xlu2 %842 }
 0x124   : >> { %3493 = vmatpush.xpose.msk.msra.mxu0 %vm518_vm1, %v843_v52 }
 0x12b   : >> { %v841_v53 = vpop.permute.xlu2 %840 }
 0x12c   : >> { %3494 = vmatpush.xpose.msk.msra.mxu0 %vm518_vm1, %v841_v53 }
 0x133   : >> { %v837_v54 = vpop.permute.xlu2 %836 }
 0x134   : >> { %3495 = vmatmul.msk.f32.vlgmr.msra.gmra.mxu0 %vm518_vm1, %v837_v54 }
 0x147   : >> { %v548_v55 = vpop.f32.mrf.mxu3 }
 0x148   : >> { %v589_v56 = vmul.f32 0.25, %v548_v55 }
 0x14a   : >> { %v593_v57 = vadd.f32 %v589_v56, %v3888_v1 }
 0x14c   : >> { %v597_v58 = vsel %vm518_vm1, %v593_v57, -inf }
 0x14d   : >> { %598 = vmax.xlane.f32.xlu0 %v597_v58 }
 0x14f   : >> { %v551_v59 = vpop.f32.mrf.mxu3 }
 0x150   : >> { %v590_v60 = vmul.f32 0.25, %v551_v59 }
 0x152   : >> { %v594_v61 = vadd.f32 %v590_v60, %v3890_v2 }
 0x154   : >> { %v600_v62 = vsel %vm518_vm1, %v594_v61, -inf }
 0x155   : >> { %601 = vmax.xlane.f32.xlu0 %v600_v62 }
 0x157   : >> { %v583_v63 = vpop.f32.mrf.mxu3 }
 0x158   : >> { %v591_v8 = vmul.f32 0.25, %v583_v63 }
 0x15a   : >> { %v4015_v9 = vadd.f32 %v591_v8, %v3892_v3 }
 0x15c   : >> { %v603_v10 = vsel %vm518_vm1, %v4015_v9, -inf }
 0x15d   : >> { %604 = vmax.xlane.f32.xlu2 %v603_v10 }
 0x15f   : >> { %v586_v24 = vpop.f32.mrf.mxu3 }
 0x160   : >> { %v592_v25 = vmul.f32 0.25, %v586_v24 }
 0x162   : >> { %v596_v26 = vadd.f32 %v592_v25, %v3894_v4 }
 0x164   : >> { %v606_v29 = vsel %vm518_vm1, %v596_v26, -inf }
 0x169   : >> { %797 = vrot.lane.b32.xlu0 %v447_v36, %s3818_s12 }
 0x171   : >> { %838 = vrot.lane.b32.xlu0 %v456_v44, %s3818_s12 }
 0x1b1   : >> { %v869_v27 = vpop.f32.mrf.mxu0 }
 0x1b2   : >> { %v877_v28 = vmul.f32 0.25, %v869_v27 }
 0x1b4   : >> { %v881_v30 = vadd.f32 %v877_v28, %v3892_v3 }
 0x1b6   : >> { %v889_v31 = vsel %vm518_vm1, %v881_v30, -inf }
 0x1c0   : >> { %v599_v11 = vpop.xlane.xlu0 %598 }
 0x1c1   : >> { %v609_v12 = vsub.f32 %v593_v57, %v599_v11 }
 0x1c3   : >> { %v613_v13 = vmul.f32 1.442695, %v609_v12 }
 0x1c5   : >> { %3671 = vpow2.f32 %v613_v13 }
 0x1c8   : >> { %v602_v14 = vpop.xlane.xlu0 %601 }
 0x1c9   : >> { %v610_v15 = vsub.f32 %v594_v61, %v602_v14 }
 0x1cb   : >> { %v3672_v16 = vpop.eup %3671  ;;  %v615_v17 = vmul.f32 1.442695, %v610_v15 }
 0x1cc   : >> { %v621_v18 = vsel %vm518_vm1, %v3672_v16, 0.0 }
 0x1cd   : >> { %3673 = vpow2.f32 %v615_v17  ;;  %622 = vadd.xlane.f32.xlu1 %v621_v18 }
 0x1d0   : >> { %v605_v24 = vpop.xlane.xlu2 %604 }
 0x1d1   : >> { %v611_v28 = vsub.f32 %v4015_v9, %v605_v24 }
 0x1d3   : >> { %v3674_v19 = vpop.eup %3673  ;;  %v617_v48 = vmul.f32 1.442695, %v611_v28 }
 0x1d4   : >> { %v624_v21 = vsel %vm518_vm1, %v3674_v19, 0.0 }
 0x1d5   : >> { %625 = vadd.xlane.f32.xlu1 %v624_v21 }
 0x1db   : >> { %v798_v22 = vpop.permute.xlu0 %797 }
 0x1e3   : >> { %v839_v23 = vpop.permute.xlu0 %838 }
 0x1e4   : >> { %3496 = vmatmul.msk.f32.gmra.mxu0 %vm518_vm1, %v839_v23 }
 0x1ee   : >> { %799 = vrot.lane.b32.xlu1 %v450_v42, %s3818_s12 }
 0x218   : >> { %607 = vmax.xlane.f32.xlu1 %v606_v29 }
 0x220   : >> { %890 = vmax.xlane.f32.xlu1 %v889_v31 }
 0x240   : >> { %v623_v32 = vpop.xlane.xlu1 %622 }
 0x241   : >> { %3675 = vrcp.f32 %v623_v32  ;;  %v644_v37 = vand.u32 2147483648, %v623_v32  ;;  %v642_v42 = vand.u32 2147483647, %v623_v32  ;;  %vm638_vm3 = vweird.f32 %v623_v32 }
 0x243   : >> { %v645_v45 = vor.u32 1.1754944e-38, %v644_v37  ;;  %vm643_vm5 = vcmp.eq.f32.partialorder %v642_v42, 8.507059e+37 }
 0x247   : >> { %v3676_v33 = vpop.eup %3675 }
 0x248   : >> { %v634_v34 = vmul.f32 %v3676_v33, %v623_v32  ;;  %v626_v35 = vpop.xlane.xlu1 %625  ;;  %vm639_vm2 = vweird.f32 %v3676_v33 }
 0x249   : >> { %3677 = vrcp.f32 %v626_v35  ;;  %vm640_vm4 = vmor %vm638_vm3, %vm639_vm2  ;;  %v659_v54 = vand.u32 2147483648, %v626_v35  ;;  %v657_v56 = vand.u32 2147483647, %v626_v35  ;;  %vm653_vm7 = vweird.f32 %v626_v35 }
 0x24a   : >> { %v635_v36 = vsub.f32 1.0, %v634_v34 }
 0x24b   : >> { %v660_v58 = vor.u32 1.1754944e-38, %v659_v54  ;;  %vm658_vm9 = vcmp.eq.f32.partialorder %v657_v56, 8.507059e+37 }
 0x24c   : >> { %v636_v38 = vmul.f32 %v3676_v33, %v635_v36 }
 0x24e   : >> { %v637_v43 = vadd.f32 %v3676_v33, %v636_v38 }
 0x24f   : >> { %v3678_v44 = vpop.eup %3677 }
 0x250   : >> { %v641_v46 = vsel %vm640_vm4, %v3676_v33, %v637_v43  ;;  %v649_v47 = vmul.f32 %v3678_v44, %v626_v35  ;;  %vm654_vm6 = vweird.f32 %v3678_v44 }
 0x251   : >> { %v646_v51 = vsel %vm643_vm5, %v645_v45, %v641_v46  ;;  %vm655_vm8 = vmor %vm653_vm7, %vm654_vm6 }
 0x252   : >> { %v650_v52 = vsub.f32 1.0, %v649_v47  ;;  %v647_v53 = vmul.f32 %v3672_v16, %v646_v51  ;;  %v391_v16 = vld [vmem:[%s3927_s30 + $0x68] sm:$0xff] }
 0x253   : >> { %777 = vmatpush.msrb.mxu2 %v391_v16 }
 0x254   : >> { %v651_v55 = vmul.f32 %v3678_v44, %v650_v52  ;;  %3481 = vmatmul.msk.f32.vlgmr.msrb.gmra.mxu3 %vm518_vm1, %v647_v53 }
 0x256   : >> { %v652_v57 = vadd.f32 %v3678_v44, %v651_v55 }
 0x258   : >> { %v656_v59 = vsel %vm655_vm8, %v3678_v44, %v652_v57 }
 0x259   : >> { %v661_v60 = vsel %vm658_vm9, %v660_v58, %v656_v59 }
 0x25a   : >> { %v662_v61 = vmul.f32 %v3674_v19, %v661_v60  ;;  %v390_v19 = vld [vmem:[%s3927_s30 + $0x60] sm:$0xff] }
 0x25b   : >> { %778 = vmatpush.msrb.mxu2 %v390_v19 }
 0x25c   : >> { %3482 = vmatmul.msk.f32.gmra.mxu3 %vm518_vm1, %v662_v61 }
 0x260   : >> { %v800_v62 = vpop.permute.xlu1 %799 }
 0x264   : >> { %3491 = vmatmul.msk.f32.vlgmr.msra.gmra.mxu3 %vm518_vm1, %v798_v22 }
 0x26c   : >> { %3492 = vmatmul.msk.f32.gmra.mxu3 %vm518_vm1, %v800_v62 }
 0x28b   : >> { %v608_v63 = vpop.xlane.xlu1 %607 }
 0x28c   : >> { %v612_v8 = vsub.f32 %v596_v26, %v608_v63  ;;  %v872_v26 = vpop.f32.mrf.mxu0 }
 0x28d   : >> { %v878_v29 = vmul.f32 0.25, %v872_v26 }
 0x28e   : >> { %v619_v10 = vmul.f32 1.442695, %v612_v8 }
 0x290   : >> { %3679 = vpow2.f32 %v619_v10 }
 0x293   : >> { %v891_v11 = vpop.xlane.xlu1 %890 }
 0x294   : >> { %v897_v12 = vsub.f32 %v881_v30, %v891_v11 }
 0x296   : >> { %v4033_v13 = vpop.eup %3679  ;;  %v903_v14 = vmul.f32 1.442695, %v897_v12 }
 0x297   : >> { %v630_v15 = vsel %vm518_vm1, %v4033_v13, 0.0 }
 0x298   : >> { %3681 = vpow2.f32 %v903_v14  ;;  %631 = vadd.xlane.f32.xlu1 %v630_v15 }
 0x299   : >> { %3683 = vpow2.f32 %v617_v48 }
 0x29e   : >> { %v3682_v17 = vpop.eup %3681 }
 0x29f   : >> { %v913_v18 = vsel %vm518_vm1, %v3682_v17, 0.0  ;;  %v4053_v35 = vpop.eup %3683 }
 0x2a0   : >> { %914 = vadd.xlane.f32.xlu1 %v913_v18  ;;  %v627_v9 = vsel %vm518_vm1, %v4053_v35, 0.0 }
 0x2b9   : >> { %3665 = vrot.lane.b32.xlu1 %v3664_v50, %s3818_s12  ;;  %v882_v50 = vadd.f32 %v878_v29, %v3894_v4 }
 0x2bb   : >> { %v892_v33 = vsel %vm518_vm1, %v882_v50, -inf }
 0x2d7   : >> { %v716_v21 = vpop.f32.mrf.mxu3 }
 0x2d8   : >> { %3485 = vmatmul.msk.f32.vlgmr.msrb.gmra.mxu2 %vm518_vm1, %v716_v21 }
 0x2df   : >> { %v719_v22 = vpop.f32.mrf.mxu3 }
 0x2e0   : >> { %3486 = vmatmul.msk.f32.gmra.mxu2 %vm518_vm1, %v719_v22 }
 0x2e7   : >> { %v830_v23 = vpop.f32.mrf.mxu3 }
 0x2e8   : >> { %v875_v25 = vmul.f32 0.25, %v830_v23 }
 0x2ea   : >> { %v879_v27 = vadd.f32 %v875_v25, %v3888_v1  ;;  %v1491_v1 = vld [vmem:[%s5727_s7] sm:$0xff] (%p368_p8) }
 0x2ec   : >> { %v883_v30 = vsel %vm518_vm1, %v879_v27, -inf }
 0x2ed   : >> { %884 = vmax.xlane.f32.xlu0 %v883_v30 }
 0x2ef   : >> { %v833_v49 = vpop.f32.mrf.mxu3 }
 0x2f0   : >> { %v876_v31 = vmul.f32 0.25, %v833_v49 }
 0x2f2   : >> { %v880_v32 = vadd.f32 %v876_v31, %v3890_v2 }
 0x2f4   : >> { %v886_v34 = vsel %vm518_vm1, %v880_v32, -inf }
 0x2f5   : >> { %893 = vmax.xlane.f32.xlu0 %v892_v33  ;;  %887 = vmax.xlane.f32.xlu2 %v886_v34 }
 0x2fd   : >> { %628 = vadd.xlane.f32.xlu2 %v627_v9 }
 0x30b   : >> { %v4057_v36 = vpop.xlane.xlu1 %631 }
 0x30c   : >> { %vm683_vm5 = vweird.f32 %v4057_v36  ;;  %v687_v9 = vand.u32 2147483647, %v4057_v36 }
 0x30e   : >> { %vm688_vm7 = vcmp.eq.f32.partialorder %v687_v9, 8.507059e+37 }
 0x313   : >> { %v915_v37 = vpop.xlane.xlu1 %914 }
 0x314   : >> { %3685 = vrcp.f32 %v915_v37  ;;  %v960_v46 = vand.u32 2147483648, %v915_v37  ;;  %vm954_vm11 = vweird.f32 %v915_v37  ;;  %v958_v47 = vand.u32 2147483647, %v915_v37 }
 0x316   : >> { %v961_v52 = vor.u32 1.1754944e-38, %v960_v46  ;;  %vm959_vm13 = vcmp.eq.f32.partialorder %v958_v47, 8.507059e+37 }
 0x31a   : >> { %v3686_v38 = vpop.eup %3685 }
 0x31b   : >> { %v950_v42 = vmul.f32 %v3686_v38, %v915_v37  ;;  %vm955_vm10 = vweird.f32 %v3686_v38 }
 0x31c   : >> { %vm956_vm12 = vmor %vm954_vm11, %vm955_vm10 }
 0x31d   : >> { %v951_v43 = vsub.f32 1.0, %v950_v42 }
 0x31f   : >> { %v952_v44 = vmul.f32 %v3686_v38, %v951_v43 }
 0x321   : >> { %v953_v45 = vadd.f32 %v3686_v38, %v952_v44 }
 0x323   : >> { %v957_v51 = vsel %vm956_vm12, %v3686_v38, %v953_v45 }
 0x324   : >> { %v962_v54 = vsel %vm959_vm13, %v961_v52, %v957_v51 }
 0x325   : >> { %v963_v57 = vmul.f32 %v3682_v17, %v962_v54 }
 0x32b   : >> { %v3666_v53 = vpop.permute.xlu1 %3665 }
 0x32c   : >> { %v3667_v55 = vunpack.i.l.bf16 %v3666_v53  ;;  %v3668_v56 = vunpack.i.h.bf16 %v3666_v53 }
 0x32e   : >> { %1044 = vmatpush.msrb.mxu3 %v3667_v55 }
 0x330   : >> { %1045 = vmatpush.msrb.mxu3 %v3668_v56 }
 0x331   : >> { %3499 = vmatmul.msk.f32.vlgmr.msrb.gmra.mxu3 %vm518_vm1, %v963_v57 }
 0x360   : >> { %v885_v58 = vpop.xlane.xlu0 %884 }
 0x361   : >> { %v895_v59 = vsub.f32 %v879_v27, %v885_v58 }
 0x363   : >> { %v899_v60 = vmul.f32 1.442695, %v895_v59 }
 0x365   : >> { %3687 = vpow2.f32 %v899_v60 }
 0x366   : >> { %3689 = vrcp.f32 %v4057_v36 }
 0x368   : >> { %v888_v61 = vpop.xlane.xlu2 %887  ;;  %v894_v62 = vpop.xlane.xlu0 %893 }
 0x369   : >> { %v896_v63 = vsub.f32 %v880_v32, %v888_v61  ;;  %v898_v11 = vsub.f32 %v882_v50, %v894_v62  ;;  %v689_v32 = vand.u32 2147483648, %v4057_v36 }
 0x36b   : >> { %v4060_v8 = vpop.eup %3687  ;;  %v901_v10 = vmul.f32 1.442695, %v896_v63  ;;  %v905_v14 = vmul.f32 1.442695, %v898_v11  ;;  %v690_v38 = vor.u32 1.1754944e-38, %v689_v32 }
 0x36c   : >> { %v907_v12 = vsel %vm518_vm1, %v4060_v8, 0.0  ;;  %v3690_v16 = vpop.eup %3689 }
 0x36d   : >> { %908 = vadd.xlane.f32.xlu0 %v907_v12  ;;  %3691 = vpow2.f32 %v901_v10  ;;  %v679_v18 = vmul.f32 %v3690_v16, %v4057_v36  ;;  %vm684_vm4 = vweird.f32 %v3690_v16  ;;  %v393_v36 = vld [vmem:[%s3927_s30 + $0x78] sm:$0xff] }
 0x36e   : >> { %vm685_vm6 = vmor %vm683_vm5, %vm684_vm4  ;;  %1079 = vmatpush.msrb.mxu0 %v393_v36 }
 0x36f   : >> { %v680_v22 = vsub.f32 1.0, %v679_v18 }
 0x370   : >> { %v629_v15 = vpop.xlane.xlu2 %628 }
 0x371   : >> { %3693 = vrcp.f32 %v629_v15  ;;  %v674_v26 = vand.u32 2147483648, %v629_v15  ;;  %v681_v27 = vmul.f32 %v3690_v16, %v680_v22  ;;  %v672_v29 = vand.u32 2147483647, %v629_v15 }
 0x372   : >> { %3695 = vpow2.f32 %v905_v14  ;;  %vm668_vm15 = vweird.f32 %v629_v15 }
 0x373   : >> { %v4065_v17 = vpop.eup %3691  ;;  %v675_v49 = vor.u32 1.1754944e-38, %v674_v26  ;;  %vm673_vm3 = vcmp.eq.f32.partialorder %v672_v29, 8.507059e+37  ;;  %v682_v31 = vadd.f32 %v3690_v16, %v681_v27 }
 0x374   : >> { %v910_v19 = vsel %vm518_vm1, %v4065_v17, 0.0 }
 0x375   : >> { %911 = vadd.xlane.f32.xlu2 %v910_v19  ;;  %v686_v37 = vsel %vm685_vm6, %v3690_v16, %v682_v31 }
 0x376   : >> { %v691_v42 = vsel %vm688_vm7, %v690_v38, %v686_v37 }
 0x377   : >> { %v3694_v21 = vpop.eup %3693  ;;  %v692_v43 = vmul.f32 %v4033_v13, %v691_v42 }
 0x378   : >> { %v664_v23 = vmul.f32 %v3694_v21, %v629_v15  ;;  %v4070_v24 = vpop.eup %3695  ;;  %vm669_vm14 = vweird.f32 %v3694_v21 }
 0x379   : >> { %v916_v30 = vsel %vm518_vm1, %v4070_v24, 0.0  ;;  %vm670_vm2 = vmor %vm668_vm15, %vm669_vm14 }
 0x37a   : >> { %v665_v25 = vsub.f32 1.0, %v664_v23 }
 0x37c   : >> { %v666_v28 = vmul.f32 %v3694_v21, %v665_v25 }
 0x37d   : >> { %917 = vadd.xlane.f32.xlu2 %v916_v30 }
 0x37e   : >> { %v667_v48 = vadd.f32 %v3694_v21, %v666_v28 }
 0x380   : >> { %v671_v50 = vsel %vm670_vm2, %v3694_v21, %v667_v48 }
 0x381   : >> { %3660 = vrot.lane.b32.xlu0 %v3659_v41, %s3818_s12  ;;  %v676_v33 = vsel %vm673_vm3, %v675_v49, %v671_v50  ;;  %v392_v49 = vld [vmem:[%s3927_s30 + $0x70] sm:$0xff] }
 0x382   : >> { %v677_v34 = vmul.f32 %v4053_v35, %v676_v33  ;;  %1080 = vmatpush.msrb.mxu0 %v392_v49  ;;  %v792_v33 = vperm.slane %v3971_v20, 3  ;;  %v401_v49 = vld [vmem:[%s399_s20 + $0x8] sm:$0xff] }
 0x384   : >> { %3483 = vmatmul.msk.f32.vlgmr.msrb.gmra.mxu1 %vm518_vm1, %v677_v34 }
 0x38c   : >> { %3484 = vmatmul.msk.f32.gmra.mxu1 %vm518_vm1, %v692_v43 }
 0x3b4   : >> { %v1047_v31 = vpop.f32.mrf.mxu3 }
 0x3e0   : >> { %v909_v39 = vpop.xlane.xlu0 %908 }
 0x3e1   : >> { %3697 = vrcp.f32 %v909_v39  ;;  %v930_v47 = vand.u32 2147483648, %v909_v39  ;;  %vm924_vm9 = vweird.f32 %v909_v39  ;;  %v928_v51 = vand.u32 2147483647, %v909_v39 }
 0x3e3   : >> { %v931_v55 = vor.u32 1.1754944e-38, %v930_v47  ;;  %vm929_vm11 = vcmp.eq.f32.partialorder %v928_v51, 8.507059e+37 }
 0x3e7   : >> { %v3698_v40 = vpop.eup %3697 }
 0x3e8   : >> { %v920_v41 = vmul.f32 %v3698_v40, %v909_v39  ;;  %v912_v44 = vpop.xlane.xlu2 %911  ;;  %vm925_vm8 = vweird.f32 %v3698_v40 }
 0x3e9   : >> { %3699 = vrcp.f32 %v912_v44  ;;  %vm926_vm10 = vmor %vm924_vm9, %vm925_vm8  ;;  %v945_v61 = vand.u32 2147483648, %v912_v44  ;;  %vm939_vm13 = vweird.f32 %v912_v44  ;;  %v943_v11 = vand.u32 2147483647, %v912_v44 }
 0x3ea   : >> { %v921_v35 = vsub.f32 1.0, %v920_v41 }
 0x3eb   : >> { %v946_v16 = vor.u32 1.1754944e-38, %v945_v61  ;;  %vm944_vm15 = vcmp.eq.f32.partialorder %v943_v11, 8.507059e+37 }
 0x3ec   : >> { %v922_v45 = vmul.f32 %v3698_v40, %v921_v35 }
 0x3ee   : >> { %v923_v46 = vadd.f32 %v3698_v40, %v922_v45 }
 0x3ef   : >> { %v3700_v52 = vpop.eup %3699 }
 0x3f0   : >> { %v927_v13 = vsel %vm926_vm10, %v3698_v40, %v923_v46  ;;  %v935_v53 = vmul.f32 %v3700_v52, %v912_v44  ;;  %v918_v54 = vpop.xlane.xlu2 %917  ;;  %vm940_vm12 = vweird.f32 %v3700_v52 }
 0x3f1   : >> { %3701 = vrcp.f32 %v918_v54  ;;  %v932_v58 = vsel %vm929_vm11, %v931_v55, %v927_v13  ;;  %vm941_vm14 = vmor %vm939_vm13, %vm940_vm12  ;;  %v975_v19 = vand.u32 2147483648, %v918_v54  ;;  %v973_v23 = vand.u32 2147483647, %v918_v54 }
 0x3f2   : >> { %v936_v56 = vsub.f32 1.0, %v935_v53  ;;  %v933_v63 = vmul.f32 %v4060_v8, %v932_v58  ;;  %vm969_vm3 = vweird.f32 %v918_v54 }
 0x3f3   : >> { %v3661_v57 = vpop.permute.xlu0 %3660  ;;  %v976_v26 = vor.u32 1.1754944e-38, %v975_v19  ;;  %vm974_vm5 = vcmp.eq.f32.partialorder %v973_v23, 8.507059e+37 }
 0x3f4   : >> { %v3662_v59 = vunpack.i.l.bf16 %v3661_v57  ;;  %v937_v60 = vmul.f32 %v3700_v52, %v936_v56  ;;  %v3663_v62 = vunpack.i.h.bf16 %v3661_v57 }
 0x3f6   : >> { %1007 = vmatpush.msra.mxu1 %v3662_v59  ;;  %v938_v10 = vadd.f32 %v3700_v52, %v937_v60 }
 0x3f7   : >> { %v3702_v12 = vpop.eup %3701 }
 0x3f8   : >> { %1008 = vmatpush.msra.mxu1 %v3663_v62  ;;  %v965_v14 = vmul.f32 %v3702_v12, %v918_v54  ;;  %v942_v15 = vsel %vm941_vm14, %v3700_v52, %v938_v10  ;;  %vm970_vm2 = vweird.f32 %v3702_v12 }
 0x3f9   : >> { %3497 = vmatmul.msk.f32.vlgmr.msra.gmra.mxu1 %vm518_vm1, %v933_v63  ;;  %v947_v21 = vsel %vm944_vm15, %v946_v16, %v942_v15  ;;  %vm971_vm4 = vmor %vm969_vm3, %vm970_vm2 }
 0x3fa   : >> { %v966_v18 = vsub.f32 1.0, %v965_v14  ;;  %v948_v8 = vmul.f32 %v4065_v17, %v947_v21 }
 0x3fc   : >> { %v967_v22 = vmul.f32 %v3702_v12, %v966_v18 }
 0x3fe   : >> { %v968_v25 = vadd.f32 %v3702_v12, %v967_v22 }
 0x400   : >> { %v972_v28 = vsel %vm971_vm4, %v3702_v12, %v968_v25  ;;  %vm1288_vm4 = vcmask 523264  }
 0x401   : >> { %v745_v27 = vpop.f32.mrf.mxu1  ;;  %3498 = vmatmul.msk.f32.gmra.mxu1 %vm518_vm1, %v948_v8  ;;  %v977_v29 = vsel %vm974_vm5, %v976_v26, %v972_v28 }
 0x402   : >> { %3487 = vmatmul.msk.f32.gmra.mxu2 %vm518_vm1, %v745_v27  ;;  %v978_v30 = vmul.f32 %v4070_v24, %v977_v29  ;;  %v780_v24 = vpop.f32.mrf.mxu2 }
 0x403   : >> { %v793_v34 = vadd.f32 %v792_v33, %v780_v24 }
 0x404   : >> { %3500 = vmatmul.msk.f32.gmra.mxu3 %vm518_vm1, %v978_v30  ;;  %v403_v30 = vld [vmem:[%s399_s20 + $0x18] sm:$0xff] }
 0x405   : >> { %1234 = vmatpush.msrb.mxu1 %v403_v30 }
 0x409   : >> { %v748_v48 = vpop.f32.mrf.mxu1 }
 0x40a   : >> { %3488 = vmatmul.msk.f32.gmra.mxu2 %vm518_vm1, %v748_v48  ;;  %v783_v38 = vpop.f32.mrf.mxu2  ;;  %v402_v48 = vld [vmem:[%s399_s20 + $0x10] sm:$0xff] }
 0x40b   : >> { %v794_v39 = vadd.f32 %v792_v33, %v783_v38  ;;  %1235 = vmatpush.msrb.mxu1 %v402_v48  ;;  %v412_v48 = vld [vmem:[%s405_s24 + $0x30] sm:$0xff] }
 0x40d   : >> { %1236 = vmatpush.msrb.mxu1 %v401_v49  ;;  %v411_v49 = vld [vmem:[%s405_s24 + $0x28] sm:$0xff] }
 0x476   : >> { %v1010_v17 = vpop.f32.mrf.mxu1 }
 0x477   : >> { %3501 = vmatmul.msk.f32.vlgmr.msrb.gmra.mxu0 %vm518_vm1, %v1010_v17  ;;  %v400_v17 = vld [vmem:[%s399_s20] sm:$0xff] }
 0x478   : >> { %1237 = vmatpush.msrb.mxu1 %v400_v17  ;;  %v410_v17 = vld [vmem:[%s405_s24 + $0x20] sm:$0xff] }
 0x47e   : >> { %v1013_v50 = vpop.f32.mrf.mxu1 }
 0x47f   : >> { %3502 = vmatmul.msk.f32.gmra.mxu0 %vm518_vm1, %v1013_v50 }
 0x485   : >> { %v786_v44 = vpop.f32.mrf.mxu2 }
 0x486   : >> { %v795_v45 = vadd.f32 %v792_v33, %v786_v44 }
 0x487   : >> { %3503 = vmatmul.msk.f32.gmra.mxu0 %vm518_vm1, %v1047_v31  ;;  %v1050_v32 = vpop.f32.mrf.mxu3 }
 0x48d   : >> { %v789_v52 = vpop.f32.mrf.mxu2 }
 0x48e   : >> { %v796_v13 = vadd.f32 %v792_v33, %v789_v52  ;;  %v1202_v52 = vperm.slane %v3971_v20, 6 }
 0x48f   : >> { %3504 = vmatmul.msk.f32.gmra.mxu0 %vm518_vm1, %v1050_v32 }
 0x4f4   : >> { %v1082_v9 = vpop.f32.mrf.mxu0 }
 0x4f5   : >> { %v1094_v37 = vadd.f32 %v1082_v9, %v793_v34 }
 0x4f7   : >> { %v1098_v42 = vadd.f32 %v3809_v0, %v1094_v37 }
 0x4f9   : >> { %v1102_v43 = vsel %vm361_vm0, %v1098_v42, 0.0 }
 0x4fa   : >> { %1103 = vadd.xlane.f32.xlu2 %v1102_v43 }
 0x4fc   : >> { %v1085_v40 = vpop.f32.mrf.mxu0 }
 0x4fd   : >> { %v1095_v41 = vadd.f32 %v1085_v40, %v794_v39 }
 0x4ff   : >> { %v1099_v35 = vadd.f32 %v3805_v5, %v1095_v41  ;;  %v3819_v5 = vmov 32.0  }
 0x500   : >> { %3703 = vrcp.f32 %v3819_v5 }
 0x501   : >> { %v1105_v36 = vsel %vm361_vm0, %v1099_v35, 0.0 }
 0x502   : >> { %1106 = vadd.xlane.f32.xlu2 %v1105_v36 }
 0x504   : >> { %v1088_v46 = vpop.f32.mrf.mxu0 }
 0x505   : >> { %v1096_v47 = vadd.f32 %v1088_v46, %v795_v45  ;;  %v1197_v45 = vperm.slane %v3971_v20, 5 }
 0x506   : >> { %v3704_v57 = vpop.eup %3703 }
 0x507   : >> { %v1100_v51 = vadd.f32 %v3801_v6, %v1096_v47  ;;  %v1115_v58 = vmul.f32 32.0, %v3704_v57  ;;  %vm1119_vm1 = vweird.f32 %v3704_v57 }
 0x509   : >> { %v1108_v0 = vsel %vm361_vm0, %v1100_v51, 0.0  ;;  %v1116_v59 = vsub.f32 1.0, %v1115_v58 }
 0x50a   : >> { %1109 = vadd.xlane.f32.xlu0 %v1108_v0 }
 0x50b   : >> { %v1117_v60 = vmul.f32 %v3704_v57, %v1116_v59 }
 0x50c   : >> { %v1091_v53 = vpop.f32.mrf.mxu0 }
 0x50d   : >> { %v1097_v54 = vadd.f32 %v1091_v53, %v796_v13  ;;  %v1118_v61 = vadd.f32 %v3704_v57, %v1117_v60 }
 0x50f   : >> { %v1101_v55 = vadd.f32 %v3797_v7, %v1097_v54  ;;  %v4108_v6 = vsel %vm1119_vm1, %v3704_v57, %v1118_v61 }
 0x511   : >> { %v1111_v56 = vsel %vm361_vm0, %v1101_v55, 0.0 }
 0x512   : >> { %1112 = vadd.xlane.f32.xlu2 %v1111_v56 }
 0x56d   : >> { %v1104_v62 = vpop.xlane.xlu2 %1103 }
 0x56e   : >> { %v1121_v63 = vmul.f32 %v4108_v6, %v1104_v62 }
 0x570   : >> { %v1125_v10 = vsub.f32 %v1098_v42, %v1121_v63 }
 0x572   : >> { %v1129_v11 = vmul.f32 %v1125_v10, %v1125_v10 }
 0x574   : >> { %v1133_v7 = vsel %vm361_vm0, %v1129_v11, 0.0 }
 0x575   : >> { %1134 = vadd.xlane.f32.xlu1 %v1133_v7  ;;  %v1107_v12 = vpop.xlane.xlu2 %1106 }
 0x576   : >> { %v1122_v14 = vmul.f32 %v4108_v6, %v1107_v12 }
 0x578   : >> { %v4113_v15 = vsub.f32 %v1099_v35, %v1122_v14 }
 0x57a   : >> { %v1130_v16 = vmul.f32 %v4113_v15, %v4113_v15 }
 0x57c   : >> { %v1136_v18 = vsel %vm361_vm0, %v1130_v16, 0.0 }
 0x57d   : >> { %v1110_v19 = vpop.xlane.xlu0 %1109  ;;  %1137 = vadd.xlane.f32.xlu2 %v1136_v18 }
 0x57e   : >> { %v1123_v21 = vmul.f32 %v4108_v6, %v1110_v19 }
 0x580   : >> { %v4119_v22 = vsub.f32 %v1100_v51, %v1123_v21 }
 0x582   : >> { %v1131_v23 = vmul.f32 %v4119_v22, %v4119_v22 }
 0x584   : >> { %v1139_v8 = vsel %vm361_vm0, %v1131_v23, 0.0 }
 0x585   : >> { %1140 = vadd.xlane.f32.xlu2 %v1139_v8  ;;  %v1113_v25 = vpop.xlane.xlu2 %1112 }
 0x586   : >> { %v1124_v26 = vmul.f32 %v4108_v6, %v1113_v25 }
 0x588   : >> { %v4125_v27 = vsub.f32 %v1101_v55, %v1124_v26 }
 0x58a   : >> { %v1132_v28 = vmul.f32 %v4125_v27, %v4125_v27 }
 0x58c   : >> { %v1142_v29 = vsel %vm361_vm0, %v1132_v28, 0.0 }
 0x58d   : >> { %1143 = vadd.xlane.f32.xlu2 %v1142_v29 }
 0x5e8   : >> { %v1135_v50 = vpop.xlane.xlu1 %1134 }
 0x5e9   : >> { %v1145_v31 = vmul.f32 %v1135_v50, %v4108_v6  ;;  %v408_v50 = vld [vmem:[%s405_s24 + $0x10] sm:$0xff] }
 0x5eb   : >> { %v1149_v32 = vadd.f32 1e-12, %v1145_v31  ;;  %v407_v31 = vld [vmem:[%s405_s24 + $0x8] sm:$0xff] }
 0x5ed   : >> { %3705 = vrsqrt.f32 %v1149_v32  ;;  %vm1159_vm7 = vweird.f32 %v1149_v32 }
 0x5f0   : >> { %v1138_v24 = vpop.xlane.xlu2 %1137 }
 0x5f1   : >> { %v1146_v33 = vmul.f32 %v1138_v24, %v4108_v6  ;;  %v3669_v24 = vld [vmem:[%s414_s15] ss:$0 sm:$0xff] }
 0x5f3   : >> { %v3706_v34 = vpop.eup %3705  ;;  %v1150_v9 = vadd.f32 1e-12, %v1146_v33 }
 0x5f4   : >> { %v1154_v37 = vmul.f32 %v3706_v34, %v1149_v32  ;;  %vm1160_vm6 = vweird.f32 %v3706_v34  ;;  %v406_v32 = vld [vmem:[%s405_s24] sm:$0xff] }
 0x5f5   : >> { %3707 = vrsqrt.f32 %v1150_v9  ;;  %vm1161_vm8 = vmor %vm1159_vm7, %vm1160_vm6  ;;  %vm1169_vm10 = vweird.f32 %v1150_v9 }
 0x5f6   : >> { %v1155_v38 = vmul.f32 %v3706_v34, %v1154_v37 }
 0x5f8   : >> { %v1156_v42 = vmul.f32 0.5, %v1155_v38  ;;  %v1141_v43 = vpop.xlane.xlu2 %1140 }
 0x5f9   : >> { %v1147_v39 = vmul.f32 %v1141_v43, %v4108_v6 }
 0x5fa   : >> { %v1157_v40 = vsub.f32 1.5, %v1156_v42 }
 0x5fb   : >> { %v3708_v41 = vpop.eup %3707  ;;  %v1151_v44 = vadd.f32 1e-12, %v1147_v39 }
 0x5fc   : >> { %v1158_v35 = vmul.f32 %v3706_v34, %v1157_v40  ;;  %v1164_v36 = vmul.f32 %v3708_v41, %v1150_v9  ;;  %vm1170_vm9 = vweird.f32 %v3708_v41 }
 0x5fd   : >> { %3709 = vrsqrt.f32 %v1151_v44  ;;  %vm1171_vm11 = vmor %vm1169_vm10, %vm1170_vm9  ;;  %vm1179_vm13 = vweird.f32 %v1151_v44 }
 0x5fe   : >> { %v1162_v46 = vsel %vm1161_vm8, %v3706_v34, %v1158_v35  ;;  %v1165_v47 = vmul.f32 %v3708_v41, %v1164_v36 }
 0x5ff   : >> { %v1193_v51 = vmul.f32 %v1162_v46, %v1125_v10 }
 0x600   : >> { %v1166_v0 = vmul.f32 0.5, %v1165_v47  ;;  %v1144_v13 = vpop.xlane.xlu2 %1143 }
 0x601   : >> { %v1148_v53 = vmul.f32 %v1144_v13, %v4108_v6  ;;  %v1198_v54 = vmul.f32 %v1197_v45, %v1193_v51 }
 0x602   : >> { %v1167_v55 = vsub.f32 1.5, %v1166_v0 }
 0x603   : >> { %v3710_v56 = vpop.eup %3709  ;;  %v1152_v5 = vadd.f32 1e-12, %v1148_v53  ;;  %v4146_v57 = vadd.f32 %v1202_v52, %v1198_v54 }
 0x604   : >> { %v1168_v58 = vmul.f32 %v3708_v41, %v1167_v55  ;;  %v1174_v59 = vmul.f32 %v3710_v56, %v1151_v44  ;;  %vm1180_vm12 = vweird.f32 %v3710_v56 }
 0x605   : >> { %3711 = vrsqrt.f32 %v1152_v5  ;;  %3505 = vmatmul.msk.f32.vlgmr.msrb.gmra.mxu1 %vm361_vm0, %v4146_v57  ;;  %vm1181_vm14 = vmor %vm1179_vm13, %vm1180_vm12  ;;  %vm1189_vm2 = vweird.f32 %v1152_v5 }
 0x606   : >> { %v1175_v20 = vmul.f32 %v3710_v56, %v1174_v59  ;;  %v1172_v60 = vsel %vm1171_vm11, %v3708_v41, %v1168_v58 }
 0x607   : >> { %v1194_v61 = vmul.f32 %v1172_v60, %v4113_v15 }
 0x608   : >> { %v1176_v62 = vmul.f32 0.5, %v1175_v20 }
 0x609   : >> { %v1199_v63 = vmul.f32 %v1197_v45, %v1194_v61 }
 0x60a   : >> { %v1177_v10 = vsub.f32 1.5, %v1176_v62 }
 0x60b   : >> { %v3712_v11 = vpop.eup %3711  ;;  %v4151_v7 = vadd.f32 %v1202_v52, %v1199_v63 }
 0x60c   : >> { %v1178_v12 = vmul.f32 %v3710_v56, %v1177_v10  ;;  %v1184_v14 = vmul.f32 %v3712_v11, %v1152_v5  ;;  %vm1190_vm15 = vweird.f32 %v3712_v11 }
 0x60d   : >> { %3506 = vmatmul.msk.f32.gmra.mxu1 %vm361_vm0, %v4151_v7  ;;  %vm1191_vm3 = vmor %vm1189_vm2, %vm1190_vm15 }
 0x60e   : >> { %v1185_v16 = vmul.f32 %v3712_v11, %v1184_v14  ;;  %v1182_v18 = vsel %vm1181_vm14, %v3710_v56, %v1178_v12 }
 0x60f   : >> { %v1195_v19 = vmul.f32 %v1182_v18, %v4119_v22  ;;  %v413_v22 = vld [vmem:[%s405_s24 + $0x38] sm:$0xff] }
 0x610   : >> { %v1186_v15 = vmul.f32 0.5, %v1185_v16  ;;  %1309 = vmatpush.msra.mxu2 %v413_v22 }
 0x611   : >> { %v1200_v21 = vmul.f32 %v1197_v45, %v1195_v19 }
 0x612   : >> { %v1187_v23 = vsub.f32 1.5, %v1186_v15  ;;  %1310 = vmatpush.msra.mxu2 %v412_v48 }
 0x613   : >> { %v4156_v8 = vadd.f32 %v1202_v52, %v1200_v21 }
 0x614   : >> { %v1188_v25 = vmul.f32 %v3712_v11, %v1187_v23  ;;  %1311 = vmatpush.msra.mxu2 %v411_v49 }
 0x615   : >> { %3507 = vmatmul.msk.f32.gmra.mxu1 %vm361_vm0, %v4156_v8 }
 0x616   : >> { %v1192_v26 = vsel %vm1191_vm3, %v3712_v11, %v1188_v25  ;;  %1312 = vmatpush.msra.mxu2 %v410_v17 }
 0x617   : >> { %v1196_v28 = vmul.f32 %v1192_v26, %v4125_v27  ;;  %v409_v27 = vld [vmem:[%s405_s24 + $0x18] sm:$0xff] }
 0x618   : >> { %1313 = vmatpush.msra.mxu2 %v409_v27 }
 0x619   : >> { %v1201_v29 = vmul.f32 %v1197_v45, %v1196_v28  ;;  %v4179_v28 = vld [vmem:[%s3936_s11] sm:$0xff] }
 0x61a   : >> { %1314 = vmatpush.msra.mxu2 %v408_v50 }
 0x61b   : >> { %v4161_v30 = vadd.f32 %v1202_v52, %v1201_v29  ;;  %v1287_v29 = vperm.slane %v4179_v28, 4 }
 0x61c   : >> { %1315 = vmatpush.msra.mxu2 %v407_v31 }
 0x61d   : >> { %3508 = vmatmul.msk.f32.gmra.mxu1 %vm361_vm0, %v4161_v30 }
 0x61e   : >> { %1316 = vmatpush.msra.mxu2 %v406_v32 }
 0x682   : >> { %v1239_v33 = vpop.f32.mrf.mxu1 }
 0x683   : >> { %v1240_v34 = vadd.f32 %v3669_v24, %v1239_v33 }
 0x685   : >> { %v1255_v9 = vmul.f32 0.044715, %v1240_v34  ;;  %v1251_v0 = vmul.f32 0.5, %v1240_v34 }
 0x687   : >> { %v1259_v37 = vmul.f32 %v1255_v9, %v1240_v34 }
 0x689   : >> { %v1263_v38 = vmul.f32 %v1259_v37, %v1240_v34 }
 0x68a   : >> { %v1242_v42 = vpop.f32.mrf.mxu1 }
 0x68b   : >> { %v1267_v43 = vadd.f32 %v1263_v38, %v1240_v34  ;;  %v1243_v39 = vadd.f32 %v3669_v24, %v1242_v42 }
 0x68d   : >> { %v1271_v40 = vmul.f32 0.7978846, %v1267_v43  ;;  %v1256_v41 = vmul.f32 0.044715, %v1243_v39  ;;  %v1252_v61 = vmul.f32 0.5, %v1243_v39 }
 0x68f   : >> { %3713 = vtanh.f32 %v1271_v40  ;;  %v1260_v44 = vmul.f32 %v1256_v41, %v1243_v39 }
 0x691   : >> { %v1264_v35 = vmul.f32 %v1260_v44, %v1243_v39 }
 0x692   : >> { %v1245_v36 = vpop.f32.mrf.mxu1 }
 0x693   : >> { %v1246_v45 = vadd.f32 %v3669_v24, %v1245_v36  ;;  %v1268_v46 = vadd.f32 %v1264_v35, %v1243_v39 }
 0x695   : >> { %v3714_v47 = vpop.eup %3713  ;;  %v1257_v51 = vmul.f32 0.044715, %v1246_v45  ;;  %v1272_v52 = vmul.f32 0.7978846, %v1268_v46  ;;  %v1253_v18 = vmul.f32 0.5, %v1246_v45 }
 0x696   : >> { %v1279_v13 = vadd.f32 1.0, %v3714_v47 }
 0x697   : >> { %3715 = vtanh.f32 %v1272_v52  ;;  %v1261_v53 = vmul.f32 %v1257_v51, %v1246_v45 }
 0x698   : >> { %v1283_v54 = vmul.f32 %v1279_v13, %v1251_v0 }
 0x699   : >> { %v1265_v55 = vmul.f32 %v1261_v53, %v1246_v45 }
 0x69a   : >> { %v1248_v56 = vpop.f32.mrf.mxu1  ;;  %3509 = vmatmul.msk.f32.vlgmr.msra.gmra.mxu2 %vm1288_vm4, %v1283_v54 }
 0x69b   : >> { %v1249_v5 = vadd.f32 %v3669_v24, %v1248_v56  ;;  %v1269_v58 = vadd.f32 %v1265_v55, %v1246_v45 }
 0x69d   : >> { %v3716_v59 = vpop.eup %3715  ;;  %v1258_v20 = vmul.f32 0.044715, %v1249_v5  ;;  %v1273_v60 = vmul.f32 0.7978846, %v1269_v58  ;;  %v1254_v23 = vmul.f32 0.5, %v1249_v5 }
 0x69e   : >> { %v1280_v62 = vadd.f32 1.0, %v3716_v59 }
 0x69f   : >> { %3717 = vtanh.f32 %v1273_v60  ;;  %v1262_v63 = vmul.f32 %v1258_v20, %v1249_v5 }
 0x6a0   : >> { %v1284_v10 = vmul.f32 %v1280_v62, %v1252_v61 }
 0x6a1   : >> { %v1266_v11 = vmul.f32 %v1262_v63, %v1249_v5 }
 0x6a2   : >> { %3510 = vmatmul.msk.f32.gmra.mxu2 %vm1288_vm4, %v1284_v10 }
 0x6a3   : >> { %v1270_v12 = vadd.f32 %v1266_v11, %v1249_v5 }
 0x6a5   : >> { %v3718_v14 = vpop.eup %3717  ;;  %v1274_v16 = vmul.f32 0.7978846, %v1270_v12 }
 0x6a6   : >> { %v1281_v19 = vadd.f32 1.0, %v3718_v14 }
 0x6a7   : >> { %3719 = vtanh.f32 %v1274_v16 }
 0x6a8   : >> { %v1285_v15 = vmul.f32 %v1281_v19, %v1253_v18 }
 0x6aa   : >> { %3511 = vmatmul.msk.f32.gmra.mxu2 %vm1288_vm4, %v1285_v15 }
 0x6ad   : >> { %v3720_v21 = vpop.eup %3719 }
 0x6ae   : >> { %v1282_v25 = vadd.f32 1.0, %v3720_v21  ;;  %v1422_v21 = vperm.slane %v4179_v28, 7 }
 0x6b0   : >> { %v1286_v26 = vmul.f32 %v1282_v25, %v1254_v23 }
 0x6b2   : >> { %3512 = vmatmul.msk.f32.gmra.mxu2 %vm1288_vm4, %v1286_v26  ;;  %v3670_v26 = vld [vmem:[%s3936_s11 + $0x8] ss:$0 sm:$0xff]  ;;  %vm1881_vm4 = vcmask (%p368_p8), 23552  }
 0x71d   : >> { %v1318_v22 = vpop.f32.mrf.mxu2 }
 0x71e   : >> { %v1319_v48 = vadd.f32 %v1318_v22, %v1287_v29 }
 0x720   : >> { %v1330_v49 = vadd.f32 %v1319_v48, %v4146_v57 }
 0x722   : >> { %v1334_v17 = vsel %vm361_vm0, %v1330_v49, 0.0 }
 0x723   : >> { %1335 = vadd.xlane.f32.xlu2 %v1334_v17 }
 0x725   : >> { %v1321_v27 = vpop.f32.mrf.mxu2 }
 0x726   : >> { %v1322_v50 = vadd.f32 %v1321_v27, %v1287_v29 }
 0x728   : >> { %v1331_v31 = vadd.f32 %v1322_v50, %v4151_v7 }
 0x72a   : >> { %v1337_v32 = vsel %vm361_vm0, %v1331_v31, 0.0 }
 0x72b   : >> { %1338 = vadd.xlane.f32.xlu0 %v1337_v32 }
 0x72d   : >> { %v1324_v24 = vpop.f32.mrf.mxu2 }
 0x72e   : >> { %v1325_v33 = vadd.f32 %v1324_v24, %v1287_v29 }
 0x730   : >> { %v1332_v34 = vadd.f32 %v1325_v33, %v4156_v8 }
 0x732   : >> { %v1340_v9 = vsel %vm361_vm0, %v1332_v34, 0.0 }
 0x733   : >> { %1341 = vadd.xlane.f32.xlu2 %v1340_v9 }
 0x735   : >> { %v1327_v37 = vpop.f32.mrf.mxu2 }
 0x736   : >> { %v1328_v38 = vadd.f32 %v1327_v37, %v1287_v29 }
 0x738   : >> { %v1333_v57 = vadd.f32 %v1328_v38, %v4161_v30 }
 0x73a   : >> { %v1343_v42 = vsel %vm361_vm0, %v1333_v57, 0.0 }
 0x73b   : >> { %1344 = vadd.xlane.f32.xlu0 %v1343_v42 }
 0x796   : >> { %v1336_v43 = vpop.xlane.xlu2 %1335 }
 0x797   : >> { %v1346_v7 = vmul.f32 %v1336_v43, %v4108_v6 }
 0x799   : >> { %v1350_v39 = vsub.f32 %v1330_v49, %v1346_v7 }
 0x79b   : >> { %v1354_v40 = vmul.f32 %v1350_v39, %v1350_v39 }
 0x79d   : >> { %v1358_v41 = vsel %vm361_vm0, %v1354_v40, 0.0 }
 0x79e   : >> { %v1339_v44 = vpop.xlane.xlu0 %1338  ;;  %1359 = vadd.xlane.f32.xlu1 %v1358_v41 }
 0x79f   : >> { %v1347_v8 = vmul.f32 %v1339_v44, %v4108_v6 }
 0x7a1   : >> { %v1351_v35 = vsub.f32 %v1331_v31, %v1347_v8 }
 0x7a3   : >> { %v1355_v36 = vmul.f32 %v1351_v35, %v1351_v35 }
 0x7a5   : >> { %v1361_v45 = vsel %vm361_vm0, %v1355_v36, 0.0 }
 0x7a6   : >> { %1362 = vadd.xlane.f32.xlu2 %v1361_v45  ;;  %v1342_v30 = vpop.xlane.xlu2 %1341 }
 0x7a7   : >> { %v1348_v46 = vmul.f32 %v1342_v30, %v4108_v6  ;;  %v1494_v30 = vld [vmem:[%s5727_s7 + $0x18] sm:$0xff] (%p368_p8) }
 0x7a8   : > { %1663 = vmatpush.msra.mxu0 (%p368_p8), %v1494_v30  ;;  %3583 = vmatpush.msra.mxu1 (%p368_p8), %v1494_v30 }
 0x7a9   : >> { %v4195_v47 = vsub.f32 %v1332_v34, %v1348_v46  ;;  %v1493_v46 = vld [vmem:[%s5727_s7 + $0x10] sm:$0xff] (%p368_p8)  ;;  %3584 = vmatpush.msra.mxu2 (%p368_p8), %v1494_v30  ;;  %3585 = vmatpush.msra.mxu3 (%p368_p8), %v1494_v30 }
 0x7aa   : > { %1664 = vmatpush.msra.mxu0 (%p368_p8), %v1493_v46  ;;  %3586 = vmatpush.msra.mxu1 (%p368_p8), %v1493_v46 }
 0x7ab   : >> { %v1356_v51 = vmul.f32 %v4195_v47, %v4195_v47  ;;  %3587 = vmatpush.msra.mxu2 (%p368_p8), %v1493_v46  ;;  %3588 = vmatpush.msra.mxu3 (%p368_p8), %v1493_v46 }
 0x7ad   : >> { %v1364_v52 = vsel %vm361_vm0, %v1356_v51, 0.0 }
 0x7ae   : >> { %v1345_v0 = vpop.xlane.xlu0 %1344  ;;  %1365 = vadd.xlane.f32.xlu0 %v1364_v52 }
 0x7af   : >> { %v1349_v13 = vmul.f32 %v1345_v0, %v4108_v6 }
 0x7b1   : >> { %v4201_v53 = vsub.f32 %v1333_v57, %v1349_v13 }
 0x7b3   : >> { %v1357_v54 = vmul.f32 %v4201_v53, %v4201_v53 }
 0x7b5   : >> { %v1367_v55 = vsel %vm361_vm0, %v1357_v54, 0.0 }
 0x7b6   : >> { %1368 = vadd.xlane.f32.xlu1 %v1367_v55 }
 0x811   : >> { %v1360_v56 = vpop.xlane.xlu1 %1359 }
 0x812   : >> { %v1370_v5 = vmul.f32 %v1360_v56, %v4108_v6 }
 0x814   : >> { %v1374_v58 = vadd.f32 1e-12, %v1370_v5 }
 0x816   : >> { %3721 = vrsqrt.f32 %v1374_v58  ;;  %vm1384_vm1 = vweird.f32 %v1374_v58 }
 0x819   : >> { %v1363_v59 = vpop.xlane.xlu2 %1362 }
 0x81a   : >> { %v1371_v20 = vmul.f32 %v1363_v59, %v4108_v6 }
 0x81c   : >> { %v3722_v60 = vpop.eup %3721  ;;  %v1375_v61 = vadd.f32 1e-12, %v1371_v20 }
 0x81d   : >> { %v1379_v62 = vmul.f32 %v3722_v60, %v1374_v58  ;;  %vm1385_vm5 = vweird.f32 %v3722_v60 }
 0x81e   : >> { %3723 = vrsqrt.f32 %v1375_v61  ;;  %vm1386_vm6 = vmor %vm1384_vm1, %vm1385_vm5  ;;  %vm1394_vm8 = vweird.f32 %v1375_v61  ;;  %vm2512_vm5 = vcmask (%p368_p8), 1046528   ;;  %vm2747_vm1 = vcmask (%p368_p8), 1045504  }
 0x81f   : >> { %v1380_v63 = vmul.f32 %v3722_v60, %v1379_v62 }
 0x821   : >> { %v1381_v10 = vmul.f32 0.5, %v1380_v63  ;;  %v1366_v11 = vpop.xlane.xlu0 %1365 }
 0x822   : >> { %v1372_v12 = vmul.f32 %v1366_v11, %v4108_v6 }
 0x823   : >> { %v1382_v14 = vsub.f32 1.5, %v1381_v10 }
 0x824   : >> { %v3724_v16 = vpop.eup %3723  ;;  %v1376_v18 = vadd.f32 1e-12, %v1372_v12 }
 0x825   : >> { %v1383_v19 = vmul.f32 %v3722_v60, %v1382_v14  ;;  %v1389_v15 = vmul.f32 %v3724_v16, %v1375_v61  ;;  %vm1395_vm7 = vweird.f32 %v3724_v16 }
 0x826   : >> { %3725 = vrsqrt.f32 %v1376_v18  ;;  %vm1396_vm9 = vmor %vm1394_vm8, %vm1395_vm7  ;;  %vm1404_vm11 = vweird.f32 %v1376_v18  ;;  %vm3218_vm7 = vcmask (%p368_p8), 1041409   ;;  %vm3245_vm8 = vcmask (%p368_p8), 107520  }
 0x827   : >> { %v1387_v23 = vsel %vm1386_vm6, %v3722_v60, %v1383_v19  ;;  %v1390_v25 = vmul.f32 %v3724_v16, %v1389_v15  ;;  %vm3141_vm6 = vcmask (%p368_p8), 130112  }
 0x828   : >> { %v1418_v29 = vmul.f32 %v1387_v23, %v1350_v39 }
 0x829   : >> { %v1391_v22 = vmul.f32 0.5, %v1390_v25  ;;  %v1369_v48 = vpop.xlane.xlu1 %1368 }
 0x82a   : >> { %v1423_v49 = vmul.f32 %v1422_v21, %v1418_v29  ;;  %v1373_v17 = vmul.f32 %v1369_v48, %v4108_v6 }
 0x82b   : >> { %v1392_v27 = vsub.f32 1.5, %v1391_v22 }
 0x82c   : >> { %v3726_v50 = vpop.eup %3725  ;;  %v1428_v0 = vadd.f32 %v3670_v26, %v1423_v49   ;;  %v1377_v31 = vadd.f32 1e-12, %v1373_v17  ;;  %v1824_v17 = vlaneseq (%p368_p8) }
 0x82d   : >> { %v1393_v32 = vmul.f32 %v3724_v16, %v1392_v27  ;;  %v1399_v28 = vmul.f32 %v3726_v50, %v1376_v18  ;;  %vm1405_vm10 = vweird.f32 %v3726_v50 }
 0x82e   : >> { %3514 = vst.msk [vmem:[%s4214_s29 + $0x20] sm:$0xff] %vm361_vm0, %v1428_v0  ;;  %3727 = vrsqrt.f32 %v1377_v31  ;;  %vm1406_vm12 = vmor %vm1404_vm11, %vm1405_vm10  ;;  %vm1414_vm14 = vweird.f32 %v1377_v31  ;;  %v4284_v27 = vand.u32 (%p368_p8), 127, %v1824_v17  ;;  %vm3314_vm10 = vcmask (%p368_p8), 1043459  }
 0x82f   : >> { %v1397_v24 = vsel %vm1396_vm9, %v3724_v16, %v1393_v32  ;;  %v1400_v33 = vmul.f32 %v3726_v50, %v1399_v28  ;;  %vm3312_vm9 = vcmask (%p368_p8), 1042434   ;;  %vm3316_vm11 = vcmask (%p368_p8), 1044484  }
 0x830   : >> { %v1419_v6 = vmul.f32 %v1397_v24, %v1351_v35  ;;  %5741 = vst [vmem:[#allocation6_spill] sm:$0xff] (%p368_p8), %v4284_v27  ;;  %vm2038_vm2 = vcmp.eq.s32.totalorder (%p368_p8), %v4284_v27, 1  ;;  %vm1826_vm3 = vcmp.eq.s32.totalorder (%p368_p8), %v4284_v27, 0 }
 0x831   : >> { %v1401_v34 = vmul.f32 0.5, %v1400_v33 }
 0x832   : >> { %v1424_v9 = vmul.f32 %v1422_v21, %v1419_v6 }
 0x833   : >> { %v1402_v37 = vsub.f32 1.5, %v1401_v34 }
 0x834   : >> { %v3728_v38 = vpop.eup %3727  ;;  %v1429_v5 = vadd.f32 %v3670_v26, %v1424_v9  }
 0x835   : >> { %v1403_v57 = vmul.f32 %v3726_v50, %v1402_v37  ;;  %v1409_v42 = vmul.f32 %v3728_v38, %v1377_v31  ;;  %vm1415_vm13 = vweird.f32 %v3728_v38 }
 0x836   : >> { %3515 = vst.msk [vmem:[%s4214_s29 + $0x28] sm:$0xff] %vm361_vm0, %v1429_v5  ;;  %vm1416_vm15 = vmor %vm1414_vm14, %vm1415_vm13  ;;  %vm3320_vm13 = vcmask (%p368_p8), 1046534   ;;  %vm3322_vm14 = vcmask (%p368_p8), 1047559  }
 0x837   : >> { %v1407_v43 = vsel %vm1406_vm12, %v3726_v50, %v1403_v57  ;;  %v1410_v7 = vmul.f32 %v3728_v38, %v1409_v42  ;;  %vm3318_vm12 = vcmask (%p368_p8), 1045509  }
 0x838   : >> { %v1420_v39 = vmul.f32 %v1407_v43, %v4195_v47  ;;  %v1492_v47 = vld [vmem:[%s5727_s7 + $0x8] sm:$0xff] (%p368_p8) }
 0x839   : >> { %v1411_v40 = vmul.f32 0.5, %v1410_v7  ;;  %1665 = vmatpush.msra.mxu0 (%p368_p8), %v1492_v47  ;;  %3589 = vmatpush.msra.mxu1 (%p368_p8), %v1492_v47 }
 0x83a   : >> { %v1425_v41 = vmul.f32 %v1422_v21, %v1420_v39  ;;  %3590 = vmatpush.msra.mxu2 (%p368_p8), %v1492_v47  ;;  %3591 = vmatpush.msra.mxu3 (%p368_p8), %v1492_v47 }
 0x83b   : >> { %v1412_v44 = vsub.f32 1.5, %v1411_v40  ;;  %1666 = vmatpush.msra.mxu0 (%p368_p8), %v1491_v1  ;;  %3592 = vmatpush.msra.mxu1 (%p368_p8), %v1491_v1 }
 0x83c   : >> { %v1430_v6 = vadd.f32 %v3670_v26, %v1425_v41   ;;  %3593 = vmatpush.msra.mxu2 (%p368_p8), %v1491_v1  ;;  %3594 = vmatpush.msra.mxu3 (%p368_p8), %v1491_v1 }
 0x83d   : >> { %v1413_v8 = vmul.f32 %v3728_v38, %v1412_v44 }
 0x83e   : >> { %3516 = vst.msk [vmem:[%s4214_s29 + $0x30] sm:$0xff] %vm361_vm0, %v1430_v6 }
 0x83f   : >> { %v1417_v35 = vsel %vm1416_vm15, %v3728_v38, %v1413_v8  ;;  %vm3330_vm15 = vcmask (%p368_p8), 15360  }
 0x840   : >> { %v1421_v36 = vmul.f32 %v1417_v35, %v4201_v53 }
 0x842   : >> { %v1426_v45 = vmul.f32 %v1422_v21, %v1421_v36  ;;  %370 = sbr.rel (!%p368_p8) target bundleno = 23 (0x17), region = 103 }
 0x844   : >> { %v1431_v7 = vadd.f32 %v3670_v26, %v1426_v45  }
 0x846   : >> { %3517 = vst.msk [vmem:[%s4214_s29 + $0x38] sm:$0xff] %vm361_vm0, %v1431_v7 }
 0x84d   : > { %v1439_v2 = vld [vmem:[#allocation2] sm:$0xff]  ;;  %v1452_v3 = vld [vmem:[#allocation2 + $0x68] sm:$0xff]  ;;  %v1465_v4 = vld [vmem:[#allocation2 + $0xd0] sm:$0xff] }
 0x84e   : > { %v1478_v51 = vld [vmem:[#allocation2 + $0x138] sm:$0xff]  ;;  %3518 = vmatmul.msk.f32.vlgmr.msra.gmra.mxu0 %vm361_vm0, %v1439_v2  ;;  %3531 = vmatmul.msk.f32.vlgmr.msra.gmra.mxu1 %vm361_vm0, %v1452_v3  ;;  %v1453_v52 = vld [vmem:[#allocation2 + $0x70] sm:$0xff]  ;;  %v1440_v0 = vld [vmem:[#allocation2 + $0x8] sm:$0xff] }
 0x84f   : > { %3544 = vmatmul.msk.f32.vlgmr.msra.gmra.mxu2 %vm361_vm0, %v1465_v4  ;;  %3557 = vmatmul.msk.f32.vlgmr.msra.gmra.mxu3 %vm361_vm0, %v1478_v51  ;;  %v1479_v13 = vld [vmem:[#allocation2 + $0x140] sm:$0xff]  ;;  %v1466_v53 = vld [vmem:[#allocation2 + $0xd8] sm:$0xff]  ;;  %v1441_v54 = vld [vmem:[#allocation2 + $0x10] sm:$0xff] }
 0x850   : > { %v1454_v55 = vld [vmem:[#allocation2 + $0x78] sm:$0xff]  ;;  %v1480_v56 = vld [vmem:[#allocation2 + $0x148] sm:$0xff]  ;;  %v1467_v5 = vld [vmem:[#allocation2 + $0xe0] sm:$0xff] }
 0x851   : > { %v1455_v58 = vld [vmem:[#allocation2 + $0x80] sm:$0xff]  ;;  %v1442_v59 = vld [vmem:[#allocation2 + $0x18] sm:$0xff]  ;;  %v1468_v20 = vld [vmem:[#allocation2 + $0xe8] sm:$0xff] }
 0x852   : > { %v1481_v60 = vld [vmem:[#allocation2 + $0x150] sm:$0xff]  ;;  %v1443_v61 = vld [vmem:[#allocation2 + $0x20] sm:$0xff]  ;;  %v1456_v62 = vld [vmem:[#allocation2 + $0x88] sm:$0xff] }
 0x853   : > { %v1482_v63 = vld [vmem:[#allocation2 + $0x158] sm:$0xff]  ;;  %v1469_v10 = vld [vmem:[#allocation2 + $0xf0] sm:$0xff]  ;;  %v1444_v11 = vld [vmem:[#allocation2 + $0x28] sm:$0xff] }
 0x854   : > { %v1457_v12 = vld [vmem:[#allocation2 + $0x90] sm:$0xff]  ;;  %v1483_v14 = vld [vmem:[#allocation2 + $0x160] sm:$0xff]  ;;  %v1470_v16 = vld [vmem:[#allocation2 + $0xf8] sm:$0xff] }
 0x855   : > { %v1445_v18 = vld [vmem:[#allocation2 + $0x30] sm:$0xff]  ;;  %v1458_v19 = vld [vmem:[#allocation2 + $0x98] sm:$0xff]  ;;  %v1471_v15 = vld [vmem:[#allocation2 + $0x100] sm:$0xff] }
 0x856   : > { %3532 = vmatmul.msk.f32.gmra.mxu1 %vm361_vm0, %v1453_v52  ;;  %3519 = vmatmul.msk.f32.gmra.mxu0 %vm361_vm0, %v1440_v0  ;;  %v1484_v21 = vld [vmem:[#allocation2 + $0x168] sm:$0xff]  ;;  %v1459_v23 = vld [vmem:[#allocation2 + $0xa0] sm:$0xff]  ;;  %v1446_v25 = vld [vmem:[#allocation2 + $0x38] sm:$0xff] }
 0x857   : > { %3558 = vmatmul.msk.f32.gmra.mxu3 %vm361_vm0, %v1479_v13  ;;  %3545 = vmatmul.msk.f32.gmra.mxu2 %vm361_vm0, %v1466_v53  ;;  %v1485_v26 = vld [vmem:[#allocation2 + $0x170] sm:$0xff]  ;;  %v1472_v29 = vld [vmem:[#allocation2 + $0x108] sm:$0xff]  ;;  %v1447_v22 = vld [vmem:[#allocation2 + $0x40] sm:$0xff] }
 0x858   : > { %v1486_v48 = vld [vmem:[#allocation2 + $0x178] sm:$0xff]  ;;  %v1460_v49 = vld [vmem:[#allocation2 + $0xa8] sm:$0xff]  ;;  %v1473_v50 = vld [vmem:[#allocation2 + $0x110] sm:$0xff] }
 0x859   : > { %v1448_v37 = vld [vmem:[#allocation2 + $0x48] sm:$0xff]  ;;  %v1461_v38 = vld [vmem:[#allocation2 + $0xb0] sm:$0xff]  ;;  %v1474_v35 = vld [vmem:[#allocation2 + $0x118] sm:$0xff] }
 0x85a   : > { %v1487_v36 = vld [vmem:[#allocation2 + $0x180] sm:$0xff]  ;;  %v1449_v52 = vld [vmem:[#allocation2 + $0x50] sm:$0xff]  ;;  %v1462_v0 = vld [vmem:[#allocation2 + $0xb8] sm:$0xff] }
 0x85e   : > { %3520 = vmatmul.msk.f32.gmra.mxu0 %vm361_vm0, %v1441_v54  ;;  %3533 = vmatmul.msk.f32.gmra.mxu1 %vm361_vm0, %v1454_v55 }
 0x85f   : > { %3559 = vmatmul.msk.f32.gmra.mxu3 %vm361_vm0, %v1480_v56  ;;  %3546 = vmatmul.msk.f32.gmra.mxu2 %vm361_vm0, %v1467_v5 }
 0x866   : > { %3534 = vmatmul.msk.f32.gmra.mxu1 %vm361_vm0, %v1455_v58  ;;  %3521 = vmatmul.msk.f32.gmra.mxu0 %vm361_vm0, %v1442_v59 }
 0x867   : > { %3547 = vmatmul.msk.f32.gmra.mxu2 %vm361_vm0, %v1468_v20  ;;  %3560 = vmatmul.msk.f32.gmra.mxu3 %vm361_vm0, %v1481_v60  ;;  %v1488_v20 = vld [vmem:[#allocation2 + $0x188] sm:$0xff] }
 0x86e   : > { %3522 = vmatmul.msk.f32.gmra.mxu0 %vm361_vm0, %v1443_v61  ;;  %3535 = vmatmul.msk.f32.gmra.mxu1 %vm361_vm0, %v1456_v62 }
 0x86f   : > { %3561 = vmatmul.msk.f32.gmra.mxu3 %vm361_vm0, %v1482_v63  ;;  %3548 = vmatmul.msk.f32.gmra.mxu2 %vm361_vm0, %v1469_v10 }
 0x876   : > { %3523 = vmatmul.msk.f32.gmra.mxu0 %vm361_vm0, %v1444_v11  ;;  %3536 = vmatmul.msk.f32.gmra.mxu1 %vm361_vm0, %v1457_v12 }
 0x877   : > { %3562 = vmatmul.msk.f32.gmra.mxu3 %vm361_vm0, %v1483_v14  ;;  %3549 = vmatmul.msk.f32.gmra.mxu2 %vm361_vm0, %v1470_v16  ;;  %v1475_v16 = vld [vmem:[#allocation2 + $0x120] sm:$0xff] }
 0x87e   : > { %3524 = vmatmul.msk.f32.gmra.mxu0 %vm361_vm0, %v1445_v18  ;;  %3537 = vmatmul.msk.f32.gmra.mxu1 %vm361_vm0, %v1458_v19  ;;  %v1450_v18 = vld [vmem:[#allocation2 + $0x58] sm:$0xff] }
 0x87f   : > { %3550 = vmatmul.msk.f32.gmra.mxu2 %vm361_vm0, %v1471_v15  ;;  %3563 = vmatmul.msk.f32.gmra.mxu3 %vm361_vm0, %v1484_v21 }
 0x886   : > { %3538 = vmatmul.msk.f32.gmra.mxu1 %vm361_vm0, %v1459_v23  ;;  %3525 = vmatmul.msk.f32.gmra.mxu0 %vm361_vm0, %v1446_v25 }
 0x887   : > { %3564 = vmatmul.msk.f32.gmra.mxu3 %vm361_vm0, %v1485_v26  ;;  %3551 = vmatmul.msk.f32.gmra.mxu2 %vm361_vm0, %v1472_v29 }
 0x88e   : > { %3526 = vmatmul.msk.f32.gmra.mxu0 %vm361_vm0, %v1447_v22  ;;  %3539 = vmatmul.msk.f32.gmra.mxu1 %vm361_vm0, %v1460_v49  ;;  %v1489_v22 = vld [vmem:[#allocation2 + $0x190] sm:$0xff] }
 0x88f   : > { %3565 = vmatmul.msk.f32.gmra.mxu3 %vm361_vm0, %v1486_v48  ;;  %3552 = vmatmul.msk.f32.gmra.mxu2 %vm361_vm0, %v1473_v50  ;;  %v1463_v48 = vld [vmem:[#allocation2 + $0xc0] sm:$0xff] }
 0x896   : > { %3527 = vmatmul.msk.f32.gmra.mxu0 %vm361_vm0, %v1448_v37  ;;  %3540 = vmatmul.msk.f32.gmra.mxu1 %vm361_vm0, %v1461_v38 }
 0x897   : > { %3553 = vmatmul.msk.f32.gmra.mxu2 %vm361_vm0, %v1474_v35  ;;  %3566 = vmatmul.msk.f32.gmra.mxu3 %vm361_vm0, %v1487_v36  ;;  %v1451_v35 = vld [vmem:[#allocation2 + $0x60] sm:$0xff]  ;;  %v1464_v36 = vld [vmem:[#allocation2 + $0xc8] sm:$0xff] }
 0x89e   : > { %3528 = vmatmul.msk.f32.gmra.mxu0 %vm361_vm0, %v1449_v52  ;;  %3541 = vmatmul.msk.f32.gmra.mxu1 %vm361_vm0, %v1462_v0  ;;  %v1477_v0 = vld [vmem:[#allocation2 + $0x130] sm:$0xff] }
 0x89f   : > { %3567 = vmatmul.msk.f32.gmra.mxu3 %vm361_vm0, %v1488_v20  ;;  %3554 = vmatmul.msk.f32.gmra.mxu2 %vm361_vm0, %v1475_v16 }
 0x8a6   : > { %3529 = vmatmul.msk.f32.gmra.mxu0 %vm361_vm0, %v1450_v18  ;;  %3542 = vmatmul.msk.f32.gmra.mxu1 %vm361_vm0, %v1463_v48 }
 0x8a7   : > { %3568 = vmatmul.msk.f32.gmra.mxu3 %vm361_vm0, %v1489_v22 }
 0x8ae   : > { %3530 = vmatmul.msk.f32.gmra.mxu0 %vm361_vm0, %v1451_v35  ;;  %3543 = vmatmul.msk.f32.gmra.mxu1 %vm361_vm0, %v1464_v36 }
 0x8cb   : > { %v4289_v31 = vpop.f32.mrf.mxu0  ;;  %v4291_v32 = vpop.f32.mrf.mxu1 }
 0x8cc   : > { %v2054_v28 = vsel %vm2038_vm2, %v4291_v32, 0.0  ;;  %v1842_v24 = vsel %vm1826_vm3, %v4291_v32, 0.0  ;;  %v1829_v33 = vsel %vm1826_vm3, %v4289_v31, 0.0  ;;  %v2041_v57 = vsel %vm2038_vm2, %v4289_v31, 0.0 }
 0x8cd   : > { %v2132_v6 = vsel %vm1881_vm4, %v2054_v28, 0.0  ;;  %v1921_v34 = vsel %vm1881_vm4, %v1842_v24, 0.0  ;;  %v1882_v9 = vsel %vm1881_vm4, %v1829_v33, 0.0  ;;  %v2093_v7 = vsel %vm1881_vm4, %v2041_v57, 0.0 }
 0x8ce   : > { %2133 = vadd.xlane.f32.xlu2 %v2132_v6  ;;  %1922 = vadd.xlane.f32.xlu1 %v1921_v34 }
 0x8cf   : > { %1883 = vadd.xlane.f32.xlu0 %v1882_v9  ;;  %v1476_v9 = vld [vmem:[#allocation2 + $0x128] sm:$0xff] }
 0x8d0   : > { %3555 = vmatmul.msk.f32.gmra.mxu2 %vm361_vm0, %v1476_v9 }
 0x8d2   : > { %v4310_v42 = vpop.f32.mrf.mxu2  ;;  %v4312_v43 = vpop.f32.mrf.mxu3 }
 0x8d3   : > { %v1855_v39 = vsel %vm1826_vm3, %v4310_v42, 0.0  ;;  %v1868_v40 = vsel %vm1826_vm3, %v4312_v43, 0.0  ;;  %v4323_v8 = vpop.f32.mrf.mxu1  ;;  %v2067_v30 = vsel %vm2038_vm2, %v4310_v42, 0.0  ;;  %v4336_v1 = vpop.f32.mrf.mxu0 }
 0x8d4   : > { %v1960_v41 = vsel %vm1881_vm4, %v1855_v39, 0.0  ;;  %v1999_v44 = vsel %vm1881_vm4, %v1868_v40, 0.0  ;;  %v1843_v45 = vsel %vm1826_vm3, %v4323_v8, 0.0  ;;  %v2171_v3 = vsel %vm1881_vm4, %v2067_v30, 0.0 }
 0x8d5   : > { %v1924_v47 = vsel %vm1881_vm4, %v1843_v45, 0.0  ;;  %v2042_v53 = vsel %vm2038_vm2, %v4336_v1, 0.0  ;;  %v1830_v54 = vsel %vm1826_vm3, %v4336_v1, 0.0  ;;  %v2055_v62 = vsel %vm2038_vm2, %v4323_v8, 0.0 }
 0x8d6   : > { %1961 = vadd.xlane.f32.xlu2 %v1960_v41  ;;  %2094 = vadd.xlane.f32.xlu1 %v2093_v7  ;;  %v2096_v56 = vsel %vm1881_vm4, %v2042_v53, 0.0  ;;  %v1885_v5 = vsel %vm1881_vm4, %v1830_v54, 0.0  ;;  %v2135_v12 = vsel %vm1881_vm4, %v2055_v62, 0.0 }
 0x8d7   : > { %2000 = vadd.xlane.f32.xlu0 %v1999_v44 }
 0x8d8   : > { %3556 = vmatmul.msk.f32.gmra.mxu2 %vm361_vm0, %v1477_v0 }
 0x8da   : > { %v4333_v46 = vpop.f32.mrf.mxu3  ;;  %v4343_v51 = vpop.f32.mrf.mxu2 }
 0x8db   : > { %v1869_v2 = vsel %vm1826_vm3, %v4333_v46, 0.0  ;;  %v2068_v13 = vsel %vm2038_vm2, %v4343_v51, 0.0  ;;  %v4359_v58 = vpop.f32.mrf.mxu0  ;;  %v4375_v11 = vpop.f32.mrf.mxu1  ;;  %v1856_v23 = vsel %vm1826_vm3, %v4343_v51, 0.0 }
 0x8dc   : > { %v2002_v4 = vsel %vm1881_vm4, %v1869_v2, 0.0  ;;  %v2174_v55 = vsel %vm1881_vm4, %v2068_v13, 0.0  ;;  %v1831_v61 = vsel %vm1826_vm3, %v4359_v58, 0.0  ;;  %v2056_v15 = vsel %vm2038_vm2, %v4375_v11, 0.0  ;;  %v1490_v13 = vld [vmem:[#allocation2 + $0x198] sm:$0xff] }
 0x8dd   : > { %v1888_v10 = vsel %vm1881_vm4, %v1831_v61, 0.0  ;;  %v2138_v25 = vsel %vm1881_vm4, %v2056_v15, 0.0  ;;  %v1963_v29 = vsel %vm1881_vm4, %v1856_v23, 0.0  ;;  %v1844_v28 = vsel %vm1826_vm3, %v4375_v11, 0.0  ;;  %3569 = vmatmul.msk.f32.gmra.mxu3 %vm361_vm0, %v1490_v13 }
 0x8de   : > { %1925 = vadd.xlane.f32.xlu2 %v1924_v47  ;;  %2003 = vadd.xlane.f32.xlu1 %v2002_v4  ;;  %v1927_v34 = vsel %vm1881_vm4, %v1844_v28, 0.0  ;;  %v2043_v7 = vsel %vm2038_vm2, %v4359_v58, 0.0  ;;  %vm2249_vm0 = vcmp.eq.s32.totalorder %v4284_v27, 2 }
 0x8df   : > { %2172 = vadd.xlane.f32.xlu0 %v2171_v3  ;;  %v2099_v41 = vsel %vm1881_vm4, %v2043_v7, 0.0 }
 0x8e2   : > { %v4361_v59 = vpop.f32.mrf.mxu3  ;;  %v4378_v14 = vpop.f32.mrf.mxu2 }
 0x8e3   : > { %v1870_v60 = vsel %vm1826_vm3, %v4361_v59, 0.0  ;;  %v2069_v19 = vsel %vm2038_vm2, %v4378_v14, 0.0  ;;  %v4393_v26 = vpop.f32.mrf.mxu1  ;;  %v1857_v17 = vsel %vm1826_vm3, %v4378_v14, 0.0  ;;  %v4409_v33 = vpop.f32.mrf.mxu0 }
 0x8e4   : > { %v2005_v63 = vsel %vm1881_vm4, %v1870_v60, 0.0  ;;  %v2177_v21 = vsel %vm1881_vm4, %v2069_v19, 0.0  ;;  %v2057_v49 = vsel %vm2038_vm2, %v4393_v26, 0.0  ;;  %v1966_v24 = vsel %vm1881_vm4, %v1857_v17, 0.0 }
 0x8e5   : > { %v2141_v50 = vsel %vm1881_vm4, %v2057_v49, 0.0  ;;  %v1832_v38 = vsel %vm1826_vm3, %v4409_v33, 0.0  ;;  %v1845_v45 = vsel %vm1826_vm3, %v4393_v26, 0.0 }
 0x8e6   : > { %2175 = vadd.xlane.f32.xlu1 %v2174_v55  ;;  %2097 = vadd.xlane.f32.xlu2 %v2096_v56  ;;  %v1891_v39 = vsel %vm1881_vm4, %v1832_v38, 0.0  ;;  %v1930_v2 = vsel %vm1881_vm4, %v1845_v45, 0.0  ;;  %v2044_v55 = vsel %vm2038_vm2, %v4409_v33, 0.0 }
 0x8e7   : > { %1886 = vadd.xlane.f32.xlu0 %v1885_v5  ;;  %v2102_v20 = vsel %vm1881_vm4, %v2044_v55, 0.0 }
 0x8ea   : > { %v4411_v6 = vpop.f32.mrf.mxu2  ;;  %v4429_v44 = vpop.f32.mrf.mxu3 }
 0x8eb   : > { %v1858_v37 = vsel %vm1826_vm3, %v4411_v6, 0.0  ;;  %v4426_v40 = vpop.f32.mrf.mxu0  ;;  %v1871_v47 = vsel %vm1826_vm3, %v4429_v44, 0.0  ;;  %v4445_v52 = vpop.f32.mrf.mxu1  ;;  %v2070_v54 = vsel %vm2038_vm2, %v4411_v6, 0.0 }
 0x8ec   : > { %v1969_v57 = vsel %vm1881_vm4, %v1858_v37, 0.0  ;;  %v1833_v30 = vsel %vm1826_vm3, %v4426_v40, 0.0  ;;  %v2008_v4 = vsel %vm1881_vm4, %v1871_v47, 0.0  ;;  %v1846_v53 = vsel %vm1826_vm3, %v4445_v52, 0.0 }
 0x8ed   : > { %v1894_v3 = vsel %vm1881_vm4, %v1833_v30, 0.0  ;;  %v1933_v56 = vsel %vm1881_vm4, %v1846_v53, 0.0  ;;  %v2180_v5 = vsel %vm1881_vm4, %v2070_v54, 0.0  ;;  %v2045_v62 = vsel %vm2038_vm2, %v4426_v40, 0.0 }
 0x8ee   : > { %2006 = vadd.xlane.f32.xlu2 %v2005_v63  ;;  %1889 = vadd.xlane.f32.xlu1 %v1888_v10  ;;  %v2058_v63 = vsel %vm2038_vm2, %v4445_v52, 0.0 }
 0x8ef   : > { %2136 = vadd.xlane.f32.xlu0 %v2135_v12  ;;  %v2105_v12 = vsel %vm1881_vm4, %v2045_v62, 0.0  ;;  %v2144_v16 = vsel %vm1881_vm4, %v2058_v63, 0.0 }
 0x8f2   : > { %v4461_v60 = vpop.f32.mrf.mxu3  ;;  %v4477_v19 = vpop.f32.mrf.mxu2 }
 0x8f3   : > { %v1872_v61 = vsel %vm1826_vm3, %v4461_v60, 0.0  ;;  %v4475_v18 = vpop.f32.mrf.mxu0  ;;  %v2071_v15 = vsel %vm2038_vm2, %v4477_v19, 0.0  ;;  %v1859_v23 = vsel %vm1826_vm3, %v4477_v19, 0.0  ;;  %v4491_v48 = vpop.f32.mrf.mxu1 }
 0x8f4   : > { %v2011_v10 = vsel %vm1881_vm4, %v1872_v61, 0.0  ;;  %v1972_v22 = vsel %vm1881_vm4, %v1859_v23, 0.0  ;;  %v2059_v17 = vsel %vm2038_vm2, %v4491_v48, 0.0  ;;  %v1847_v28 = vsel %vm1826_vm3, %v4491_v48, 0.0 }
 0x8f5   : > { %v1936_v9 = vsel %vm1881_vm4, %v1847_v28, 0.0  ;;  %v2046_v7 = vsel %vm2038_vm2, %v4475_v18, 0.0 }
 0x8f6   : > { %2178 = vadd.xlane.f32.xlu2 %v2177_v21  ;;  %2139 = vadd.xlane.f32.xlu1 %v2138_v25  ;;  %v1834_v21 = vsel %vm1826_vm3, %v4475_v18, 0.0  ;;  %v2183_v25 = vsel %vm1881_vm4, %v2071_v15, 0.0  ;;  %v2108_v35 = vsel %vm1881_vm4, %v2046_v7, 0.0 }
 0x8f7   : > { %1964 = vadd.xlane.f32.xlu0 %v1963_v29  ;;  %v1897_v29 = vsel %vm1881_vm4, %v1834_v21, 0.0 }
 0x8fa   : > { %v4493_v49 = vpop.f32.mrf.mxu3  ;;  %v4507_v37 = vpop.f32.mrf.mxu2 }
 0x8fb   : > { %v1860_v38 = vsel %vm1826_vm3, %v4507_v37, 0.0  ;;  %v4521_v36 = vpop.f32.mrf.mxu1  ;;  %v4523_v45 = vpop.f32.mrf.mxu0 }
 0x8fc   : > { %v1848_v30 = vsel %vm1826_vm3, %v4521_v36, 0.0  ;;  %v2060_v47 = vsel %vm2038_vm2, %v4521_v36, 0.0  ;;  %v2047_v55 = vsel %vm2038_vm2, %v4523_v45, 0.0 }
 0x8fd   : > { %v2111_v63 = vsel %vm1881_vm4, %v2047_v55, 0.0 }
 0x8fe   : > { %2142 = vadd.xlane.f32.xlu2 %v2141_v50  ;;  %1967 = vadd.xlane.f32.xlu1 %v1966_v24  ;;  %v1873_v50 = vsel %vm1826_vm3, %v4493_v49, 0.0  ;;  %v2147_v24 = vsel %vm1881_vm4, %v2059_v17, 0.0 }
 0x8ff   : > { %1928 = vadd.xlane.f32.xlu0 %v1927_v34  ;;  %v2014_v34 = vsel %vm1881_vm4, %v1873_v50, 0.0 }
 0x902   : > { %v4537_v13 = vpop.f32.mrf.mxu2  ;;  %v4539_v53 = vpop.f32.mrf.mxu3 }
 0x903   : > { %v1861_v54 = vsel %vm1826_vm3, %v4537_v13, 0.0 }
 0x904   : > { %v1978_v62 = vsel %vm1881_vm4, %v1861_v54, 0.0 }
 0x906   : > { %1970 = vadd.xlane.f32.xlu2 %v1969_v57  ;;  %1892 = vadd.xlane.f32.xlu1 %v1891_v39  ;;  %v2072_v57 = vsel %vm2038_vm2, %v4507_v37, 0.0  ;;  %v1975_v39 = vsel %vm1881_vm4, %v1860_v38, 0.0 }
 0x907   : > { %2100 = vadd.xlane.f32.xlu0 %v2099_v41  ;;  %v2186_v41 = vsel %vm1881_vm4, %v2072_v57, 0.0 }
 0x90e   : > { %1931 = vadd.xlane.f32.xlu1 %v1930_v2  ;;  %1895 = vadd.xlane.f32.xlu2 %v1894_v3  ;;  %v1835_v2 = vsel %vm1826_vm3, %v4523_v45, 0.0  ;;  %v1939_v3 = vsel %vm1881_vm4, %v1848_v30, 0.0 }
 0x90f   : > { %2009 = vadd.xlane.f32.xlu0 %v2008_v4  ;;  %v2150_v4 = vsel %vm1881_vm4, %v2060_v47, 0.0  ;;  %v1900_v0 = vsel %vm1881_vm4, %v1835_v2, 0.0  ;;  %v4603_v2 = vpop.f32.mrf.mxu2 }
 0x910   : > { %v1862_v55 = vsel %vm1826_vm3, %v4603_v2, 0.0 }
 0x916   : > { %2103 = vadd.xlane.f32.xlu1 %v2102_v20  ;;  %1934 = vadd.xlane.f32.xlu2 %v1933_v56  ;;  %v1874_v20 = vsel %vm1826_vm3, %v4539_v53, 0.0 }
 0x917   : > { %2181 = vadd.xlane.f32.xlu0 %v2180_v5 }
 0x91e   : > { %2012 = vadd.xlane.f32.xlu1 %v2011_v10  ;;  %2106 = vadd.xlane.f32.xlu2 %v2105_v12  ;;  %v2017_v10 = vsel %vm1881_vm4, %v1874_v20, 0.0  ;;  %v4559_v12 = vpop.f32.mrf.mxu0 }
 0x91f   : > { %2145 = vadd.xlane.f32.xlu0 %v2144_v16  ;;  %v4561_v16 = vpop.f32.mrf.mxu1  ;;  %v1836_v21 = vsel %vm1826_vm3, %v4559_v12, 0.0 }
 0x920   : > { %v1849_v15 = vsel %vm1826_vm3, %v4561_v16, 0.0  ;;  %v1903_v50 = vsel %vm1881_vm4, %v1836_v21, 0.0  ;;  %v2061_v57 = vsel %vm2038_vm2, %v4561_v16, 0.0 }
 0x921   : > { %v1942_v17 = vsel %vm1881_vm4, %v1849_v15, 0.0 }
 0x926   : > { %2184 = vadd.xlane.f32.xlu1 %v2183_v25  ;;  %1898 = vadd.xlane.f32.xlu2 %v1897_v29  ;;  %v2073_v29 = vsel %vm2038_vm2, %v4537_v13, 0.0  ;;  %v4601_v47 = vpop.f32.mrf.mxu0 }
 0x927   : > { %1973 = vadd.xlane.f32.xlu0 %v1972_v22  ;;  %v2189_v28 = vsel %vm1881_vm4, %v2073_v29, 0.0  ;;  %v4623_v15 = vpop.f32.mrf.mxu1 }
 0x928   : > { %v2062_v29 = vsel %vm2038_vm2, %v4623_v15, 0.0 }
 0x92e   : > { %2148 = vadd.xlane.f32.xlu1 %v2147_v24  ;;  %2015 = vadd.xlane.f32.xlu2 %v2014_v34  ;;  %v4581_v24 = vpop.f32.mrf.mxu3 }
 0x92f   : > { %1937 = vadd.xlane.f32.xlu0 %v1936_v9  ;;  %v1875_v34 = vsel %vm1826_vm3, %v4581_v24, 0.0 }
 0x936   : > { %1976 = vadd.xlane.f32.xlu1 %v1975_v39  ;;  %2187 = vadd.xlane.f32.xlu2 %v2186_v41  ;;  %v2048_v39 = vsel %vm2038_vm2, %v4559_v12, 0.0  ;;  %v2020_v41 = vsel %vm1881_vm4, %v1875_v34, 0.0  ;;  %v4625_v21 = vpop.f32.mrf.mxu3  ;;  %v1850_v34 = vsel %vm1826_vm3, %v4623_v15, 0.0 }
 0x937   : > { %2109 = vadd.xlane.f32.xlu0 %v2108_v35  ;;  %v2153_v35 = vsel %vm1881_vm4, %v2061_v57, 0.0  ;;  %v2114_v30 = vsel %vm1881_vm4, %v2048_v39, 0.0  ;;  %v2156_v39 = vsel %vm1881_vm4, %v2062_v29, 0.0 }
 0x93e   : > { %1940 = vadd.xlane.f32.xlu1 %v1939_v3  ;;  %2151 = vadd.xlane.f32.xlu2 %v2150_v4  ;;  %v2074_v3 = vsel %vm2038_vm2, %v4603_v2, 0.0  ;;  %v1837_v4 = vsel %vm1826_vm3, %v4601_v47, 0.0 }
 0x93f   : > { %1901 = vadd.xlane.f32.xlu0 %v1900_v0 }
 0x941   : > { %v4547_v56 = vpop.xlane.xlu2 %2133  ;;  %v4549_v5 = vpop.xlane.xlu1 %1922 }
 0x942   : > { %5742 = vst [vmem:[#allocation7_spill] sm:$0xff] %v4549_v5  ;;  %v4554_v61 = vpop.xlane.xlu0 %1883 }
 0x943   : > { %5743 = vst [vmem:[#allocation8_spill] sm:$0xff] %v4554_v61 }
 0x946   : > { %1979 = vadd.xlane.f32.xlu2 %v1978_v62  ;;  %2112 = vadd.xlane.f32.xlu1 %v2111_v63  ;;  %v2192_v62 = vsel %vm1881_vm4, %v2074_v3, 0.0  ;;  %v1906_v63 = vsel %vm1881_vm4, %v1837_v4, 0.0 }
 0x947   : > { %2018 = vadd.xlane.f32.xlu0 %v2017_v10  ;;  %v1981_v10 = vsel %vm1881_vm4, %v1862_v55, 0.0 }
 0x949   : > { %v4569_v23 = vpop.xlane.xlu2 %1961  ;;  %v4571_v25 = vpop.xlane.xlu1 %2094 }
 0x94a   : > { %5744 = vst [vmem:[#allocation9_spill] sm:$0xff] %v4569_v23  ;;  %v4576_v22 = vpop.xlane.xlu0 %2000 }
 0x94b   : > { %5745 = vst [vmem:[#allocation10_spill] sm:$0xff] %v4571_v25 }
 0x94c   : > { %5746 = vst [vmem:[#allocation11_spill] sm:$0xff] %v4576_v22 }
 0x94e   : > { %1943 = vadd.xlane.f32.xlu2 %v1942_v17  ;;  %1904 = vadd.xlane.f32.xlu1 %v1903_v50  ;;  %v1876_v17 = vsel %vm1826_vm3, %v4625_v21, 0.0 }
 0x94f   : > { %2190 = vadd.xlane.f32.xlu0 %v2189_v28 }
 0x951   : > { %v4586_v9 = vpop.xlane.xlu2 %1925  ;;  %v4588_v38 = vpop.xlane.xlu1 %2003 }
 0x952   : > { %5747 = vst [vmem:[#allocation12_spill] sm:$0xff] %v4586_v9  ;;  %v4593_v7 = vpop.xlane.xlu0 %2172 }
 0x953   : > { %5748 = vst [vmem:[#allocation13_spill] sm:$0xff] %v4588_v38 }
 0x954   : > { %5749 = vst [vmem:[#allocation14_spill] sm:$0xff] %v4593_v7 }
 0x956   : > { %2115 = vadd.xlane.f32.xlu2 %v2114_v30  ;;  %2021 = vadd.xlane.f32.xlu1 %v2020_v41  ;;  %v2023_v41 = vsel %vm1881_vm4, %v1876_v17, 0.0  ;;  %v4645_v30 = vpop.f32.mrf.mxu2 }
 0x957   : > { %2154 = vadd.xlane.f32.xlu0 %v2153_v35  ;;  %v1945_v35 = vsel %vm1881_vm4, %v1850_v34, 0.0  ;;  %v1863_v3 = vsel %vm1826_vm3, %v4645_v30, 0.0  ;;  %v2075_v4 = vsel %vm2038_vm2, %v4645_v30, 0.0 }
 0x958   : > { %v1984_v29 = vsel %vm1881_vm4, %v1863_v3, 0.0  ;;  %v2195_v17 = vsel %vm1881_vm4, %v2075_v4, 0.0 }
 0x959   : > { %v4611_v0 = vpop.xlane.xlu1 %2175  ;;  %v4613_v54 = vpop.xlane.xlu2 %2097 }
 0x95a   : > { %5750 = vst [vmem:[#allocation15_spill] sm:$0xff] %v4611_v0  ;;  %v4618_v20 = vpop.xlane.xlu0 %1886 }
 0x95b   : > { %5751 = vst [vmem:[#allocation16_spill] sm:$0xff] %v4613_v54 }
 0x95c   : > { %5752 = vst [vmem:[#allocation17_spill] sm:$0xff] %v4618_v20 }
 0x95e   : > { %2193 = vadd.xlane.f32.xlu1 %v2192_v62  ;;  %1907 = vadd.xlane.f32.xlu2 %v1906_v63  ;;  %v2049_v63 = vsel %vm2038_vm2, %v4601_v47, 0.0  ;;  %v4687_v38 = vpop.f32.mrf.mxu2 }
 0x95f   : > { %1982 = vadd.xlane.f32.xlu0 %v1981_v10  ;;  %v2117_v34 = vsel %vm1881_vm4, %v2049_v63, 0.0  ;;  %v1864_v23 = vsel %vm1826_vm3, %v4687_v38, 0.0 }
 0x961   : > { %v4633_v50 = vpop.xlane.xlu2 %2006  ;;  %v4635_v28 = vpop.xlane.xlu1 %1889 }
 0x962   : > { %5753 = vst [vmem:[#allocation18_spill] sm:$0xff] %v4633_v50  ;;  %v4640_v57 = vpop.xlane.xlu0 %2136 }
 0x963   : > { %5754 = vst [vmem:[#allocation19_spill] sm:$0xff] %v4635_v28 }
 0x964   : > { %5755 = vst [vmem:[#allocation20_spill] sm:$0xff] %v4640_v57 }
 0x966   : > { %2157 = vadd.xlane.f32.xlu1 %v2156_v39  ;;  %2024 = vadd.xlane.f32.xlu2 %v2023_v41  ;;  %v4665_v39 = vpop.f32.mrf.mxu1  ;;  %v4667_v41 = vpop.f32.mrf.mxu0 }
 0x967   : > { %1946 = vadd.xlane.f32.xlu0 %v1945_v35  ;;  %v1851_v35 = vsel %vm1826_vm3, %v4665_v39, 0.0  ;;  %v2063_v50 = vsel %vm2038_vm2, %v4665_v39, 0.0  ;;  %v1838_v63 = vsel %vm1826_vm3, %v4667_v41, 0.0  ;;  %v2050_v7 = vsel %vm2038_vm2, %v4667_v41, 0.0  ;;  %v4753_v5 = vpop.f32.mrf.mxu2 }
 0x968   : > { %v1909_v22 = vsel %vm1881_vm4, %v1838_v63, 0.0 }
 0x969   : > { %v4653_v55 = vpop.xlane.xlu2 %2178  ;;  %v4655_v62 = vpop.xlane.xlu1 %2139 }
 0x96a   : > { %5756 = vst [vmem:[#allocation21_spill] sm:$0xff] %v4653_v55  ;;  %v4660_v10 = vpop.xlane.xlu0 %1964 }
 0x96b   : > { %5757 = vst [vmem:[#allocation22_spill] sm:$0xff] %v4655_v62 }
 0x96c   : > { %5758 = vst [vmem:[#allocation23_spill] sm:$0xff] %v4660_v10  ;;  %v4689_v10 = vpop.f32.mrf.mxu3 }
 0x96d   : > { %v1877_v63 = vsel %vm1826_vm3, %v4689_v10, 0.0 }
 0x96e   : > { %1985 = vadd.xlane.f32.xlu1 %v1984_v29  ;;  %2196 = vadd.xlane.f32.xlu2 %v2195_v17  ;;  %v1948_v17 = vsel %vm1881_vm4, %v1851_v35, 0.0  ;;  %v2026_v0 = vsel %vm1881_vm4, %v1877_v63, 0.0  ;;  %v4711_v55 = vpop.f32.mrf.mxu1  ;;  %v2076_v63 = vsel %vm2038_vm2, %v4687_v38, 0.0 }
 0x96f   : > { %2118 = vadd.xlane.f32.xlu0 %v2117_v34  ;;  %v2159_v34 = vsel %vm1881_vm4, %v2063_v50, 0.0  ;;  %v4795_v28 = vpop.f32.mrf.mxu2 }
 0x970   : > { %5777 = vst [vmem:[#allocation42_spill] sm:$0xff] %v4795_v28 }
 0x971   : > { %v4675_v3 = vpop.xlane.xlu2 %2142  ;;  %v4677_v4 = vpop.xlane.xlu1 %1967 }
 0x972   : > { %5759 = vst [vmem:[#allocation24_spill] sm:$0xff] %v4675_v3  ;;  %v4682_v29 = vpop.xlane.xlu0 %1928 }
 0x973   : > { %5760 = vst [vmem:[#allocation25_spill] sm:$0xff] %v4677_v4  ;;  %v4709_v4 = vpop.f32.mrf.mxu0 }
 0x974   : > { %5761 = vst [vmem:[#allocation26_spill] sm:$0xff] %v4682_v29  ;;  %v1839_v29 = vsel %vm1826_vm3, %v4709_v4, 0.0  ;;  %v4731_v57 = vpop.f32.mrf.mxu3 }
 0x975   : > { %v1878_v62 = vsel %vm1826_vm3, %v4731_v57, 0.0 }
 0x976   : > { %1949 = vadd.xlane.f32.xlu1 %v1948_v17  ;;  %2160 = vadd.xlane.f32.xlu2 %v2159_v34  ;;  %v2120_v34 = vsel %vm1881_vm4, %v2050_v7, 0.0 }
 0x977   : > { %1910 = vadd.xlane.f32.xlu0 %v1909_v22  ;;  %v1987_v22 = vsel %vm1881_vm4, %v1864_v23, 0.0 }
 0x979   : > { %v4697_v35 = vpop.xlane.xlu2 %1970  ;;  %v4699_v50 = vpop.xlane.xlu1 %1892 }
 0x97a   : > { %5762 = vst [vmem:[#allocation27_spill] sm:$0xff] %v4697_v35  ;;  %v4704_v17 = vpop.xlane.xlu0 %2100  ;;  %v1852_v35 = vsel %vm1826_vm3, %v4711_v55, 0.0 }
 0x97b   : > { %5763 = vst [vmem:[#allocation28_spill] sm:$0xff] %v4699_v50  ;;  %v4773_v50 = vpop.f32.mrf.mxu1 }
 0x97c   : > { %5764 = vst [vmem:[#allocation29_spill] sm:$0xff] %v4704_v17  ;;  %v4775_v20 = vpop.f32.mrf.mxu3 }
 0x97e   : > { %1988 = vadd.xlane.f32.xlu2 %v1987_v22  ;;  %2121 = vadd.xlane.f32.xlu1 %v2120_v34  ;;  %v1912_v22 = vsel %vm1881_vm4, %v1839_v29, 0.0  ;;  %v2198_v34 = vsel %vm1881_vm4, %v2076_v63, 0.0  ;;  %v2051_v63 = vsel %vm2038_vm2, %v4709_v4, 0.0 }
 0x97f   : > { %2027 = vadd.xlane.f32.xlu0 %v2026_v0  ;;  %v1951_v0 = vsel %vm1881_vm4, %v1852_v35, 0.0  ;;  %v2064_v35 = vsel %vm2038_vm2, %v4711_v55, 0.0 }
 0x981   : > { %v4719_v23 = vpop.xlane.xlu1 %1931  ;;  %v4721_v7 = vpop.xlane.xlu2 %1895 }
 0x982   : > { %5765 = vst [vmem:[#allocation30_spill] sm:$0xff] %v4719_v23  ;;  %v4726_v9 = vpop.xlane.xlu0 %2009 }
 0x983   : > { %5766 = vst [vmem:[#allocation31_spill] sm:$0xff] %v4721_v7  ;;  %v4815_v61 = vpop.f32.mrf.mxu1 }
 0x984   : > { %5767 = vst [vmem:[#allocation32_spill] sm:$0xff] %v4726_v9  ;;  %v4751_v9 = vpop.f32.mrf.mxu0  ;;  %v4839_v25 = vpop.f32.mrf.mxu3 }
 0x986   : > { %1952 = vadd.xlane.f32.xlu2 %v1951_v0  ;;  %1913 = vadd.xlane.f32.xlu1 %v1912_v22  ;;  %v2029_v0 = vsel %vm1881_vm4, %v1878_v62, 0.0  ;;  %v2162_v22 = vsel %vm1881_vm4, %v2064_v35, 0.0 }
 0x987   : > { %2199 = vadd.xlane.f32.xlu0 %v2198_v34  ;;  %v2123_v34 = vsel %vm1881_vm4, %v2051_v63, 0.0  ;;  %v1865_v63 = vsel %vm1826_vm3, %v4753_v5, 0.0 }
 0x989   : > { %v4736_v23 = vpop.xlane.xlu1 %2103  ;;  %v4738_v3 = vpop.xlane.xlu2 %1934 }
 0x98a   : > { %5768 = vst [vmem:[#allocation33_spill] sm:$0xff] %v4736_v23  ;;  %v4743_v29 = vpop.xlane.xlu0 %2181  ;;  %v4837_v23 = vpop.f32.mrf.mxu2 }
 0x98b   : > { %5769 = vst [vmem:[#allocation34_spill] sm:$0xff] %v4738_v3  ;;  %v1840_v3 = vsel %vm1826_vm3, %v4751_v9, 0.0 }
 0x98c   : > { %5770 = vst [vmem:[#allocation35_spill] sm:$0xff] %v4743_v29  ;;  %v2077_v29 = vsel %vm2038_vm2, %v4753_v5, 0.0  ;;  %v4817_v17 = vpop.f32.mrf.mxu0 }
 0x98e   : > { %2124 = vadd.xlane.f32.xlu2 %v2123_v34  ;;  %2030 = vadd.xlane.f32.xlu1 %v2029_v0  ;;  %v2201_v0 = vsel %vm1881_vm4, %v2077_v29, 0.0  ;;  %v1990_v34 = vsel %vm1881_vm4, %v1865_v63, 0.0  ;;  %v1853_v63 = vsel %vm1826_vm3, %v4773_v50, 0.0 }
 0x98f   : > { %2163 = vadd.xlane.f32.xlu0 %v2162_v22  ;;  %v1915_v22 = vsel %vm1881_vm4, %v1840_v3, 0.0 }
 0x991   : > { %v4761_v62 = vpop.xlane.xlu1 %2012  ;;  %v4763_v35 = vpop.xlane.xlu2 %2106 }
 0x992   : > { %5771 = vst [vmem:[#allocation36_spill] sm:$0xff] %v4761_v62  ;;  %v4768_v7 = vpop.xlane.xlu0 %2145  ;;  %v2065_v62 = vsel %vm2038_vm2, %v4773_v50, 0.0 }
 0x993   : > { %5772 = vst [vmem:[#allocation37_spill] sm:$0xff] %v4763_v35 }
 0x994   : > { %5773 = vst [vmem:[#allocation38_spill] sm:$0xff] %v4768_v7  ;;  %v1879_v7 = vsel %vm1826_vm3, %v4775_v20, 0.0 }
 0x996   : > { %2202 = vadd.xlane.f32.xlu1 %v2201_v0  ;;  %1916 = vadd.xlane.f32.xlu2 %v1915_v22  ;;  %v2165_v0 = vsel %vm1881_vm4, %v2065_v62, 0.0  ;;  %v2032_v22 = vsel %vm1881_vm4, %v1879_v7, 0.0  ;;  %v2052_v7 = vsel %vm2038_vm2, %v4751_v9, 0.0 }
 0x997   : > { %1991 = vadd.xlane.f32.xlu0 %v1990_v34  ;;  %v1954_v34 = vsel %vm1881_vm4, %v1853_v63, 0.0 }
 0x999   : > { %v4783_v29 = vpop.xlane.xlu1 %2184  ;;  %v4785_v3 = vpop.xlane.xlu2 %1898 }
 0x99a   : > { %5774 = vst [vmem:[#allocation39_spill] sm:$0xff] %v4783_v29  ;;  %v4790_v35 = vpop.xlane.xlu0 %1973  ;;  %v1866_v29 = vsel %vm1826_vm3, %v4795_v28, 0.0 }
 0x99b   : > { %5775 = vst [vmem:[#allocation40_spill] sm:$0xff] %v4785_v3  ;;  %v2078_v3 = vsel %vm2038_vm2, %v4795_v28, 0.0 }
 0x99c   : > { %5776 = vst [vmem:[#allocation41_spill] sm:$0xff] %v4790_v35 }
 0x99e   : > { %2166 = vadd.xlane.f32.xlu1 %v2165_v0  ;;  %2033 = vadd.xlane.f32.xlu2 %v2032_v22  ;;  %v1993_v0 = vsel %vm1881_vm4, %v1866_v29, 0.0  ;;  %v2204_v22 = vsel %vm1881_vm4, %v2078_v3, 0.0 }
 0x99f   : > { %1955 = vadd.xlane.f32.xlu0 %v1954_v34  ;;  %v2126_v34 = vsel %vm1881_vm4, %v2052_v7, 0.0  ;;  %v1841_v7 = vsel %vm1826_vm3, %v4817_v17, 0.0 }
 0x9a1   : > { %v4803_v35 = vpop.xlane.xlu1 %2148  ;;  %v4805_v62 = vpop.xlane.xlu2 %2015 }
 0x9a2   : > { %5778 = vst [vmem:[#allocation43_spill] sm:$0xff] %v4803_v35  ;;  %v4810_v63 = vpop.xlane.xlu0 %1937  ;;  %v1918_v35 = vsel %vm1881_vm4, %v1841_v7, 0.0  ;;  %v1880_v7 = vsel %vm1826_vm3, %v4839_v25, 0.0 }
 0x9a3   : > { %5779 = vst [vmem:[#allocation44_spill] sm:$0xff] %v4805_v62  ;;  %v1854_v62 = vsel %vm1826_vm3, %v4815_v61, 0.0 }
 0x9a4   : > { %5780 = vst [vmem:[#allocation45_spill] sm:$0xff] %v4810_v63  ;;  %v2066_v63 = vsel %vm2038_vm2, %v4815_v61, 0.0 }
 0x9a6   : > { %1994 = vadd.xlane.f32.xlu1 %v1993_v0  ;;  %2205 = vadd.xlane.f32.xlu2 %v2204_v22  ;;  %v1957_v22 = vsel %vm1881_vm4, %v1854_v62, 0.0 }
 0x9a7   : > { %2127 = vadd.xlane.f32.xlu0 %v2126_v34  ;;  %v2168_v34 = vsel %vm1881_vm4, %v2066_v63, 0.0 }
 0x9a9   : > { %v4825_v29 = vpop.xlane.xlu1 %1976  ;;  %v4827_v3 = vpop.xlane.xlu2 %2187 }
 0x9aa   : > { %5781 = vst [vmem:[#allocation46_spill] sm:$0xff] %v4825_v29  ;;  %v4832_v0 = vpop.xlane.xlu0 %2109  ;;  %v1867_v29 = vsel %vm1826_vm3, %v4837_v23, 0.0 }
 0x9ab   : > { %5782 = vst [vmem:[#allocation47_spill] sm:$0xff] %v4827_v3  ;;  %v2053_v3 = vsel %vm2038_vm2, %v4817_v17, 0.0 }
 0x9ac   : > { %5783 = vst [vmem:[#allocation48_spill] sm:$0xff] %v4832_v0  ;;  %v2035_v0 = vsel %vm1881_vm4, %v1880_v7, 0.0 }
 0x9ae   : > { %1958 = vadd.xlane.f32.xlu1 %v1957_v22  ;;  %2169 = vadd.xlane.f32.xlu2 %v2168_v34  ;;  %v2129_v34 = vsel %vm1881_vm4, %v2053_v3, 0.0  ;;  %v2080_v3 = vsel %vm2038_vm2, %v4312_v43, 0.0 }
 0x9af   : > { %1919 = vadd.xlane.f32.xlu0 %v1918_v35  ;;  %v1996_v35 = vsel %vm1881_vm4, %v1867_v29, 0.0  ;;  %v2081_v29 = vsel %vm2038_vm2, %v4333_v46, 0.0 }
 0x9b0   : > { %v2213_v7 = vsel %vm1881_vm4, %v2081_v29, 0.0  ;;  %v2082_v29 = vsel %vm2038_vm2, %v4361_v59, 0.0 }
 0x9b1   : > { %v4847_v62 = vpop.xlane.xlu1 %1940  ;;  %v4849_v63 = vpop.xlane.xlu2 %2151 }
 0x9b2   : > { %5784 = vst [vmem:[#allocation49_spill] sm:$0xff] %v4847_v62  ;;  %v4854_v22 = vpop.xlane.xlu0 %1901 }
 0x9b3   : > { %5785 = vst [vmem:[#allocation50_spill] sm:$0xff] %v4849_v63  ;;  %v2079_v63 = vsel %vm2038_vm2, %v4837_v23, 0.0 }
 0x9b4   : > { %5786 = vst [vmem:[#allocation51_spill] sm:$0xff] %v4854_v22  ;;  %v2084_v22 = vsel %vm2038_vm2, %v4461_v60, 0.0 }
 0x9b6   : > { %1997 = vadd.xlane.f32.xlu2 %v1996_v35  ;;  %2130 = vadd.xlane.f32.xlu1 %v2129_v34  ;;  %v2210_v35 = vsel %vm1881_vm4, %v2080_v3, 0.0  ;;  %v2222_v3 = vsel %vm1881_vm4, %v2084_v22, 0.0  ;;  %v2086_v22 = vsel %vm2038_vm2, %v4539_v53, 0.0 }
 0x9b7   : > { %2036 = vadd.xlane.f32.xlu0 %v2035_v0  ;;  %v2207_v0 = vsel %vm1881_vm4, %v2079_v63, 0.0  ;;  %v2083_v63 = vsel %vm2038_vm2, %v4429_v44, 0.0 }
 0x9b9   : > { %v4859_v54 = vpop.xlane.xlu2 %1979  ;;  %v4861_v62 = vpop.xlane.xlu1 %2112 }
 0x9ba   : > { %5787 = vst [vmem:[#allocation52_spill] sm:$0xff] %v4859_v54  ;;  %v4866_v28 = vpop.xlane.xlu0 %2018 }
 0x9bb   : > { %5788 = vst [vmem:[#allocation53_spill] sm:$0xff] %v4861_v62  ;;  %v2087_v62 = vsel %vm2038_vm2, %v4581_v24, 0.0 }
 0x9bc   : > { %5789 = vst [vmem:[#allocation54_spill] sm:$0xff] %v4866_v28 }
 0x9be   : > { %2214 = vadd.xlane.f32.xlu2 %v2213_v7  ;;  %2211 = vadd.xlane.f32.xlu1 %v2210_v35  ;;  %v2216_v7 = vsel %vm1881_vm4, %v2082_v29, 0.0  ;;  %v2231_v29 = vsel %vm1881_vm4, %v2087_v62, 0.0  ;;  %v2089_v62 = vsel %vm2038_vm2, %v4689_v10, 0.0 }
 0x9bf   : > { %2208 = vadd.xlane.f32.xlu0 %v2207_v0  ;;  %v2219_v0 = vsel %vm1881_vm4, %v2083_v63, 0.0  ;;  %v2085_v63 = vsel %vm2038_vm2, %v4493_v49, 0.0 }
 0x9c1   : > { %v4877_v34 = vpop.xlane.xlu2 %1943  ;;  %v4879_v28 = vpop.xlane.xlu1 %1904 }
 0x9c2   : > { %5790 = vst [vmem:[#allocation55_spill] sm:$0xff] %v4877_v34  ;;  %v4881_v54 = vpop.xlane.xlu0 %2190 }
 0x9c3   : > { %5791 = vst [vmem:[#allocation56_spill] sm:$0xff] %v4879_v28  ;;  %v2090_v28 = vsel %vm2038_vm2, %v4731_v57, 0.0 }
 0x9c4   : > { %5792 = vst [vmem:[#allocation57_spill] sm:$0xff] %v4881_v54 }
 0x9c6   : > { %2223 = vadd.xlane.f32.xlu2 %v2222_v3  ;;  %2220 = vadd.xlane.f32.xlu1 %v2219_v0  ;;  %v2228_v3 = vsel %vm1881_vm4, %v2086_v22, 0.0  ;;  %v2225_v0 = vsel %vm1881_vm4, %v2085_v63, 0.0  ;;  %v2088_v22 = vsel %vm2038_vm2, %v4625_v21, 0.0  ;;  %v2240_v63 = vsel %vm1881_vm4, %v2090_v28, 0.0 }
 0x9c7   : > { %2217 = vadd.xlane.f32.xlu0 %v2216_v7  ;;  %v2092_v28 = vsel %vm2038_vm2, %v4839_v25, 0.0 }
 0x9c9   : > { %v4895_v35 = vpop.xlane.xlu2 %2115  ;;  %v4897_v54 = vpop.xlane.xlu1 %2021 }
 0x9ca   : > { %5793 = vst [vmem:[#allocation58_spill] sm:$0xff] %v4897_v54  ;;  %v4899_v34 = vpop.xlane.xlu0 %2154 }
 0x9cb   : > { %5794 = vst [vmem:[#allocation59_spill] sm:$0xff] %v4899_v34 }
 0x9ce   : > { %2232 = vadd.xlane.f32.xlu2 %v2231_v29  ;;  %2229 = vadd.xlane.f32.xlu1 %v2228_v3  ;;  %v2237_v29 = vsel %vm1881_vm4, %v2089_v62, 0.0  ;;  %v2234_v3 = vsel %vm1881_vm4, %v2088_v22, 0.0  ;;  %v2091_v62 = vsel %vm2038_vm2, %v4775_v20, 0.0  ;;  %vm3332_vm2 = vcmask 12288  }
 0x9cf   : > { %2226 = vadd.xlane.f32.xlu0 %v2225_v0 }
 0x9d1   : > { %v4913_v7 = vpop.xlane.xlu1 %2193  ;;  %v4915_v54 = vpop.xlane.xlu2 %1907 }
 0x9d2   : > { %5795 = vst [vmem:[#allocation60_spill] sm:$0xff] %v4913_v7  ;;  %v4917_v34 = vpop.xlane.xlu0 %1982 }
 0x9d3   : > { %5796 = vst [vmem:[#allocation61_spill] sm:$0xff] %v4915_v54  ;;  %v2252_v54 = vsel %vm2249_vm0, %v4289_v31, 0.0 }
 0x9d4   : > { %5797 = vst [vmem:[#allocation62_spill] sm:$0xff] %v4917_v34  ;;  %v2304_v22 = vsel %vm1881_vm4, %v2252_v54, 0.0  ;;  %v2254_v54 = vsel %vm2249_vm0, %v4359_v58, 0.0  ;;  %v2258_v58 = vsel %vm2249_vm0, %v4523_v45, 0.0 }
 0x9d6   : > { %2241 = vadd.xlane.f32.xlu2 %v2240_v63  ;;  %2238 = vadd.xlane.f32.xlu1 %v2237_v29  ;;  %v2246_v63 = vsel %vm1881_vm4, %v2092_v28, 0.0  ;;  %v2243_v29 = vsel %vm1881_vm4, %v2091_v62, 0.0  ;;  %v2253_v28 = vsel %vm2249_vm0, %v4336_v1, 0.0  ;;  %v2257_v1 = vsel %vm2249_vm0, %v4475_v18, 0.0 }
 0x9d7   : > { %2235 = vadd.xlane.f32.xlu0 %v2234_v3  ;;  %v2261_v18 = vsel %vm2249_vm0, %v4667_v41, 0.0 }
 0x9d9   : > { %v4932_v0 = vpop.xlane.xlu1 %2157  ;;  %v4934_v34 = vpop.xlane.xlu2 %2024 }
 0x9da   : > { %5798 = vst [vmem:[#allocation63_spill] sm:$0xff] %v4934_v34  ;;  %v4936_v7 = vpop.xlane.xlu0 %1946 }
 0x9db   : > { %5799 = vst [vmem:[#allocation64_spill] sm:$0xff] %v4936_v7  ;;  %v2255_v7 = vsel %vm2249_vm0, %v4409_v33, 0.0 }
 0x9dc   : > { %v2313_v62 = vsel %vm1881_vm4, %v2255_v7, 0.0  ;;  %v2256_v7 = vsel %vm2249_vm0, %v4426_v40, 0.0  ;;  %v2260_v40 = vsel %vm2249_vm0, %v4601_v47, 0.0  ;;  %v2264_v47 = vsel %vm2249_vm0, %v4817_v17, 0.0 }
 0x9de   : > { %2305 = vadd.xlane.f32.xlu2 %v2304_v22  ;;  %2247 = vadd.xlane.f32.xlu1 %v2246_v63  ;;  %v2310_v22 = vsel %vm1881_vm4, %v2254_v54, 0.0  ;;  %v2307_v63 = vsel %vm1881_vm4, %v2253_v28, 0.0  ;;  %v2322_v54 = vsel %vm1881_vm4, %v2258_v58, 0.0  ;;  %v2319_v28 = vsel %vm1881_vm4, %v2257_v1, 0.0 }
 0x9df   : > { %2244 = vadd.xlane.f32.xlu0 %v2243_v29  ;;  %v2259_v58 = vsel %vm2249_vm0, %v4559_v12, 0.0  ;;  %v2331_v1 = vsel %vm1881_vm4, %v2261_v18, 0.0  ;;  %v2263_v12 = vsel %vm2249_vm0, %v4751_v9, 0.0  ;;  %v2262_v18 = vsel %vm2249_vm0, %v4709_v4, 0.0 }
 0x9e0   : > { %v2267_v9 = vsel %vm2249_vm0, %v4375_v11, 0.0  ;;  %v2266_v4 = vsel %vm2249_vm0, %v4323_v8, 0.0  ;;  %v2270_v8 = vsel %vm2249_vm0, %v4491_v48, 0.0 }
 0x9e1   : > { %v4950_v3 = vpop.xlane.xlu1 %1985  ;;  %v4952_v31 = vpop.xlane.xlu2 %2196 }
 0x9e2   : > { %5800 = vst [vmem:[#allocation65_spill] sm:$0xff] %v4950_v3  ;;  %v4954_v34 = vpop.xlane.xlu0 %2118 }
 0x9e6   : > { %2314 = vadd.xlane.f32.xlu2 %v2313_v62  ;;  %2311 = vadd.xlane.f32.xlu1 %v2310_v22  ;;  %v2316_v62 = vsel %vm1881_vm4, %v2256_v7, 0.0  ;;  %v2328_v7 = vsel %vm1881_vm4, %v2260_v40, 0.0  ;;  %v2340_v40 = vsel %vm1881_vm4, %v2264_v47, 0.0  ;;  %v2265_v47 = vsel %vm2249_vm0, %v4291_v32, 0.0 }
 0x9e7   : > { %2308 = vadd.xlane.f32.xlu0 %v2307_v63  ;;  %v2269_v32 = vsel %vm2249_vm0, %v4445_v52, 0.0  ;;  %v2273_v52 = vsel %vm2249_vm0, %v4623_v15, 0.0 }
 0x9e9   : > { %v4968_v29 = vpop.xlane.xlu1 %1949  ;;  %v4970_v33 = vpop.xlane.xlu2 %2160 }
 0x9ea   : > { %v4972_v3 = vpop.xlane.xlu0 %1910 }
 0x9ee   : > { %2323 = vadd.xlane.f32.xlu2 %v2322_v54  ;;  %2320 = vadd.xlane.f32.xlu1 %v2319_v28  ;;  %v2325_v54 = vsel %vm1881_vm4, %v2259_v58, 0.0  ;;  %v2337_v58 = vsel %vm1881_vm4, %v2263_v12, 0.0  ;;  %v2349_v12 = vsel %vm1881_vm4, %v2267_v9, 0.0  ;;  %v2268_v9 = vsel %vm2249_vm0, %v4393_v26, 0.0 }
 0x9ef   : > { %2317 = vadd.xlane.f32.xlu0 %v2316_v62  ;;  %v2272_v26 = vsel %vm2249_vm0, %v4561_v16, 0.0  ;;  %v2276_v16 = vsel %vm2249_vm0, %v4773_v50, 0.0 }
 0x9f1   : > { %v4986_v22 = vpop.xlane.xlu2 %1988  ;;  %v4988_v45 = vpop.xlane.xlu1 %2121 }
 0x9f2   : > { %5801 = vst [vmem:[#allocation66_spill] sm:$0xff] %v4986_v22  ;;  %v4990_v63 = vpop.xlane.xlu0 %2027 }
 0x9f3   : > { %5802 = vst [vmem:[#allocation67_spill] sm:$0xff] %v4990_v63 }
 0x9f6   : > { %2332 = vadd.xlane.f32.xlu2 %v2331_v1  ;;  %2329 = vadd.xlane.f32.xlu1 %v2328_v7  ;;  %v2334_v1 = vsel %vm1881_vm4, %v2262_v18, 0.0  ;;  %v2346_v18 = vsel %vm1881_vm4, %v2266_v4, 0.0  ;;  %v2358_v4 = vsel %vm1881_vm4, %v2270_v8, 0.0  ;;  %v2271_v8 = vsel %vm2249_vm0, %v4521_v36, 0.0 }
 0x9f7   : > { %2326 = vadd.xlane.f32.xlu0 %v2325_v54  ;;  %v2275_v36 = vsel %vm2249_vm0, %v4711_v55, 0.0 }
 0x9f9   : > { %v5004_v28 = vpop.xlane.xlu2 %1952  ;;  %v5006_v41 = vpop.xlane.xlu1 %1913 }
 0x9fa   : > { %v5008_v62 = vpop.xlane.xlu0 %2199 }
 0x9fe   : > { %2341 = vadd.xlane.f32.xlu2 %v2340_v40  ;;  %2338 = vadd.xlane.f32.xlu1 %v2337_v58  ;;  %v2343_v40 = vsel %vm1881_vm4, %v2265_v47, 0.0  ;;  %v2355_v47 = vsel %vm1881_vm4, %v2269_v32, 0.0  ;;  %v2367_v32 = vsel %vm1881_vm4, %v2273_v52, 0.0  ;;  %v2274_v52 = vsel %vm2249_vm0, %v4665_v39, 0.0 }
 0x9ff   : > { %2335 = vadd.xlane.f32.xlu0 %v2334_v1  ;;  %v2370_v50 = vsel %vm1881_vm4, %v2274_v52, 0.0 }
 0xa01   : > { %v5022_v7 = vpop.xlane.xlu2 %2124  ;;  %v5024_v17 = vpop.xlane.xlu1 %2030 }
 0xa02   : > { %5803 = vst [vmem:[#allocation68_spill] sm:$0xff] %v5024_v17  ;;  %v5026_v54 = vpop.xlane.xlu0 %2163 }
 0xa06   : > { %2350 = vadd.xlane.f32.xlu2 %v2349_v12  ;;  %2347 = vadd.xlane.f32.xlu1 %v2346_v18  ;;  %v2352_v12 = vsel %vm1881_vm4, %v2268_v9, 0.0  ;;  %v2364_v9 = vsel %vm1881_vm4, %v2272_v26, 0.0 }
 0xa07   : > { %2344 = vadd.xlane.f32.xlu0 %v2343_v40 }
 0xa09   : > { %v2203_v58 = vpop.xlane.xlu1 %2202  ;;  %v5040_v1 = vpop.xlane.xlu2 %1916 }
 0xa0a   : > { %v1992_v11 = vpop.xlane.xlu0 %1991  ;;  %v2567_v15 = vrot.slane %v2203_v58, 1 }
 0xa0e   : > { %2359 = vadd.xlane.f32.xlu2 %v2358_v4  ;;  %2356 = vadd.xlane.f32.xlu1 %v2355_v47  ;;  %v2361_v4 = vsel %vm1881_vm4, %v2271_v8, 0.0 }
 0xa0f   : > { %2353 = vadd.xlane.f32.xlu0 %v2352_v12 }
 0xa11   : > { %v2167_v18 = vpop.xlane.xlu1 %2166  ;;  %v5054_v40 = vpop.xlane.xlu2 %2033 }
 0xa12   : > { %v1956_v48 = vpop.xlane.xlu0 %1955 }
 0xa16   : > { %2368 = vadd.xlane.f32.xlu2 %v2367_v32  ;;  %2365 = vadd.xlane.f32.xlu1 %v2364_v9  ;;  %v2376_v32 = vsel %vm1881_vm4, %v2276_v16, 0.0  ;;  %v2373_v9 = vsel %vm1881_vm4, %v2275_v36, 0.0 }
 0xa17   : > { %2362 = vadd.xlane.f32.xlu0 %v2361_v4 }
 0xa19   : > { %v1995_v47 = vpop.xlane.xlu1 %1994  ;;  %v2206_v12 = vpop.xlane.xlu2 %2205 }
 0xa1a   : > { %v5068_v63 = vpop.xlane.xlu0 %2127  ;;  %v2568_v17 = vrot.slane %v2206_v12, 1  ;;  %v2549_v12 = vrot.slane %v2167_v18, 1 }
 0xa1c   : > { %v2569_v26 = vsel %vm2512_vm5, %v2567_v15, %v2568_v17  ;;  %v5080_v8 = vadd.f32 %v2568_v17, %v1995_v47  ;;  %v2279_v17 = vsel %vm2249_vm0, %v4343_v51, 0.0  ;;  %v2277_v47 = vsel %vm2249_vm0, %v4815_v61, 0.0 }
 0xa1d   : > { %v5082_v58 = vadd.f32 %v2569_v26, %v1992_v11  ;;  %v2278_v11 = vsel %vm2249_vm0, %v4310_v42, 0.0  ;;  %v2385_v18 = vsel %vm1881_vm4, %v2279_v17, 0.0  ;;  %v2379_v51 = vsel %vm1881_vm4, %v2277_v47, 0.0 }
 0xa1e   : > { %2377 = vadd.xlane.f32.xlu2 %v2376_v32  ;;  %2374 = vadd.xlane.f32.xlu1 %v2373_v9  ;;  %v2382_v52 = vsel %vm1881_vm4, %v2278_v11, 0.0  ;;  %v5737_v32 = vrot.slane %v4547_v56, 1 }
 0xa1f   : > { %2371 = vadd.xlane.f32.xlu0 %v2370_v50  ;;  %v2280_v50 = vsel %vm2249_vm0, %v4378_v14, 0.0 }
 0xa21   : > { %v1959_v55 = vpop.xlane.xlu1 %1958  ;;  %v2170_v4 = vpop.xlane.xlu2 %2169 }
 0xa22   : > { %v2550_v22 = vrot.slane %v2170_v4, 1  ;;  %v1920_v39 = vpop.xlane.xlu0 %1919 }
 0xa24   : > { %v2551_v15 = vsel %vm2512_vm5, %v2549_v12, %v2550_v22  ;;  %v5097_v16 = vadd.f32 %v2550_v22, %v1959_v55  ;;  %v2282_v22 = vsel %vm2249_vm0, %v4477_v19, 0.0  ;;  %v2388_v19 = vsel %vm1881_vm4, %v2280_v50, 0.0 }
 0xa25   : > { %v5099_v36 = vadd.f32 %v2551_v15, %v1956_v48  ;;  %v2281_v48 = vsel %vm2249_vm0, %v4411_v6, 0.0  ;;  %v2394_v12 = vsel %vm1881_vm4, %v2282_v22, 0.0  ;;  %v2284_v15 = vsel %vm2249_vm0, %v4537_v13, 0.0 }
 0xa26   : > { %2386 = vadd.xlane.f32.xlu2 %v2385_v18  ;;  %2383 = vadd.xlane.f32.xlu1 %v2382_v52  ;;  %v2391_v17 = vsel %vm1881_vm4, %v2281_v48, 0.0  ;;  %v2283_v52 = vsel %vm2249_vm0, %v4507_v37, 0.0 }
 0xa27   : > { %2380 = vadd.xlane.f32.xlu0 %v2379_v51 }
 0xa29   : > { %v1998_v42 = vpop.xlane.xlu2 %1997  ;;  %v2131_v26 = vpop.xlane.xlu1 %2130 }
 0xa2a   : > { %v2531_v61 = vrot.slane %v2131_v26, 1  ;;  %v5105_v9 = vpop.xlane.xlu0 %2036 }
 0xa2c   : > { %v2533_v55 = vsel %vm2512_vm5, %v2531_v61, %v5737_v32  ;;  %v2400_v61 = vsel %vm1881_vm4, %v2284_v15, 0.0 }
 0xa2d   : > { %v5119_v4 = vadd.f32 %v2533_v55, %v1920_v39  ;;  %v2285_v39 = vsel %vm2249_vm0, %v4603_v2, 0.0  ;;  %v2397_v2 = vsel %vm1881_vm4, %v2283_v52, 0.0 }
 0xa2e   : > { %2395 = vadd.xlane.f32.xlu2 %v2394_v12  ;;  %2392 = vadd.xlane.f32.xlu1 %v2391_v17  ;;  %v2403_v26 = vsel %vm1881_vm4, %v2285_v39, 0.0  ;;  %v2288_v12 = vsel %vm2249_vm0, %v4753_v5, 0.0 }
 0xa2f   : > { %2389 = vadd.xlane.f32.xlu0 %v2388_v19  ;;  %v2412_v15 = vsel %vm1881_vm4, %v2288_v12, 0.0 }
 0xa31   : > { %v2215_v6 = vpop.xlane.xlu2 %2214  ;;  %v5124_v11 = vpop.xlane.xlu1 %2211 }
 0xa32   : > { %v5735_v14 = vrot.slane %v5124_v11, 1  ;;  %v2209_v47 = vpop.xlane.xlu0 %2208  ;;  %v2573_v17 = vrot.slane %v2215_v6, 1 }
 0xa33   : > { %v2570_v18 = vrot.slane %v2209_v47, 1  ;;  %v2286_v47 = vsel %vm2249_vm0, %v4645_v30, 0.0 }
 0xa34   : > { %v2406_v6 = vsel %vm1881_vm4, %v2286_v47, 0.0 }
 0xa35   : > { %v2572_v51 = vsel %vm2512_vm5, %v2570_v18, %v5735_v14 }
 0xa36   : > { %v5141_v22 = vadd.f32 %v2572_v51, %v1998_v42  ;;  %2404 = vadd.xlane.f32.xlu2 %v2403_v26  ;;  %2401 = vadd.xlane.f32.xlu1 %v2400_v61  ;;  %v2287_v42 = vsel %vm2249_vm0, %v4687_v38, 0.0  ;;  %v2291_v26 = vsel %vm2249_vm0, %v4312_v43, 0.0  ;;  %v2290_v61 = vsel %vm2249_vm0, %v4837_v23, 0.0 }
 0xa37   : > { %2398 = vadd.xlane.f32.xlu0 %v2397_v2  ;;  %v2409_v38 = vsel %vm1881_vm4, %v2287_v42, 0.0  ;;  %v2421_v42 = vsel %vm1881_vm4, %v2291_v26, 0.0  ;;  %v2293_v26 = vsel %vm2249_vm0, %v4361_v59, 0.0 }
 0xa38   : > { %v2427_v59 = vsel %vm1881_vm4, %v2293_v26, 0.0  ;;  %v2295_v26 = vsel %vm2249_vm0, %v4461_v60, 0.0 }
 0xa39   : > { %v5144_v13 = vpop.xlane.xlu2 %2223  ;;  %v2221_v48 = vpop.xlane.xlu1 %2220 }
 0xa3a   : > { %v5736_v37 = vrot.slane %v5144_v13, 1  ;;  %v2576_v50 = vrot.slane %v2221_v48, 1  ;;  %v5147_v55 = vpop.xlane.xlu0 %2217  ;;  %v5804_v48 = vld [vmem:[#allocation42_spill] sm:$0xff] }
 0xa3b   : > { %v5734_v19 = vrot.slane %v5147_v55, 1 }
 0xa3c   : > { %v5162_v39 = vsel %vm2512_vm5, %v2576_v50, %v5736_v37  ;;  %v2289_v50 = vsel %vm2249_vm0, %v5804_v48, 0.0  ;;  %v2292_v48 = vsel %vm2249_vm0, %v4333_v46, 0.0  ;;  %v5813_v37 = vld [vmem:[#allocation8_spill] sm:$0xff] }
 0xa3d   : > { %v5167_v5 = vsel %vm2512_vm5, %v2573_v17, %v5734_v19  ;;  %v2418_v17 = vsel %vm1881_vm4, %v2290_v61, 0.0  ;;  %v2415_v43 = vsel %vm1881_vm4, %v2289_v50, 0.0 }
 0xa3e   : > { %2413 = vadd.xlane.f32.xlu2 %v2412_v15  ;;  %2410 = vadd.xlane.f32.xlu1 %v2409_v38 }
 0xa3f   : > { %2407 = vadd.xlane.f32.xlu0 %v2406_v6 }
 0xa41   : > { %v2233_v30 = vpop.xlane.xlu2 %2232  ;;  %v5172_v18 = vpop.xlane.xlu1 %2229 }
 0xa42   : > { %v5732_v52 = vrot.slane %v5172_v18, 1  ;;  %v2227_v51 = vpop.xlane.xlu0 %2226  ;;  %v2582_v61 = vrot.slane %v2233_v30, 1  ;;  %v2424_v30 = vsel %vm1881_vm4, %v2292_v48, 0.0 }
 0xa43   : > { %v2579_v2 = vrot.slane %v2227_v51, 1  ;;  %v2294_v51 = vsel %vm2249_vm0, %v4429_v44, 0.0 }
 0xa45   : > { %v5187_v12 = vsel %vm2512_vm5, %v2579_v2, %v5732_v52  ;;  %v5812_v52 = vld [vmem:[#allocation29_spill] sm:$0xff] }
 0xa46   : > { %2422 = vadd.xlane.f32.xlu2 %v2421_v42  ;;  %2419 = vadd.xlane.f32.xlu1 %v2418_v17  ;;  %v2430_v42 = vsel %vm1881_vm4, %v2294_v51, 0.0  ;;  %v2296_v51 = vsel %vm2249_vm0, %v4493_v49, 0.0  ;;  %v2433_v49 = vsel %vm1881_vm4, %v2295_v26, 0.0 }
 0xa47   : > { %2416 = vadd.xlane.f32.xlu0 %v2415_v43 }
 0xa49   : > { %v5192_v23 = vpop.xlane.xlu2 %2241  ;;  %v2239_v47 = vpop.xlane.xlu1 %2238 }
 0xa4a   : > { %v5733_v15 = vrot.slane %v5192_v23, 1  ;;  %v2585_v38 = vrot.slane %v2239_v47, 1  ;;  %v5195_v6 = vpop.xlane.xlu0 %2235 }
 0xa4b   : > { %5805 = vst [vmem:[#allocation42_spill] sm:$0xff] %v5195_v6  ;;  %v5731_v2 = vrot.slane %v5195_v6, 1 }
 0xa4c   : > { %v5210_v50 = vsel %vm2512_vm5, %v2585_v38, %v5733_v15  ;;  %v2297_v38 = vsel %vm2249_vm0, %v4539_v53, 0.0  ;;  %v2516_v15 = vrot.slane %v5812_v52, 1  ;;  %v5815_v52 = vld [vmem:[#allocation17_spill] sm:$0xff] }
 0xa4d   : > { %5806 = vst [vmem:[#allocation69_spill] sm:$0xff] %v5210_v50  ;;  %v5215_v44 = vsel %vm2512_vm5, %v2582_v61, %v5731_v2 }
 0xa4e   : > { %2431 = vadd.xlane.f32.xlu2 %v2430_v42  ;;  %2428 = vadd.xlane.f32.xlu1 %v2427_v59  ;;  %v2439_v59 = vsel %vm1881_vm4, %v2297_v38, 0.0  ;;  %v2298_v38 = vsel %vm2249_vm0, %v4581_v24, 0.0  ;;  %v2302_v24 = vsel %vm2249_vm0, %v4775_v20, 0.0  ;;  %v5809_v20 = vld [vmem:[#allocation16_spill] sm:$0xff] }
 0xa4f   : > { %2425 = vadd.xlane.f32.xlu0 %v2424_v30  ;;  %v2436_v30 = vsel %vm1881_vm4, %v2296_v51, 0.0  ;;  %v2442_v26 = vsel %vm1881_vm4, %v2298_v38, 0.0 }
 0xa51   : > { %v5220_v46 = vpop.xlane.xlu2 %2305  ;;  %v2248_v17 = vpop.xlane.xlu1 %2247 }
 0xa52   : > { %v2589_v43 = vrot.slane %v2248_v17, 1  ;;  %v2245_v47 = vpop.xlane.xlu0 %2244  ;;  %v3820_v17 = vmov 0  }
 0xa53   : > { %v2588_v61 = vrot.slane %v2245_v47, 1  ;;  %3732 = vset.pattern.permute.xlu2 %v3820_v17  ;;  %3730 = vset.pattern.permute.xlu0 %v3820_v17  ;;  %v2300_v47 = vsel %vm2249_vm0, %v4689_v10, 0.0 }
 0xa54   : > { %v5232_v48 = vadd.f32 %v2589_v43, %v5105_v9  ;;  %3731 = vset.pattern.permute.xlu1 %v3820_v17  ;;  %v2448_v51 = vsel %vm1881_vm4, %v2300_v47, 0.0  ;;  %v2454_v17 = vsel %vm1881_vm4, %v2302_v24, 0.0 }
 0xa55   : > { %v2590_v42 = vsel %vm2512_vm5, %v2588_v61, %v2589_v43 }
 0xa56   : > { %5807 = vst [vmem:[#allocation70_spill] sm:$0xff] %v5232_v48  ;;  %v5238_v53 = vadd.f32 %v2590_v42, %v5054_v40  ;;  %2440 = vadd.xlane.f32.xlu2 %v2439_v59  ;;  %2437 = vadd.xlane.f32.xlu1 %v2436_v30  ;;  %v2299_v40 = vsel %vm2249_vm0, %v4625_v21, 0.0  ;;  %v2303_v21 = vsel %vm2249_vm0, %v4839_v25, 0.0  ;;  %v2301_v30 = vsel %vm2249_vm0, %v4731_v57, 0.0 }
 0xa57   : > { %2434 = vadd.xlane.f32.xlu0 %v2433_v49  ;;  %v2445_v61 = vsel %vm1881_vm4, %v2299_v40, 0.0  ;;  %v2457_v49 = vsel %vm1881_vm4, %v2303_v21, 0.0  ;;  %v2451_v47 = vsel %vm1881_vm4, %v2301_v30, 0.0 }
 0xa58   : > { %5808 = vst [vmem:[#allocation71_spill] sm:$0xff] %v5238_v53 }
 0xa59   : > { %v5241_v60 = vpop.xlane.xlu2 %2314  ;;  %v2312_v9 = vpop.xlane.xlu1 %2311 }
 0xa5a   : > { %v2309_v43 = vpop.xlane.xlu0 %2308  ;;  %v2752_v19 = vrot.slane %v5241_v60, 2 }
 0xa5b   : > { %v2749_v24 = vrot.slane %v2309_v43, 2 }
 0xa5e   : > { %2449 = vadd.xlane.f32.xlu2 %v2448_v51  ;;  %2446 = vadd.xlane.f32.xlu1 %v2445_v61  ;;  %v2514_v51 = vrot.slane %v5809_v20, 1  ;;  %v2751_v20 = vrot.slane %v2312_v9, 2  ;;  %v2523_v9 = vrot.slane %v4895_v35, 1  ;;  %v2529_v35 = vrot.slane %v5068_v63, 1 }
 0xa5f   : > { %2443 = vadd.xlane.f32.xlu0 %v2442_v26  ;;  %v5810_v26 = vld [vmem:[#allocation10_spill] sm:$0xff] }
 0xa60   : > { %v2513_v21 = vrot.slane %v5810_v26, 1  ;;  %v2753_v43 = vsel %vm2747_vm1, %v2751_v20, %v2752_v19  ;;  %v2644_v60 = vadd.f32 %v2514_v51, %v5815_v52 }
 0xa61   : > { %v5255_v42 = vpop.xlane.xlu2 %2323  ;;  %v5257_v10 = vpop.xlane.xlu1 %2320 }
 0xa62   : > { %v2318_v59 = vpop.xlane.xlu0 %2317  ;;  %v2515_v30 = vsel %vm2512_vm5, %v2513_v21, %v2514_v51  ;;  %v5814_v21 = vld [vmem:[#allocation19_spill] sm:$0xff]  ;;  %v2755_v50 = vrot.slane %v5257_v10, 2 }
 0xa63   : > { %v2643_v32 = vadd.f32 %v2515_v30, %v5813_v37  ;;  %v2754_v6 = vrot.slane %v2318_v59, 2 }
 0xa65   : > { %v2756_v10 = vsel %vm2747_vm1, %v2754_v6, %v2755_v50 }
 0xa66   : > { %2458 = vadd.xlane.f32.xlu2 %v2457_v49  ;;  %2455 = vadd.xlane.f32.xlu1 %v2454_v17  ;;  %v5811_v17 = vld [vmem:[#allocation33_spill] sm:$0xff] }
 0xa67   : > { %2452 = vadd.xlane.f32.xlu0 %v2451_v47  ;;  %v2517_v2 = vrot.slane %v5811_v17, 1  ;;  %v2748_v47 = vrot.slane %v5220_v46, 2 }
 0xa69   : > { %v5271_v40 = vpop.xlane.xlu2 %2332  ;;  %v5273_v25 = vpop.xlane.xlu1 %2329  ;;  %v2750_v14 = vsel %vm2747_vm1, %v2748_v47, %v2749_v24  ;;  %v2518_v26 = vsel %vm2512_vm5, %v2516_v15, %v2517_v2  ;;  %v5816_v47 = vld [vmem:[#allocation48_spill] sm:$0xff]  ;;  %v2879_v15 = vadd.f32 %v2749_v24, %v2644_v60 }
 0xa6a   : > { %v5275_v38 = vpop.xlane.xlu0 %2326  ;;  %v2878_v27 = vadd.f32 %v2750_v14, %v2643_v32  ;;  %v2645_v46 = vadd.f32 %v2518_v26, %v5814_v21  ;;  %v2520_v37 = vrot.slane %v5816_v47, 1  ;;  %v5817_v32 = vld [vmem:[#allocation37_spill] sm:$0xff]  ;;  %v5818_v26 = vld [vmem:[#allocation56_spill] sm:$0xff] }
 0xa6b   : > { %v2758_v20 = vrot.slane %v5275_v38, 2  ;;  %v2519_v14 = vrot.slane %v5817_v32, 1  ;;  %v2650_v21 = vadd.f32 %v2523_v9, %v5818_v26  ;;  %v2528_v38 = vrot.slane %v5022_v7, 1  ;;  %v5821_v26 = vld [vmem:[#allocation53_spill] sm:$0xff] }
 0xa6c   : > { %v2880_v30 = vadd.f32 %v2753_v43, %v2645_v46 }
 0xa6d   : > { %v2521_v51 = vsel %vm2512_vm5, %v2519_v14, %v2520_v37  ;;  %v2885_v47 = vadd.f32 %v2758_v20, %v2650_v21  ;;  %v2522_v21 = vrot.slane %v5821_v26, 1 }
 0xa71   : > { %v5278_v61 = vpop.xlane.xlu2 %2341  ;;  %v5280_v57 = vpop.xlane.xlu1 %2338 }
 0xa72   : > { %v2336_v49 = vpop.xlane.xlu0 %2335  ;;  %v2764_v59 = vrot.slane %v5280_v57, 2 }
 0xa73   : > { %v2763_v46 = vrot.slane %v2336_v49, 2  ;;  %v2524_v49 = vsel %vm2512_vm5, %v2522_v21, %v2523_v9  ;;  %v2525_v9 = vrot.slane %v4954_v34, 1 }
 0xa75   : > { %v2765_v7 = vsel %vm2747_vm1, %v2763_v46, %v2764_v59  ;;  %v5823_v46 = vld [vmem:[#allocation51_spill] sm:$0xff] }
 0xa79   : > { %v5292_v17 = vpop.xlane.xlu2 %2350  ;;  %v5294_v48 = vpop.xlane.xlu1 %2347 }
 0xa7a   : > { %v5297_v53 = vpop.xlane.xlu0 %2344 }
 0xa7b   : > { %2983 = vperm.xlu0 %3730, %v2878_v27   ;;  %v5819_v27 = vld [vmem:[#allocation28_spill] sm:$0xff]  ;;  %v2767_v26 = vrot.slane %v5297_v53, 2  ;;  %v5828_v53 = vld [vmem:[#allocation61_spill] sm:$0xff] }
 0xa7c   : > { %v2646_v52 = vadd.f32 %v2517_v2, %v5819_v27  ;;  %v2530_v2 = vsel %vm2512_vm5, %v2528_v38, %v2529_v35 }
 0xa7d   : > { %v2653_v6 = vadd.f32 %v2530_v2, %v5006_v41  ;;  %v2526_v41 = vrot.slane %v4988_v45, 1  ;;  %v5826_v45 = vld [vmem:[#allocation38_spill] sm:$0xff] }
 0xa7e   : > { %2989 = vperm.xlu2 %3732, %v2880_v30   ;;  %v5820_v30 = vld [vmem:[#allocation31_spill] sm:$0xff]  ;;  %v2881_v32 = vadd.f32 %v2752_v19, %v2646_v52  ;;  %v5822_v19 = vld [vmem:[#allocation40_spill] sm:$0xff] }
 0xa7f   : > { %2986 = vperm.xlu1 %3731, %v2879_v15   ;;  %v2647_v15 = vadd.f32 %v2521_v51, %v5820_v30  ;;  %v2757_v51 = vrot.slane %v5255_v42, 2  ;;  %v2888_v27 = vadd.f32 %v2765_v7, %v2653_v6  ;;  %v2648_v52 = vadd.f32 %v2520_v37, %v5822_v19  ;;  %v5824_v37 = vld [vmem:[#allocation7_spill] sm:$0xff] }
 0xa80   : > { %v2761_v42 = vrot.slane %v5271_v40, 2  ;;  %v2527_v7 = vsel %vm2512_vm5, %v2525_v9, %v2526_v41  ;;  %v2538_v6 = vrot.slane %v5826_v45, 1 }
 0xa81   : > { %v5309_v43 = vpop.xlane.xlu2 %2359  ;;  %v5311_v24 = vpop.xlane.xlu1 %2356  ;;  %v2882_v14 = vadd.f32 %v2756_v10, %v2647_v15  ;;  %v2759_v10 = vsel %vm2747_vm1, %v2757_v51, %v2758_v20  ;;  %v2649_v15 = vadd.f32 %v2524_v49, %v5823_v46  ;;  %v2883_v2 = vadd.f32 %v2755_v50, %v2648_v52 }
 0xa82   : > { %v2354_v60 = vpop.xlane.xlu0 %2353  ;;  %v5825_v20 = vrot.slane %v4547_v56, 1  ;;  %v2773_v19 = vrot.slane %v5311_v24, 2 }
 0xa83   : > { %3004 = vperm.xlu0 %3730, %v2885_v47   ;;  %v2772_v56 = vrot.slane %v2354_v60, 2  ;;  %v2766_v60 = vrot.slane %v5278_v61, 2 }
 0xa84   : > { %v2656_v21 = vadd.f32 %v5825_v20, %v5824_v37 }
 0xa86   : > { %2992 = vperm.xlu2 %3732, %v2881_v32   ;;  %v2760_v32 = vrot.slane %v5273_v25, 2  ;;  %v2891_v50 = vadd.f32 %v2767_v26, %v2656_v21  ;;  %v5827_v25 = vld [vmem:[#allocation24_spill] sm:$0xff] }
 0xa87   : > { %2995 = vperm.xlu1 %3731, %v2882_v14   ;;  %v2884_v14 = vadd.f32 %v2759_v10, %v2649_v15  ;;  %v2537_v51 = vrot.slane %v5827_v25, 1  ;;  %v2652_v10 = vadd.f32 %v2526_v41, %v4972_v3  ;;  %v2654_v41 = vadd.f32 %v2529_v35, %v5040_v1 }
 0xa88   : > { %v2762_v34 = vsel %vm2747_vm1, %v2760_v32, %v2761_v42  ;;  %v5829_v32 = vld [vmem:[#allocation30_spill] sm:$0xff] }
 0xa89   : > { %v5327_v47 = vpop.xlane.xlu2 %2368  ;;  %v5329_v38 = vpop.xlane.xlu1 %2365  ;;  %v2539_v46 = vsel %vm2512_vm5, %v2537_v51, %v2538_v6  ;;  %v2887_v9 = vadd.f32 %v2761_v42, %v2652_v10  ;;  %v2768_v42 = vsel %vm2747_vm1, %v2766_v60, %v2767_v26  ;;  %v5832_v51 = vld [vmem:[#allocation20_spill] sm:$0xff]  ;;  %v5833_v26 = vld [vmem:[#allocation49_spill] sm:$0xff] }
 0xa8a   : > { %v5333_v30 = vpop.xlane.xlu0 %2362  ;;  %v2534_v61 = vrot.slane %v5832_v51, 1  ;;  %v2890_v63 = vadd.f32 %v2768_v42, %v5119_v4  ;;  %v5836_v42 = vld [vmem:[#allocation43_spill] sm:$0xff] }
 0xa8b   : > { %3013 = vperm.xlu0 %3730, %v2888_v27   ;;  %v2651_v27 = vadd.f32 %v2527_v7, %v5828_v53  ;;  %v5830_v7 = vld [vmem:[#allocation22_spill] sm:$0xff]  ;;  %v2889_v53 = vadd.f32 %v2764_v59, %v2654_v41  ;;  %v2776_v1 = vrot.slane %v5333_v30, 2 }
 0xa8d   : > { %v2886_v15 = vadd.f32 %v2762_v34, %v2651_v27  ;;  %v2535_v34 = vrot.slane %v5830_v7, 1  ;;  %v2770_v27 = vrot.slane %v5292_v17, 2  ;;  %v5834_v17 = vld [vmem:[#allocation12_spill] sm:$0xff]  ;;  %v2540_v7 = vrot.slane %v5836_v42, 1 }
 0xa8e   : > { %2998 = vperm.xlu2 %3732, %v2883_v2   ;;  %v2774_v2 = vsel %vm2747_vm1, %v2772_v56, %v2773_v19  ;;  %v2769_v56 = vrot.slane %v5294_v48, 2  ;;  %v2546_v48 = vrot.slane %v4970_v33, 1 }
 0xa8f   : > { %3001 = vperm.xlu1 %3731, %v2884_v14   ;;  %v2659_v14 = vadd.f32 %v2539_v46, %v5829_v32  ;;  %v2536_v35 = vsel %vm2512_vm5, %v2534_v61, %v2535_v34  ;;  %v2547_v46 = vrot.slane %v5026_v54, 1  ;;  %v5835_v32 = vld [vmem:[#allocation26_spill] sm:$0xff] }
 0xa90   : > { %v5837_v61 = vld [vmem:[#allocation34_spill] sm:$0xff] }
 0xa91   : > { %v5347_v49 = vpop.xlane.xlu2 %2377  ;;  %v5349_v40 = vpop.xlane.xlu1 %2374  ;;  %v2894_v37 = vadd.f32 %v2774_v2, %v2659_v14  ;;  %v2658_v14 = vadd.f32 %v2535_v34, %v5835_v32  ;;  %v2548_v54 = vsel %vm2512_vm5, %v2546_v48, %v2547_v46 }
 0xa92   : > { %v2372_v52 = vpop.xlane.xlu0 %2371  ;;  %v2782_v4 = vrot.slane %v5349_v40, 2  ;;  %v2665_v33 = vadd.f32 %v2548_v54, %v4968_v29  ;;  %v2544_v29 = vrot.slane %v4932_v0, 1  ;;  %v5840_v0 = vld [vmem:[#allocation35_spill] sm:$0xff] }
 0xa93   : > { %3022 = vperm.xlu0 %3730, %v2891_v50   ;;  %v5831_v50 = vld [vmem:[#allocation50_spill] sm:$0xff]  ;;  %v2781_v30 = vrot.slane %v2372_v52, 2  ;;  %v2893_v41 = vadd.f32 %v2770_v27, %v2658_v14  ;;  %v2775_v52 = vrot.slane %v5309_v43, 2  ;;  %v5843_v14 = vld [vmem:[#allocation64_spill] sm:$0xff] }
 0xa94   : > { %v2541_v25 = vrot.slane %v5831_v50, 1  ;;  %v2664_v54 = vadd.f32 %v2544_v29, %v5843_v14 }
 0xa95   : > { %v2783_v50 = vsel %vm2747_vm1, %v2781_v30, %v2782_v4 }
 0xa96   : > { %3007 = vperm.xlu2 %3732, %v2886_v15   ;;  %v2662_v10 = vadd.f32 %v2541_v25, %v5833_v26  ;;  %v2771_v15 = vsel %vm2747_vm1, %v2769_v56, %v2770_v27  ;;  %v2542_v40 = vsel %vm2512_vm5, %v2540_v7, %v2541_v25  ;;  %v2900_v34 = vadd.f32 %v2783_v50, %v2665_v33  ;;  %v5839_v26 = vld [vmem:[#allocation59_spill] sm:$0xff]  ;;  %v5844_v50 = vld [vmem:[#allocation25_spill] sm:$0xff] }
 0xa97   : > { %3010 = vperm.xlu1 %3731, %v2887_v9   ;;  %v2657_v9 = vadd.f32 %v2536_v35, %v5834_v17  ;;  %v2777_v27 = vsel %vm2747_vm1, %v2775_v52, %v2776_v1  ;;  %v2543_v25 = vrot.slane %v5839_v26, 1  ;;  %v2556_v17 = vrot.slane %v5840_v0, 1  ;;  %v5847_v26 = vld [vmem:[#allocation14_spill] sm:$0xff] }
 0xa98   : > { %v2897_v57 = vadd.f32 %v2776_v1, %v2662_v10  ;;  %v2779_v10 = vrot.slane %v5327_v47, 2  ;;  %v5841_v47 = vld [vmem:[#allocation21_spill] sm:$0xff]  ;;  %v2565_v0 = vrot.slane %v5008_v62, 1 }
 0xa99   : > { %v5363_v20 = vpop.xlane.xlu2 %2386  ;;  %v5365_v3 = vpop.xlane.xlu1 %2383  ;;  %v2555_v48 = vrot.slane %v5841_v47, 1 }
 0xa9a   : > { %v5371_v21 = vpop.xlane.xlu0 %2380  ;;  %v2899_v7 = vadd.f32 %v2779_v10, %v2664_v54  ;;  %v5851_v54 = vld [vmem:[#allocation39_spill] sm:$0xff] }
 0xa9b   : > { %3031 = vperm.xlu0 %3730, %v2894_v37   ;;  %v2892_v37 = vadd.f32 %v2771_v15, %v2657_v9  ;;  %v2778_v15 = vrot.slane %v5329_v38, 2  ;;  %v5842_v38 = vld [vmem:[#allocation55_spill] sm:$0xff] }
 0xa9d   : > { %v2780_v9 = vsel %vm2747_vm1, %v2778_v15, %v2779_v10  ;;  %v2788_v10 = vrot.slane %v5363_v20, 2  ;;  %v2787_v15 = vrot.slane %v5365_v3, 2 }
 0xa9e   : > { %3016 = vperm.xlu2 %3732, %v2889_v53   ;;  %v2660_v53 = vadd.f32 %v2538_v6, %v5837_v61  ;;  %v2785_v6 = vrot.slane %v5371_v21, 2  ;;  %v2666_v61 = vadd.f32 %v2547_v46, %v5004_v28  ;;  %v5848_v46 = vld [vmem:[#allocation46_spill] sm:$0xff] }
 0xa9f   : > { %3019 = vperm.xlu1 %3731, %v2890_v63   ;;  %v5838_v63 = vld [vmem:[#allocation45_spill] sm:$0xff] }
 0xaa0   : > { %v2661_v35 = vadd.f32 %v2542_v40, %v5838_v63  ;;  %v2895_v43 = vadd.f32 %v2773_v19, %v2660_v53  ;;  %v2903_v24 = vadd.f32 %v2785_v6, %v5097_v16 }
 0xaa1   : > { %v5386_v59 = vpop.xlane.xlu2 %2395  ;;  %v5392_v60 = vpop.xlane.xlu1 %2392 }
 0xaa2   : > { %v2390_v2 = vpop.xlane.xlu0 %2389  ;;  %v2896_v45 = vadd.f32 %v2777_v27, %v2661_v35  ;;  %v2791_v21 = vrot.slane %v5392_v60, 2  ;;  %v5845_v27 = vld [vmem:[#allocation15_spill] sm:$0xff]  ;;  %v5857_v60 = vld [vmem:[#allocation52_spill] sm:$0xff] }
 0xaa3   : > { %3040 = vperm.xlu0 %3730, %v2897_v57   ;;  %v2545_v57 = vsel %vm2512_vm5, %v2543_v25, %v2544_v29  ;;  %v2790_v32 = vrot.slane %v2390_v2, 2  ;;  %v2784_v2 = vrot.slane %v5347_v49, 2  ;;  %v2553_v63 = vrot.slane %v5845_v27, 1  ;;  %v5846_v35 = vld [vmem:[#allocation47_spill] sm:$0xff] }
 0xaa4   : > { %v2663_v30 = vadd.f32 %v2545_v57, %v5842_v38  ;;  %v2559_v29 = vrot.slane %v5846_v35, 1  ;;  %v2552_v25 = vrot.slane %v5847_v26, 1  ;;  %v5850_v38 = vld [vmem:[#allocation23_spill] sm:$0xff] }
 0xaa5   : > { %v2792_v16 = vsel %vm2747_vm1, %v2790_v32, %v2791_v21  ;;  %v2786_v53 = vsel %vm2747_vm1, %v2784_v2, %v2785_v6  ;;  %v5853_v2 = vld [vmem:[#allocation27_spill] sm:$0xff] }
 0xaa6   : > { %3025 = vperm.xlu2 %3732, %v2892_v37   ;;  %v2898_v42 = vadd.f32 %v2780_v9, %v2663_v30  ;;  %v2902_v49 = vadd.f32 %v2786_v53, %v5099_v36  ;;  %v2554_v28 = vsel %vm2512_vm5, %v2552_v25, %v2553_v63  ;;  %v2674_v6 = vadd.f32 %v2559_v29, %v5848_v46  ;;  %v5849_v36 = vld [vmem:[#allocation9_spill] sm:$0xff] }
 0xaa7   : > { %3028 = vperm.xlu1 %3731, %v2893_v41   ;;  %v2557_v41 = vsel %vm2512_vm5, %v2555_v48, %v2556_v17  ;;  %v2670_v30 = vadd.f32 %v2553_v63, %v5850_v38  ;;  %v5854_v53 = vld [vmem:[#allocation41_spill] sm:$0xff]  ;;  %v5855_v63 = vld [vmem:[#allocation60_spill] sm:$0xff] }
 0xaa8   : > { %v2671_v33 = vadd.f32 %v2557_v41, %v5844_v50  ;;  %v2558_v41 = vrot.slane %v5851_v54, 1  ;;  %v2562_v35 = vrot.slane %v5855_v63, 1  ;;  %v5856_v25 = vld [vmem:[#allocation57_spill] sm:$0xff] }
 0xaa9   : > { %v5400_v51 = vpop.xlane.xlu2 %2404  ;;  %v5416_v1 = vpop.xlane.xlu1 %2401  ;;  %v2905_v14 = vadd.f32 %v2788_v10, %v2670_v30 }
 0xaaa   : > { %v5406_v56 = vpop.xlane.xlu0 %2398  ;;  %v2906_v52 = vadd.f32 %v2792_v16, %v2671_v33 }
 0xaab   : > { %3049 = vperm.xlu0 %3730, %v2900_v34  }
 0xaae   : > { %3034 = vperm.xlu2 %3732, %v2895_v43   ;;  %v2901_v43 = vadd.f32 %v2782_v4, %v2666_v61  ;;  %v2789_v4 = vsel %vm2747_vm1, %v2787_v15, %v2788_v10  ;;  %v2796_v10 = vrot.slane %v5416_v1, 2  ;;  %v5858_v1 = vld [vmem:[#allocation62_spill] sm:$0xff] }
 0xaaf   : > { %3037 = vperm.xlu1 %3731, %v2896_v45   ;;  %v2794_v45 = vrot.slane %v5406_v56, 2  ;;  %v2564_v56 = vrot.slane %v4952_v31, 1  ;;  %v2560_v31 = vsel %vm2512_vm5, %v2558_v41, %v2559_v29 }
 0xab0   : > { %v2673_v27 = vadd.f32 %v2560_v31, %v5854_v53  ;;  %v5861_v31 = vld [vmem:[#allocation36_spill] sm:$0xff] }
 0xab1   : > { %v5422_v19 = vpop.xlane.xlu2 %2413  ;;  %v5433_v40 = vpop.xlane.xlu1 %2410  ;;  %v2909_v9 = vadd.f32 %v2794_v45, %v2674_v6  ;;  %v2566_v32 = vsel %vm2512_vm5, %v2564_v56, %v2565_v0 }
 0xab2   : > { %v2408_v37 = vpop.xlane.xlu0 %2407  ;;  %v2800_v47 = vrot.slane %v5433_v40, 2  ;;  %v2802_v38 = vrot.slane %v5422_v19, 2  ;;  %v5862_v19 = vrot.slane %v5144_v13, 1 }
 0xab3   : > { %3058 = vperm.xlu0 %3730, %v2903_v24   ;;  %v2669_v24 = vadd.f32 %v2554_v28, %v5849_v36  ;;  %v2799_v48 = vrot.slane %v2408_v37, 2  ;;  %v2793_v37 = vrot.slane %v5386_v59, 2  ;;  %v2797_v59 = vrot.slane %v5400_v51, 2 }
 0xab5   : > { %v2904_v62 = vadd.f32 %v2789_v4, %v2669_v24  ;;  %v2795_v61 = vsel %vm2747_vm1, %v2793_v37, %v2794_v45  ;;  %v2798_v45 = vsel %vm2747_vm1, %v2796_v10, %v2797_v59  ;;  %v2686_v37 = vadd.f32 %v5862_v19, %v5861_v31 }
 0xab6   : > { %3043 = vperm.xlu2 %3732, %v2898_v42   ;;  %v2801_v42 = vsel %vm2747_vm1, %v2799_v48, %v2800_v47  ;;  %v2908_v15 = vadd.f32 %v2795_v61, %v2673_v27  ;;  %v5859_v48 = vld [vmem:[#allocation13_spill] sm:$0xff]  ;;  %v5867_v10 = vrot.slane %v5147_v55, 1 }
 0xab7   : > { %3046 = vperm.xlu1 %3731, %v2899_v7   ;;  %v5852_v7 = vld [vmem:[#allocation65_spill] sm:$0xff] }
 0xab8   : > { %v2677_v16 = vadd.f32 %v2566_v32, %v5852_v7 }
 0xab9   : > { %v5436_v34 = vpop.xlane.xlu2 %2422  ;;  %v5453_v20 = vpop.xlane.xlu1 %2419 }
 0xaba   : > { %v5447_v57 = vpop.xlane.xlu0 %2416  ;;  %v2912_v33 = vadd.f32 %v2801_v42, %v2677_v16  ;;  %v2806_v7 = vrot.slane %v5436_v34, 2  ;;  %v2805_v16 = vrot.slane %v5453_v20, 2  ;;  %v5863_v34 = vld [vmem:[#allocation11_spill] sm:$0xff]  ;;  %v5864_v20 = vrot.slane %v5124_v11, 1  ;;  %v5866_v11 = vld [vmem:[#allocation18_spill] sm:$0xff] }
 0xabb   : > { %3067 = vperm.xlu0 %3730, %v2906_v52   ;;  %v2672_v52 = vadd.f32 %v2556_v17, %v5853_v2  ;;  %v2803_v17 = vrot.slane %v5447_v57, 2 }
 0xabc   : > { %v2682_v53 = vadd.f32 %v5864_v20, %v5863_v34  ;;  %v5880_v34 = vld [vmem:[#allocation70_spill] sm:$0xff] }
 0xabd   : > { %v2907_v29 = vadd.f32 %v2791_v21, %v2672_v52  ;;  %v2915_v28 = vadd.f32 %v2803_v17, %v5080_v8  ;;  %v2683_v8 = vadd.f32 %v5167_v5, %v5859_v48  ;;  %v2804_v54 = vsel %vm2747_vm1, %v2802_v38, %v2803_v17  ;;  %v5868_v17 = vld [vmem:[#allocation32_spill] sm:$0xff] }
 0xabe   : > { %3052 = vperm.xlu2 %3732, %v2901_v43   ;;  %v2561_v43 = vrot.slane %v5856_v25, 1  ;;  %v2917_v27 = vadd.f32 %v2806_v7, %v2682_v53 }
 0xabf   : > { %3055 = vperm.xlu1 %3731, %v2902_v49  }
 0xac0   : > { %v2563_v49 = vsel %vm2512_vm5, %v2561_v43, %v2562_v35 }
 0xac1   : > { %v5455_v3 = vpop.xlane.xlu2 %2431  ;;  %v5473_v26 = vpop.xlane.xlu1 %2428  ;;  %v2675_v21 = vadd.f32 %v2563_v49, %v5857_v60  ;;  %v2685_v49 = vadd.f32 %v5162_v39, %v5868_v17 }
 0xac2   : > { %v2426_v50 = vpop.xlane.xlu0 %2425  ;;  %v2809_v51 = vrot.slane %v5473_v26, 2  ;;  %v2811_v25 = vrot.slane %v5455_v3, 2 }
 0xac3   : > { %3076 = vperm.xlu0 %3730, %v2909_v9   ;;  %v2808_v4 = vrot.slane %v2426_v50, 2  ;;  %v2676_v9 = vadd.f32 %v2562_v35, %v5858_v1  ;;  %v2910_v57 = vadd.f32 %v2798_v45, %v2675_v21  ;;  %v2914_v50 = vadd.f32 %v2804_v54, %v5082_v58  ;;  %v5865_v35 = vld [vmem:[#allocation58_spill] sm:$0xff]  ;;  %v5869_v21 = vld [vmem:[#allocation68_spill] sm:$0xff] }
 0xac4   : > { %v2689_v26 = vadd.f32 %v5215_v44, %v5865_v35  ;;  %v5875_v54 = vld [vmem:[#allocation42_spill] sm:$0xff] }
 0xac5   : > { %v2911_v36 = vadd.f32 %v2797_v59, %v2676_v9  ;;  %v2810_v56 = vsel %vm2747_vm1, %v2808_v4, %v2809_v51  ;;  %v5870_v4 = vrot.slane %v5192_v23, 1 }
 0xac6   : > { %3061 = vperm.xlu2 %3732, %v2904_v62   ;;  %v2918_v30 = vadd.f32 %v2810_v56, %v2683_v8  ;;  %v5860_v62 = vld [vmem:[#allocation66_spill] sm:$0xff] }
 0xac7   : > { %3064 = vperm.xlu1 %3731, %v2905_v14   ;;  %v2678_v14 = vadd.f32 %v2565_v0, %v5860_v62  ;;  %v2807_v0 = vsel %vm2747_vm1, %v2805_v16, %v2806_v7  ;;  %v2692_v1 = vadd.f32 %v5870_v4, %v5869_v21  ;;  %v5878_v7 = vld [vmem:[#allocation69_spill] sm:$0xff] }
 0xac8   : > { %v2916_v58 = vadd.f32 %v2807_v0, %v5141_v22 }
 0xac9   : > { %v5467_v40 = vpop.xlane.xlu2 %2440  ;;  %v2438_v24 = vpop.xlane.xlu1 %2437  ;;  %v2913_v42 = vadd.f32 %v2800_v47, %v2678_v14  ;;  %v5874_v14 = vld [vmem:[#allocation63_spill] sm:$0xff] }
 0xaca   : > { %v2435_v46 = vpop.xlane.xlu0 %2434  ;;  %v2815_v44 = vrot.slane %v5467_v40, 2  ;;  %v5872_v40 = vld [vmem:[#allocation54_spill] sm:$0xff] }
 0xacb   : > { %3085 = vperm.xlu0 %3730, %v2912_v33   ;;  %v2812_v5 = vrot.slane %v2435_v46, 2 }
 0xacd   : > { %v2921_v2 = vadd.f32 %v2812_v5, %v2686_v37  ;;  %v2813_v22 = vsel %vm2747_vm1, %v2811_v25, %v2812_v5 }
 0xace   : > { %3070 = vperm.xlu2 %3732, %v2907_v29   ;;  %v2920_v46 = vadd.f32 %v2813_v22, %v2685_v49 }
 0xacf   : > { %3073 = vperm.xlu1 %3731, %v2908_v15   ;;  %v2684_v15 = vadd.f32 %v5867_v10, %v5866_v11 }
 0xad1   : > { %v5484_v6 = vpop.xlane.xlu2 %2449  ;;  %v2447_v33 = vpop.xlane.xlu1 %2446  ;;  %v2919_v45 = vadd.f32 %v2809_v51, %v2684_v15 }
 0xad2   : > { %v2444_v41 = vpop.xlane.xlu0 %2443  ;;  %v2818_v47 = vrot.slane %v2447_v33, 2  ;;  %v2820_v23 = vrot.slane %v5484_v6, 2 }
 0xad3   : > { %3094 = vperm.xlu0 %3730, %v2915_v28   ;;  %v2817_v61 = vrot.slane %v2444_v41, 2  ;;  %v2814_v28 = vrot.slane %v2438_v24, 2  ;;  %v5873_v24 = vrot.slane %v5172_v18, 1 }
 0xad5   : > { %v2819_v13 = vsel %vm2747_vm1, %v2817_v61, %v2818_v47  ;;  %v2816_v55 = vsel %vm2747_vm1, %v2814_v28, %v2815_v44  ;;  %v2688_v56 = vadd.f32 %v5873_v24, %v5872_v40 }
 0xad6   : > { %3079 = vperm.xlu2 %3732, %v2910_v57   ;;  %v2924_v43 = vadd.f32 %v2819_v13, %v2689_v26 }
 0xad7   : > { %3082 = vperm.xlu1 %3731, %v2911_v36   ;;  %v5871_v36 = vld [vmem:[#allocation44_spill] sm:$0xff]  ;;  %v2923_v8 = vadd.f32 %v2815_v44, %v2688_v56 }
 0xad8   : > { %v2687_v51 = vadd.f32 %v5187_v12, %v5871_v36  ;;  %v5876_v12 = vrot.slane %v5875_v54, 1 }
 0xad9   : > { %v5493_v32 = vpop.xlane.xlu2 %2458  ;;  %v2456_v29 = vpop.xlane.xlu1 %2455 }
 0xada   : > { %v2453_v63 = vpop.xlane.xlu0 %2452  ;;  %v2922_v48 = vadd.f32 %v2816_v55, %v2687_v51  ;;  %v2690_v41 = vadd.f32 %v5876_v12, %v5874_v14  ;;  %v2824_v5 = vrot.slane %v5493_v32, 2  ;;  %v2823_v31 = vrot.slane %v2456_v29, 2 }
 0xadb   : > { %3103 = vperm.xlu0 %3730, %v2918_v30   ;;  %v2821_v3 = vrot.slane %v2453_v63, 2 }
 0xadc   : > { %v2825_v6 = vsel %vm2747_vm1, %v2823_v31, %v2824_v5  ;;  %v2929_v20 = vadd.f32 %v2824_v5, %v5880_v34 }
 0xadd   : > { %v2927_v9 = vadd.f32 %v2821_v3, %v2692_v1  ;;  %v2822_v18 = vsel %vm2747_vm1, %v2820_v23, %v2821_v3 }
 0xade   : > { %3088 = vperm.xlu2 %3732, %v2913_v42   ;;  %v5877_v42 = vld [vmem:[#allocation67_spill] sm:$0xff] }
 0xadf   : > { %3091 = vperm.xlu1 %3731, %v2914_v50   ;;  %v2691_v16 = vadd.f32 %v5878_v7, %v5877_v42  ;;  %v2925_v50 = vadd.f32 %v2818_v47, %v2690_v41 }
 0xae1   : > { %v5504_v52 = vpop.permute.xlu2 %2989  ;;  %v2926_v19 = vadd.f32 %v2822_v18, %v2691_v16 }
 0xae3   : > { %3112 = vperm.xlu0 %3730, %v2921_v2   ;;  %v5879_v2 = vld [vmem:[#allocation71_spill] sm:$0xff] }
 0xae4   : > { %v2928_v61 = vadd.f32 %v2825_v6, %v5879_v2 }
 0xae6   : > { %3097 = vperm.xlu2 %3732, %v2916_v58  }
 0xae7   : > { %3100 = vperm.xlu1 %3731, %v2917_v27   ;;  %v5881_v27 = vld [vmem:[#allocation6_spill] sm:$0xff] }
 0xae8   : > { %v5560_v63 = vadd.s32 4294967288, %v5881_v27  ;;  %v3143_v11 = vperm.slane %v5504_v52, %v5881_v27 }
 0xae9   : > { %v5514_v59 = vpop.permute.xlu2 %2992 }
 0xaea   : > { %v3144_v25 = vperm.slane %v5514_v59, %v5560_v63 }
 0xaeb   : > { %3121 = vperm.xlu0 %3730, %v2924_v43  }
 0xaec   : > { %v3145_v15 = vsel %vm3141_vm6, %v3144_v25, %v3143_v11 }
 0xaed   : > { %v2984_v60 = vpop.permute.xlu0 %2983 }
 0xaee   : > { %3106 = vperm.xlu2 %3732, %v2919_v45   ;;  %v3138_v43 = vperm.slane %v2984_v60, %v5881_v27 }
 0xaef   : > { %3109 = vperm.xlu1 %3731, %v2920_v46  }
 0xaf1   : > { %v5527_v57 = vpop.permute.xlu2 %2998  ;;  %v2987_v39 = vpop.permute.xlu1 %2986 }
 0xaf2   : > { %v3140_v26 = vperm.slane %v2987_v39, %v5560_v63  ;;  %v3147_v24 = vperm.slane %v5527_v57, %v5560_v63 }
 0xaf3   : > { %3130 = vperm.xlu0 %3730, %v2927_v9  }
 0xaf4   : > { %v3142_v10 = vsel %vm3141_vm6, %v3140_v26, %v3138_v43 }
 0xaf5   : > { %v5534_v38 = vpop.permute.xlu0 %3004  ;;  %v3219_v49 = vsel %vm3218_vm7, %v3145_v15, %v3142_v10 }
 0xaf6   : > { %3115 = vperm.xlu2 %3732, %v2922_v48   ;;  %v3246_v45 = vsel %vm3245_vm8, %v3219_v49, -inf  ;;  %v3150_v36 = vperm.slane %v5534_v38, %v5560_v63 }
 0xaf7   : > { %3118 = vperm.xlu1 %3731, %v2923_v8  }
 0xaf9   : > { %v5537_v30 = vpop.permute.xlu2 %3007  ;;  %v5539_v62 = vpop.permute.xlu1 %2995 }
 0xafa   : > { %v3146_v55 = vperm.slane %v5539_v62, %v5881_v27  ;;  %v3152_v56 = vperm.slane %v5537_v30, %v5881_v27 }
 0xafc   : > { %v3148_v54 = vsel %vm3141_vm6, %v3147_v24, %v3146_v55 }
 0xafd   : > { %v5548_v37 = vpop.permute.xlu0 %3013 }
 0xafe   : > { %3124 = vperm.xlu2 %3732, %v2925_v50   ;;  %v3155_v38 = vperm.slane %v5548_v37, %v5881_v27 }
 0xaff   : > { %3127 = vperm.xlu1 %3731, %v2926_v19  }
 0xb01   : > { %v5551_v33 = vpop.permute.xlu2 %3016  ;;  %v3002_v0 = vpop.permute.xlu1 %3001 }
 0xb02   : > { %v3149_v21 = vperm.slane %v3002_v0, %v5881_v27  ;;  %v3156_v48 = vperm.slane %v5551_v33, %v5560_v63 }
 0xb04   : > { %v3151_v23 = vsel %vm3141_vm6, %v3150_v36, %v3149_v21  ;;  %v3157_v50 = vsel %vm3141_vm6, %v3156_v48, %v3155_v38 }
 0xb05   : > { %v5555_v53 = vpop.permute.xlu0 %3022  ;;  %v3220_v18 = vsel %vm3218_vm7, %v3151_v23, %v3148_v54 }
 0xb06   : > { %3133 = vperm.xlu2 %3732, %v2928_v61   ;;  %v3249_v33 = vsel %vm3245_vm8, %v3220_v18, -inf  ;;  %v3159_v2 = vperm.slane %v5555_v53, %v5560_v63 }
 0xb07   : > { %3136 = vperm.xlu1 %3731, %v2929_v20  }
 0xb09   : > { %v5557_v32 = vpop.permute.xlu2 %3025  ;;  %v3011_v47 = vpop.permute.xlu1 %3010 }
 0xb0a   : > { %v3153_v51 = vperm.slane %v3011_v47, %v5560_v63  ;;  %v3161_v37 = vperm.slane %v5557_v32, %v5881_v27 }
 0xb0c   : > { %v3154_v41 = vsel %vm3141_vm6, %v3153_v51, %v3152_v56 }
 0xb0d   : > { %v3032_v58 = vpop.permute.xlu0 %3031  ;;  %v3221_v19 = vsel %vm3218_vm7, %v3157_v50, %v3154_v41 }
 0xb0e   : > { %v3164_v52 = vperm.slane %v3032_v58, %v5881_v27  ;;  %v3252_v61 = vsel %vm3245_vm8, %v3221_v19, -inf }
 0xb11   : > { %v3035_v13 = vpop.permute.xlu2 %3034  ;;  %v5562_v35 = vpop.permute.xlu1 %3019 }
 0xb12   : > { %v3165_v44 = vperm.slane %v3035_v13, %v5560_v63  ;;  %v3158_v6 = vperm.slane %v5562_v35, %v5881_v27 }
 0xb14   : > { %v3166_v4 = vsel %vm3141_vm6, %v3165_v44, %v3164_v52  ;;  %v3160_v32 = vsel %vm3141_vm6, %v3159_v2, %v3158_v6 }
 0xb15   : > { %v3041_v29 = vpop.permute.xlu0 %3040 }
 0xb16   : > { %v3168_v3 = vperm.slane %v3041_v29, %v5560_v63 }
 0xb19   : > { %v3044_v22 = vpop.permute.xlu2 %3043  ;;  %v3029_v17 = vpop.permute.xlu1 %3028 }
 0xb1a   : > { %v3170_v57 = vperm.slane %v3044_v22, %v5881_v27  ;;  %v3162_v42 = vperm.slane %v3029_v17, %v5560_v63 }
 0xb1c   : > { %v3163_v34 = vsel %vm3141_vm6, %v3162_v42, %v3161_v37 }
 0xb1d   : > { %3247 = vmax.xlane.f32.xlu0 %v3246_v45  ;;  %v3050_v59 = vpop.permute.xlu0 %3049  ;;  %v3222_v58 = vsel %vm3218_vm7, %v3163_v34, %v3160_v32 }
 0xb1e   : > { %v3173_v12 = vperm.slane %v3050_v59, %v5881_v27  ;;  %v3255_v35 = vsel %vm3245_vm8, %v3222_v58, -inf }
 0xb21   : > { %v3053_v28 = vpop.permute.xlu2 %3052  ;;  %v3038_v46 = vpop.permute.xlu1 %3037 }
 0xb22   : > { %v3167_v60 = vperm.slane %v3038_v46, %v5881_v27  ;;  %v3174_v8 = vperm.slane %v3053_v28, %v5560_v63 }
 0xb24   : > { %v3169_v1 = vsel %vm3141_vm6, %v3168_v3, %v3167_v60  ;;  %v3175_v16 = vsel %vm3141_vm6, %v3174_v8, %v3173_v12 }
 0xb25   : > { %v5583_v9 = vpop.permute.xlu0 %3058  ;;  %v3223_v39 = vsel %vm3218_vm7, %v3169_v1, %v3166_v4 }
 0xb26   : > { %v3258_v40 = vsel %vm3245_vm8, %v3223_v39, -inf }
 0xb27   : > { %3259 = vmax.xlane.f32.xlu0 %v3258_v40 }
 0xb29   : > { %v5600_v62 = vpop.permute.xlu2 %3061  ;;  %v3047_v14 = vpop.permute.xlu1 %3046 }
 0xb2a   : > { %v3171_v30 = vperm.slane %v3047_v14, %v5560_v63  ;;  %v3179_v8 = vperm.slane %v5600_v62, %v5881_v27  ;;  %v3177_v14 = vperm.slane %v5583_v9, %v5560_v63 }
 0xb2c   : > { %v3172_v7 = vsel %vm3141_vm6, %v3171_v30, %v3170_v57 }
 0xb2d   : > { %v5612_v5 = vpop.permute.xlu0 %3067  ;;  %v3224_v31 = vsel %vm3218_vm7, %v3175_v16, %v3172_v7 }
 0xb2e   : > { %v3261_v0 = vsel %vm3245_vm8, %v3224_v31, -inf  ;;  %v3182_v2 = vperm.slane %v5612_v5, %v5881_v27 }
 0xb2f   : > { %3250 = vmax.xlane.f32.xlu2 %v3249_v33  ;;  %3262 = vmax.xlane.f32.xlu0 %v3261_v0 }
 0xb31   : > { %v5626_v20 = vpop.permute.xlu2 %3070  ;;  %v3056_v47 = vpop.permute.xlu1 %3055  ;;  %3253 = vmax.xlane.f32.xlu1 %v3252_v61 }
 0xb32   : > { %v3176_v23 = vperm.slane %v3056_v47, %v5881_v27  ;;  %v3183_v19 = vperm.slane %v5626_v20, %v5560_v63 }
 0xb34   : > { %v3178_v62 = vsel %vm3141_vm6, %v3177_v14, %v3176_v23 }
 0xb35   : > { %v5630_v13 = vpop.permute.xlu0 %3076 }
 0xb36   : > { %v3186_v37 = vperm.slane %v5630_v13, %v5560_v63  ;;  %v3184_v13 = vsel %vm3141_vm6, %v3183_v19, %v3182_v2 }
 0xb37   : > { %3256 = vmax.xlane.f32.xlu2 %v3255_v35 }
 0xb39   : > { %v3080_v26 = vpop.permute.xlu2 %3079  ;;  %v3065_v25 = vpop.permute.xlu1 %3064 }
 0xb3a   : > { %v3188_v17 = vperm.slane %v3080_v26, %v5881_v27  ;;  %v3180_v51 = vperm.slane %v3065_v25, %v5560_v63 }
 0xb3c   : > { %v3181_v57 = vsel %vm3141_vm6, %v3180_v51, %v3179_v8 }
 0xb3d   : > { %v3086_v53 = vpop.permute.xlu0 %3085  ;;  %v3225_v42 = vsel %vm3218_vm7, %v3181_v57, %v3178_v62 }
 0xb3e   : > { %v3191_v49 = vperm.slane %v3086_v53, %v5881_v27  ;;  %v3264_v6 = vsel %vm3245_vm8, %v3225_v42, -inf }
 0xb41   : > { %v3089_v43 = vpop.permute.xlu2 %3088  ;;  %v3074_v29 = vpop.permute.xlu1 %3073 }
 0xb42   : > { %v3192_v11 = vperm.slane %v3089_v43, %v5560_v63  ;;  %v3185_v7 = vperm.slane %v3074_v29, %v5881_v27 }
 0xb44   : > { %v3193_v44 = vsel %vm3141_vm6, %v3192_v11, %v3191_v49  ;;  %v3187_v34 = vsel %vm3141_vm6, %v3186_v37, %v3185_v7 }
 0xb45   : > { %v3095_v10 = vpop.permute.xlu0 %3094  ;;  %v3226_v35 = vsel %vm3218_vm7, %v3187_v34, %v3184_v13 }
 0xb46   : > { %v3195_v1 = vperm.slane %v3095_v10, %v5560_v63  ;;  %v3267_v53 = vsel %vm3245_vm8, %v3226_v35, -inf }
 0xb49   : > { %v3098_v15 = vpop.permute.xlu2 %3097  ;;  %v3083_v22 = vpop.permute.xlu1 %3082 }
 0xb4a   : > { %v3189_v45 = vperm.slane %v3083_v22, %v5560_v63  ;;  %v3197_v55 = vperm.slane %v3098_v15, %v5881_v27 }
 0xb4c   : > { %v3190_v59 = vsel %vm3141_vm6, %v3189_v45, %v3188_v17 }
 0xb4d   : > { %v3227_v28 = vsel %vm3218_vm7, %v3193_v44, %v3190_v59  ;;  %v3104_v60 = vpop.permute.xlu0 %3103 }
 0xb4e   : > { %v3270_v46 = vsel %vm3245_vm8, %v3227_v28, -inf  ;;  %v3200_v30 = vperm.slane %v3104_v60, %v5881_v27 }
 0xb4f   : > { %3271 = vmax.xlane.f32.xlu1 %v3270_v46 }
 0xb51   : > { %v3107_v52 = vpop.permute.xlu2 %3106  ;;  %v3092_v3 = vpop.permute.xlu1 %3091 }
 0xb52   : > { %v3194_v21 = vperm.slane %v3092_v3, %v5881_v27  ;;  %v3201_v54 = vperm.slane %v3107_v52, %v5560_v63 }
 0xb54   : > { %v3196_v40 = vsel %vm3141_vm6, %v3195_v1, %v3194_v21  ;;  %v3202_v16 = vsel %vm3141_vm6, %v3201_v54, %v3200_v30 }
 0xb55   : > { %v3113_v56 = vpop.permute.xlu0 %3112 }
 0xb56   : > { %v3204_v41 = vperm.slane %v3113_v56, %v5560_v63 }
 0xb59   : > { %v3101_v4 = vpop.permute.xlu1 %3100  ;;  %v3116_v36 = vpop.permute.xlu2 %3115 }
 0xb5a   : > { %v3198_v39 = vperm.slane %v3101_v4, %v5560_v63  ;;  %v3206_v20 = vperm.slane %v3116_v36, %v5881_v27 }
 0xb5c   : > { %v3199_v24 = vsel %vm3141_vm6, %v3198_v39, %v3197_v55 }
 0xb5d   : > { %v3228_v48 = vsel %vm3218_vm7, %v3199_v24, %v3196_v40  ;;  %v3122_v0 = vpop.permute.xlu0 %3121 }
 0xb5e   : > { %v3273_v38 = vsel %vm3245_vm8, %v3228_v48, -inf  ;;  %v3209_v32 = vperm.slane %v3122_v0, %v5881_v27 }
 0xb5f   : > { %3274 = vmax.xlane.f32.xlu2 %v3273_v38 }
 0xb61   : > { %v3110_v12 = vpop.permute.xlu1 %3109  ;;  %v3125_v50 = vpop.permute.xlu2 %3124 }
 0xb62   : > { %v3203_v18 = vperm.slane %v3110_v12, %v5881_v27  ;;  %v3210_v61 = vperm.slane %v3125_v50, %v5560_v63 }
 0xb64   : > { %v3205_v9 = vsel %vm3141_vm6, %v3204_v41, %v3203_v18  ;;  %v3211_v25 = vsel %vm3141_vm6, %v3210_v61, %v3209_v32 }
 0xb65   : > { %v3229_v31 = vsel %vm3218_vm7, %v3205_v9, %v3202_v16  ;;  %v3131_v11 = vpop.permute.xlu0 %3130 }
 0xb66   : > { %v3276_v33 = vsel %vm3245_vm8, %v3229_v31, -inf  ;;  %v3213_v17 = vperm.slane %v3131_v11, %v5560_v63 }
 0xb67   : > { %3265 = vmax.xlane.f32.xlu2 %v3264_v6  ;;  %3277 = vmax.xlane.f32.xlu1 %v3276_v33 }
 0xb69   : > { %v3119_v47 = vpop.permute.xlu1 %3118  ;;  %v3134_v10 = vpop.permute.xlu2 %3133 }
 0xb6a   : > { %v3207_v58 = vperm.slane %v3119_v47, %v5560_v63  ;;  %v3215_v49 = vperm.slane %v3134_v10, %v5881_v27 }
 0xb6c   : > { %v3208_v26 = vsel %vm3141_vm6, %v3207_v58, %v3206_v20 }
 0xb6d   : > { %v3230_v5 = vsel %vm3218_vm7, %v3211_v25, %v3208_v26 }
 0xb6e   : > { %v3279_v43 = vsel %vm3245_vm8, %v3230_v5, -inf }
 0xb6f   : > { %3268 = vmax.xlane.f32.xlu1 %v3267_v53  ;;  %3280 = vmax.xlane.f32.xlu0 %v3279_v43 }
 0xb71   : > { %v3128_v29 = vpop.permute.xlu1 %3127 }
 0xb72   : > { %v3212_v15 = vperm.slane %v3128_v29, %v5881_v27 }
 0xb74   : > { %v3214_v59 = vsel %vm3141_vm6, %v3213_v17, %v3212_v15 }
 0xb79   : > { %v3137_v22 = vpop.permute.xlu1 %3136 }
 0xb7a   : > { %v3216_v45 = vperm.slane %v3137_v22, %v5560_v63 }
 0xb7c   : > { %v3217_v44 = vsel %vm3141_vm6, %v3216_v45, %v3215_v49 }
 0xb7d   : > { %v3231_v28 = vsel %vm3218_vm7, %v3217_v44, %v3214_v59 }
 0xb7e   : > { %v3282_v46 = vsel %vm3245_vm8, %v3231_v28, -inf }
 0xb7f   : > { %3283 = vmax.xlane.f32.xlu2 %v3282_v46 }
 0xb90   : > { %v3248_v21 = vpop.xlane.xlu0 %3247 }
 0xb91   : > { %v3298_v63 = vperm.slane %v3248_v21, %v5881_v27 }
 0xb9a   : > { %v3260_v55 = vpop.xlane.xlu0 %3259 }
 0xb9b   : > { %v3302_v23 = vperm.slane %v3260_v55, %v5881_v27 }
 0xba2   : > { %v3251_v52 = vpop.xlane.xlu2 %3250  ;;  %v3263_v38 = vpop.xlane.xlu0 %3262 }
 0xba3   : > { %v3299_v39 = vperm.slane %v3251_v52, %v5881_v27  ;;  %v3303_v57 = vperm.slane %v3263_v38, %v5881_v27 }
 0xba4   : > { %v3254_v3 = vpop.xlane.xlu1 %3253 }
 0xba5   : > { %v3300_v36 = vperm.slane %v3254_v3, %v5881_v27  ;;  %v3311_v51 = vsel %vm3218_vm7, %v3299_v39, %v3298_v63 }
 0xba7   : > { %v3313_v56 = vsel %vm3312_vm9, %v3300_v36, %v3311_v51 }
 0xbaa   : > { %v3257_v60 = vpop.xlane.xlu2 %3256 }
 0xbab   : > { %v3301_v40 = vperm.slane %v3257_v60, %v5881_v27 }
 0xbad   : > { %v3315_v48 = vsel %vm3314_vm10, %v3301_v40, %v3313_v56 }
 0xbae   : > { %v3317_v14 = vsel %vm3316_vm11, %v3302_v23, %v3315_v48 }
 0xbaf   : > { %v3319_v30 = vsel %vm3318_vm12, %v3303_v57, %v3317_v14 }
 0xbc2   : > { %v3272_v4 = vpop.xlane.xlu1 %3271 }
 0xbc3   : > { %v3306_v9 = vperm.slane %v3272_v4, %v5881_v27 }
 0xbd2   : > { %v3275_v1 = vpop.xlane.xlu2 %3274 }
 0xbd3   : > { %v3307_v7 = vperm.slane %v3275_v1, %v5881_v27 }
 0xbd5   : > { %v3324_v31 = vsel %vm3218_vm7, %v3307_v7, %v3306_v9 }
 0xbda   : > { %v3278_v24 = vpop.xlane.xlu1 %3277  ;;  %v3266_v8 = vpop.xlane.xlu2 %3265 }
 0xbdb   : > { %v3304_v54 = vperm.slane %v3266_v8, %v5881_v27  ;;  %v3308_v16 = vperm.slane %v3278_v24, %v5881_v27 }
 0xbdd   : > { %v3321_v18 = vsel %vm3320_vm13, %v3304_v54, %v3319_v30  ;;  %v3325_v37 = vsel %vm3312_vm9, %v3308_v16, %v3324_v31 }
 0xbe2   : > { %v3269_v12 = vpop.xlane.xlu1 %3268  ;;  %v3281_v42 = vpop.xlane.xlu0 %3280 }
 0xbe3   : > { %v3305_v41 = vperm.slane %v3269_v12, %v5881_v27  ;;  %v3309_v50 = vperm.slane %v3281_v42, %v5881_v27 }
 0xbe5   : > { %v3323_v62 = vsel %vm3322_vm14, %v3305_v41, %v3321_v18  ;;  %v3326_v33 = vsel %vm3314_vm10, %v3309_v50, %v3325_v37 }
 0xbe6   : > { %3331 = vst.msk [vmem:[%s3880_s19] sm:$0xff] %vm3330_vm15, %v3323_v62 }
 0xbf2   : > { %v3284_v19 = vpop.xlane.xlu2 %3283 }
 0xbf3   : > { %v3310_v6 = vperm.slane %v3284_v19, %v5881_v27 }
 0xbf5   : > { %v3327_v0 = vsel %vm3316_vm11, %v3310_v6, %v3326_v33 }
 0xbf6   : > { %3333 = vst.msk [vmem:[%s3880_s19 + $0x8] sm:$0x1f] %vm3332_vm2, %v3327_v0 }
 0xbf7 PF: > { %s19_s27 = sadd.s32 1, %s3793_s27  }
 0xbf8   : > { %p16_p9 = scmp.ge.s32.totalorder %s19_s27, 4  }
 0xbfa   :  { %18 = sbr.rel (!%p16_p9) target bundleno = 1 (0x1), region = 114 }
 0xbff   :  { %3355 = vsyncpa [#allocation4], 1 }
 0xc00   :  { %3357 = vsyncpa [#allocation4 + $0x1], 1 }

</bundles_post_ra>
